<compile_context>
chip_gen: v7x
topology: tpu7x:2x2x1
jax: 0.10.0
libtpu: 0.0.40
codegen_flags: <defaults>
</compile_context>

<pallas_src>
import numpy as np
import jax
import jax.numpy as jnp
from jax.experimental import pallas as pl
from jax.experimental.pallas import tpu as pltpu


# ----------------------------- model constants ------------------------------
C1_K     = 896             # conv1 contraction: 28*28 = 784 pixels padded to 7*128
C1_BLK   = 896             # conv1 pooled features 12*12*6 = 864, padded to 7*128
C2_BLK   = 256             # conv2 pooled features  4*4*12 = 192, padded to 2*128
C3_OUT   = 64              # conv3 features 2*2*16 (= fc fan-in)
POOL_OFF = (0, 1, 28, 29)  # input-row shift of the 4 conv1 2x2-pool positions


# ------------------------- host-side parameter prep -------------------------
def build_conv1_block(w):
    """Single pool-position (py=px=0) Toeplitz block for conv1 (Cin = 1).

    rows : input pixel index h*28 + w            (784 used, padded to C1_K)
    cols : (hp*12 + wp)*6 + co                   (864 used, padded to C1_BLK)
    The other 3 pool positions reuse this block with the input rows shifted by
    POOL_OFF (shifted copies are built on the host from the tiny image).
    """
    Cout, Cin, KH, KW = w.shape                  # (6, 1, 5, 5)
    assert Cin == 1
    T = np.zeros((C1_K, C1_BLK), np.float32)
    for hp in range(12):
        for wp in range(12):
            col0 = (hp * 12 + wp) * Cout
            for dy in range(KH):
                for dx in range(KW):
                    row = (2 * hp + dy) * 28 + (2 * wp + dx)
                    T[row, col0:col0 + Cout] = w[:, 0, dy, dx]
    return T


def build_conv_matrix(w, H, W, pool, in_rows, out_block):
    """Expand a conv (+ optional 2x2/2 max-pool grouping) into a dense matrix.

    Input lane order : (h, w, ci) row-major.
    Output lane order: (pool_pos, hp, wp, co)    (pool_pos = py*2 + px).
    """
    Cout, Cin, KH, KW = w.shape
    Ho, Wo = H - KH + 1, W - KW + 1
    if pool:
        Hp, Wp, npos = Ho // 2, Wo // 2, 4
    else:
        Hp, Wp, npos = Ho, Wo, 1
    assert in_rows >= H * W * Cin and out_block >= Hp * Wp * Cout
    T = np.zeros((in_rows, npos * out_block), np.float32)
    for pos in range(npos):
        py, px = (pos // 2, pos % 2) if pool else (0, 0)
        for hp in range(Hp):
            for wp in range(Wp):
                ho, wo = (2 * hp + py, 2 * wp + px) if pool else (hp, wp)
                col0 = pos * out_block + (hp * Wp + wp) * Cout
                for dy in range(KH):
                    for dx in range(KW):
                        for ci in range(Cin):
                            row = ((ho + dy) * W + (wo + dx)) * Cin + ci
                            T[row, col0:col0 + Cout] = w[:, ci, dy, dx]
    return T


def _check_conv1_block(T, w, rng):
    """Host-side self-check of the shared conv1 block + shifted-row reuse."""
    a = rng.standard_normal((28, 28)).astype(np.float32)
    full = np.zeros((24, 24, 6), np.float32)
    for dy in range(5):
        for dx in range(5):
            full += a[dy:dy + 24, dx:dx + 24, None] * w[:, 0, dy, dx][None, None, :]
    a_pad = np.zeros(C1_K + 32, np.float32)
    a_pad[:784] = a.reshape(-1)
    for pos, off in enumerate(POOL_OFF):
        py, px = pos // 2, pos % 2
        got = a_pad[off:off + C1_K] @ T
        want = full[py::2, px::2, :].reshape(-1)
        np.testing.assert_allclose(got[:864], want, rtol=1e-4, atol=1e-4)


def _check_conv_matrix(T, w, H, W, pool, rng):
    """Host-side self-check: T must reproduce a direct shift-and-add conv."""
    Cout, Cin, KH, KW = w.shape
    Ho, Wo = H - KH + 1, W - KW + 1
    a = rng.standard_normal((H, W, Cin)).astype(np.float32)
    full = np.zeros((Ho, Wo, Cout), np.float32)
    for dy in range(KH):
        for dx in range(KW):
            full += a[dy:dy + Ho, dx:dx + Wo, :] @ w[:, :, dy, dx].T
    a_row = np.zeros((1, T.shape[0]), np.float32)
    a_row[0, :H * W * Cin] = a.reshape(-1)
    got = (a_row @ T)[0]
    blk = T.shape[1] // (4 if pool else 1)
    if pool:
        Hp, Wp = Ho // 2, Wo // 2
        for pos in range(4):
            py, px = pos // 2, pos % 2
            want = full[py::2, px::2, :].reshape(-1)
            np.testing.assert_allclose(
                got[pos * blk:pos * blk + Hp * Wp * Cout], want,
                rtol=1e-4, atol=1e-4)
    else:
        np.testing.assert_allclose(got[:Ho * Wo * Cout], full.reshape(-1),
                                   rtol=1e-4, atol=1e-4)


def init_params(seed=0):
    """Synthetic torch-default-style parameters, pre-expanded for the kernel."""
    rng = np.random.default_rng(seed)

    def unif(shape, fan_in):
        b = 1.0 / np.sqrt(fan_in)
        return rng.uniform(-b, b, size=shape).astype(np.float32)

    # raw parameters in torch layout
    w1, b1 = unif((6, 1, 5, 5), 25), unif((6,), 25)
    w2, b2 = unif((12, 6, 5, 5), 150), unif((12,), 150)
    w3, b3 = unif((16, 12, 3, 3), 108), unif((16,), 108)
    fw1, fb1 = unif((120, 64), 64), unif((120,), 64)
    fw2, fb2 = unif((60, 120), 120), unif((60,), 120)
    fw3, fb3 = unif((10, 60), 60), unif((10,), 60)

    # conv -> dense matmul expansion (built once, amortized across calls)
    t1 = build_conv1_block(w1)                                   # (896, 896)
    t2 = build_conv_matrix(w2, 12, 12, True, C1_BLK, C2_BLK)     # (896, 1024)
    t3 = build_conv_matrix(w3, 4, 4, False, C2_BLK, C3_OUT)      # (256, 64)
    chk = np.random.default_rng(seed + 1)
    _check_conv1_block(t1, w1, chk)
    _check_conv_matrix(t2, w2, 12, 12, True, chk)
    _check_conv_matrix(t3, w3, 4, 4, False, chk)

    # biases broadcast over (hp, wp); padded lanes stay 0
    b1r = np.zeros((1, C1_BLK), np.float32); b1r[0, :864] = np.tile(b1, 144)
    b2r = np.zeros((1, C2_BLK), np.float32); b2r[0, :192] = np.tile(b2, 16)
    b3r = np.tile(b3, 4)[None, :].astype(np.float32)             # (1, 64)

    # fc1 rows permuted from torch's (c, h, w) flatten to this kernel's (h, w, c)
    h_i, w_i, c_i = np.meshgrid(np.arange(2), np.arange(2), np.arange(16),
                                indexing="ij")
    torch_idx = (c_i * 4 + h_i * 2 + w_i).reshape(-1)
    fw1p = fw1.T[torch_idx, :]                                   # (64, 120)

    # fc1 -> fc2 -> fc3 have no nonlinearity between them in the reference
    # module, so fold them (and the biases) into ONE (64, 10) matmul (exact).
    wfc = fw1p @ fw2.T @ fw3.T                                   # (64, 10)
    bfc = fb1 @ fw2.T @ fw3.T + fb2 @ fw3.T + fb3                # (10,)

    # TODO(synk): optional int8 (v5e/v6e) / fp8 (v7x) storage of t1/t2 with a
    # scale folded into the bias-add; skipped to avoid per-generation branching.
    bf = jnp.bfloat16
    params = dict(
        t1=jnp.asarray(t1, bf), b1=jnp.asarray(b1r),
        t2=jnp.asarray(t2, bf), b2=jnp.asarray(b2r),
        t3=jnp.asarray(t3, bf), b3=jnp.asarray(b3r),
        wfc=jnp.asarray(wfc, bf), bfc=jnp.asarray(bfc[None, :].astype(np.float32)),
    )
    raw = dict(w1=w1, b1=b1, w2=w2, b2=b2, w3=w3, b3=b3,
               fw1=fw1, fb1=fb1, fw2=fw2, fb2=fb2, fw3=fw3, fb3=fb3)
    return params, raw


# ----------------------- pure numpy reference (f32) --------------------------
def reference_forward(x, raw, m2, m3):
    """Direct translation of the torch module, same dropout masks as kernel."""
    n = x.shape[0]
    x = x.reshape(n, 1, 28, 28).astype(np.float32)

    def conv(a, w, b):
        nb, ci, H, W = a.shape
        co, _, kh, kw = w.shape
        Ho, Wo = H - kh + 1, W - kw + 1
        out = np.zeros((nb, co, Ho, Wo), np.float32)
        for dy in range(kh):
            for dx in range(kw):
                out += np.einsum("ncij,oc->noij",
                                 a[:, :, dy:dy + Ho, dx:dx + Wo], w[:, :, dy, dx])
        return out + b[None, :, None, None]

    def pool2(a):
        nb, c, H, W = a.shape
        return a.reshape(nb, c, H // 2, 2, W // 2, 2).max(axis=(3, 5))

    o = pool2(np.maximum(conv(x, raw["w1"], raw["b1"]), 0.0))          # (N,6,12,12)
    o = pool2(np.maximum(conv(o, raw["w2"], raw["b2"]), 0.0))          # (N,12,4,4)
    o = o * m2[:, :4 * 4 * 12].reshape(n, 4, 4, 12).transpose(0, 3, 1, 2)
    o = np.maximum(conv(o, raw["w3"], raw["b3"]), 0.0)                 # (N,16,2,2)
    o = o * m3.reshape(n, 2, 2, 16).transpose(0, 3, 1, 2)
    h = o.reshape(n, -1)
    h = h @ raw["fw1"].T + raw["fb1"]
    h = h @ raw["fw2"].T + raw["fb2"]
    h = h @ raw["fw3"].T + raw["fb3"]
    s = h - h.max(axis=1, keepdims=True)
    return s - np.log(np.exp(s).sum(axis=1, keepdims=True))


# ------------------------------ Pallas kernel --------------------------------
def cnn_kernel(xs_ref, m2_ref, m3_ref,
               t1_ref, b1_ref, t2_ref, b2_ref, t3_ref, b3_ref,
               wfc_ref, bfc_ref, out_ref):
    f32 = jnp.float32
    n = out_ref.shape[0]

    def mm(a, w_ref):
        # bf16 x bf16 -> f32 accumulation on the MXU
        return jnp.dot(a.astype(jnp.bfloat16), w_ref[...],
                       preferred_element_type=f32)

    # conv1(1->6, 5x5) + ReLU + 2x2 maxpool.
    # xs stacks the 4 shifted image copies on rows, so one matmul against the
    # single (896, 896) pool-position Toeplitz block computes all 4 pool
    # candidates; the pool is a max over row groups (bias/ReLU commute with max).
    r1 = mm(xs_ref[...], t1_ref)                                   # (4N, C1_BLK)
    p1 = jnp.maximum(jnp.maximum(r1[0:n], r1[n:2 * n]),
                     jnp.maximum(r1[2 * n:3 * n], r1[3 * n:4 * n]))
    o1 = jnp.maximum(p1 + b1_ref[...], 0.0)                        # (N, C1_BLK)

    # conv2(6->12, 5x5) + ReLU + 2x2 maxpool + dropout(p=0.25).
    # t2's output lanes are grouped by pool position into four contiguous
    # 128-aligned blocks -> maxpool = 3 lane-block maxes.
    r2 = mm(o1, t2_ref)                                            # (N, 4*C2_BLK)
    p2 = jnp.maximum(
        jnp.maximum(r2[:, 0:C2_BLK], r2[:, C2_BLK:2 * C2_BLK]),
        jnp.maximum(r2[:, 2 * C2_BLK:3 * C2_BLK], r2[:, 3 * C2_BLK:4 * C2_BLK]))
    o2 = jnp.maximum(p2 + b2_ref[...], 0.0) * m2_ref[...]

    # conv3(12->16, 3x3) + ReLU + dropout(p=0.2)
    o3 = jnp.maximum(mm(o2, t3_ref) + b3_ref[...], 0.0) * m3_ref[...]

    # fc1 -> fc2 -> fc3 (folded on the host, exact) -> log_softmax(dim=1)
    h = mm(o3, wfc_ref) + bfc_ref[...]                             # (N, 10)
    s = h - jnp.max(h, axis=-1, keepdims=True)
    out_ref[...] = s - jnp.log(jnp.sum(jnp.exp(s), axis=-1, keepdims=True))


# ------------------------------- forward pass --------------------------------
@jax.jit
def cnn_forward(x, drop_mask2, drop_mask3, params):
    # torch: x.view(-1, 1, 28, 28); lanes are the (h, w) raster (Cin = 1)
    x2d = x.reshape(-1, 28 * 28).astype(jnp.float32)
    n = x2d.shape[0]

    # 4 shifted copies of the flattened image (offsets select the 2x2 pool
    # position), K padded to 896 lanes.  Tiny XLA glue (~28 KB) that lets the
    # kernel reuse one conv1 Toeplitz block instead of streaming 4 of them.
    x_pad = jnp.pad(x2d, ((0, 0), (0, C1_K + 32 - 28 * 28)))
    xs = jnp.concatenate([x_pad[:, o:o + C1_K] for o in POOL_OFF], axis=0)

    vmem = pl.BlockSpec(memory_space=pltpu.MemorySpace.VMEM)
    return pl.pallas_call(
        cnn_kernel,
        out_shape=jax.ShapeDtypeStruct((n, 10), jnp.float32),
        in_specs=[vmem] * 11,
        out_specs=vmem,
    )(xs, drop_mask2, drop_mask3,
      params["t1"], params["b1"], params["t2"], params["b2"],
      params["t3"], params["b3"], params["wfc"], params["bfc"])


# ----------------------------------- main ------------------------------------
if __name__ == "__main__":
    key = jax.random.PRNGKey(0)
    kx, km2, km3 = jax.random.split(key, 3)
    N = 2
    x = jax.random.normal(kx, (N, 1, 28, 28), jnp.float32)
    params, raw = init_params(seed=0)

    # Inverted-dropout masks (F.dropout default training=True).  Generated on
    # the host with jax.random so the numpy reference sees identical masks.
    # TODO(synk): torch's exact dropout RNG stream is not reproducible; the
    # on-chip PRNG (pltpu.prng_*) is unavailable in interpret mode, so masks
    # are host-generated inputs instead of in-kernel random bits.
    m2 = jax.random.bernoulli(km2, 0.75, (N, C2_BLK)).astype(jnp.float32) / 0.75
    m3 = jax.random.bernoulli(km3, 0.80, (N, C3_OUT)).astype(jnp.float32) / 0.80

    out = cnn_forward(x, m2, m3, params)
    out = jax.block_until_ready(out)

    out_np = np.asarray(out, dtype=np.float32)
    assert out_np.shape == (N, 10), out_np.shape
    assert np.all(np.isfinite(out_np))
    # rows of log_softmax must exponentiate-sum to 1
    assert np.allclose(np.exp(out_np).sum(axis=1), 1.0, atol=1e-3)

    # end-to-end numerical check against a plain f32 numpy reference
    ref = reference_forward(np.asarray(x), raw, np.asarray(m2), np.asarray(m3))
    np.testing.assert_allclose(out_np, ref, rtol=5e-2, atol=5e-2)

    print("KERNEL_OK")
</pallas_src>

<mosaic_0001>
module attributes {stable_mosaic.version = 11 : i64} {
  func.func @cnn_kernel(%arg0: memref<8x896xf32, #tpu.memory_space<vmem>>, %arg1: memref<2x256xf32, #tpu.memory_space<vmem>>, %arg2: memref<2x64xf32, #tpu.memory_space<vmem>>, %arg3: memref<896x896xbf16, #tpu.memory_space<vmem>>, %arg4: memref<1x896xf32, #tpu.memory_space<vmem>>, %arg5: memref<896x1024xbf16, #tpu.memory_space<vmem>>, %arg6: memref<1x256xf32, #tpu.memory_space<vmem>>, %arg7: memref<256x64xbf16, #tpu.memory_space<vmem>>, %arg8: memref<1x64xf32, #tpu.memory_space<vmem>>, %arg9: memref<64x10xbf16, #tpu.memory_space<vmem>>, %arg10: memref<1x10xf32, #tpu.memory_space<vmem>>, %arg11: memref<2x10xf32, #tpu.memory_space<vmem>>) attributes {dimension_semantics = [], scalar_prefetch = 0 : i64, scratch_operands = 0 : i64, tpu.core_type = #tpu.core_type<tc>} {
    %c0 = arith.constant 0 : index
    %c0_0 = arith.constant 0 : index
    %0 = vector.load %arg0[%c0, %c0_0] : memref<8x896xf32, #tpu.memory_space<vmem>>, vector<8x896xf32>
    %1 = arith.truncf %0 : vector<8x896xf32> to vector<8x896xbf16>
    %c0_1 = arith.constant 0 : index
    %c0_2 = arith.constant 0 : index
    %2 = vector.load %arg3[%c0_1, %c0_2] : memref<896x896xbf16, #tpu.memory_space<vmem>>, vector<896x896xbf16>
    %cst = arith.constant dense<0.000000e+00> : vector<8x896xf32>
    %3 = tpu.matmul %1, %2, %cst {dimension_numbers = #tpu.dot_dimension_numbers<[1], [0], [0], [1], [0, 0, 1, 1], [], []>} : vector<8x896xbf16>, vector<896x896xbf16>, vector<8x896xf32> -> vector<8x896xf32>
    %4 = vector.extract_strided_slice %3 {offsets = [0, 0], sizes = [2, 896], strides = [1, 1]} : vector<8x896xf32> to vector<2x896xf32>
    %5 = vector.extract_strided_slice %3 {offsets = [2, 0], sizes = [2, 896], strides = [1, 1]} : vector<8x896xf32> to vector<2x896xf32>
    %6 = arith.maximumf %4, %5 : vector<2x896xf32>
    %7 = vector.extract_strided_slice %3 {offsets = [4, 0], sizes = [2, 896], strides = [1, 1]} : vector<8x896xf32> to vector<2x896xf32>
    %8 = vector.extract_strided_slice %3 {offsets = [6, 0], sizes = [2, 896], strides = [1, 1]} : vector<8x896xf32> to vector<2x896xf32>
    %9 = arith.maximumf %7, %8 : vector<2x896xf32>
    %10 = arith.maximumf %6, %9 : vector<2x896xf32>
    %c0_3 = arith.constant 0 : index
    %c0_4 = arith.constant 0 : index
    %11 = vector.load %arg4[%c0_3, %c0_4] : memref<1x896xf32, #tpu.memory_space<vmem>>, vector<1x896xf32>
    %12 = vector.broadcast %11 : vector<1x896xf32> to vector<2x896xf32>
    %13 = arith.addf %10, %12 : vector<2x896xf32>
    %cst_5 = arith.constant 0.000000e+00 : f32
    %14 = vector.broadcast %cst_5 : f32 to vector<2x896xf32>
    %15 = arith.maximumf %13, %14 : vector<2x896xf32>
    %16 = arith.truncf %15 : vector<2x896xf32> to vector<2x896xbf16>
    %c0_6 = arith.constant 0 : index
    %c0_7 = arith.constant 0 : index
    %17 = vector.load %arg5[%c0_6, %c0_7] : memref<896x1024xbf16, #tpu.memory_space<vmem>>, vector<896x1024xbf16>
    %cst_8 = arith.constant dense<0.000000e+00> : vector<2x1024xf32>
    %18 = tpu.matmul %16, %17, %cst_8 {dimension_numbers = #tpu.dot_dimension_numbers<[1], [0], [0], [1], [0, 0, 1, 1], [], []>} : vector<2x896xbf16>, vector<896x1024xbf16>, vector<2x1024xf32> -> vector<2x1024xf32>
    %19 = vector.extract_strided_slice %18 {offsets = [0, 0], sizes = [2, 256], strides = [1, 1]} : vector<2x1024xf32> to vector<2x256xf32>
    %20 = vector.extract_strided_slice %18 {offsets = [0, 256], sizes = [2, 256], strides = [1, 1]} : vector<2x1024xf32> to vector<2x256xf32>
    %21 = arith.maximumf %19, %20 : vector<2x256xf32>
    %22 = vector.extract_strided_slice %18 {offsets = [0, 512], sizes = [2, 256], strides = [1, 1]} : vector<2x1024xf32> to vector<2x256xf32>
    %23 = vector.extract_strided_slice %18 {offsets = [0, 768], sizes = [2, 256], strides = [1, 1]} : vector<2x1024xf32> to vector<2x256xf32>
    %24 = arith.maximumf %22, %23 : vector<2x256xf32>
    %25 = arith.maximumf %21, %24 : vector<2x256xf32>
    %c0_9 = arith.constant 0 : index
    %c0_10 = arith.constant 0 : index
    %26 = vector.load %arg6[%c0_9, %c0_10] : memref<1x256xf32, #tpu.memory_space<vmem>>, vector<1x256xf32>
    %27 = vector.broadcast %26 : vector<1x256xf32> to vector<2x256xf32>
    %28 = arith.addf %25, %27 : vector<2x256xf32>
    %cst_11 = arith.constant 0.000000e+00 : f32
    %29 = vector.broadcast %cst_11 : f32 to vector<2x256xf32>
    %30 = arith.maximumf %28, %29 : vector<2x256xf32>
    %c0_12 = arith.constant 0 : index
    %c0_13 = arith.constant 0 : index
    %31 = vector.load %arg1[%c0_12, %c0_13] : memref<2x256xf32, #tpu.memory_space<vmem>>, vector<2x256xf32>
    %32 = arith.mulf %30, %31 : vector<2x256xf32>
    %33 = arith.truncf %32 : vector<2x256xf32> to vector<2x256xbf16>
    %c0_14 = arith.constant 0 : index
    %c0_15 = arith.constant 0 : index
    %34 = vector.load %arg7[%c0_14, %c0_15] : memref<256x64xbf16, #tpu.memory_space<vmem>>, vector<256x64xbf16>
    %cst_16 = arith.constant dense<0.000000e+00> : vector<2x64xf32>
    %35 = tpu.matmul %33, %34, %cst_16 {dimension_numbers = #tpu.dot_dimension_numbers<[1], [0], [0], [1], [0, 0, 1, 1], [], []>} : vector<2x256xbf16>, vector<256x64xbf16>, vector<2x64xf32> -> vector<2x64xf32>
    %c0_17 = arith.constant 0 : index
    %c0_18 = arith.constant 0 : index
    %36 = vector.load %arg8[%c0_17, %c0_18] : memref<1x64xf32, #tpu.memory_space<vmem>>, vector<1x64xf32>
    %37 = vector.broadcast %36 : vector<1x64xf32> to vector<2x64xf32>
    %38 = arith.addf %35, %37 : vector<2x64xf32>
    %cst_19 = arith.constant 0.000000e+00 : f32
    %39 = vector.broadcast %cst_19 : f32 to vector<2x64xf32>
    %40 = arith.maximumf %38, %39 : vector<2x64xf32>
    %c0_20 = arith.constant 0 : index
    %c0_21 = arith.constant 0 : index
    %41 = vector.load %arg2[%c0_20, %c0_21] : memref<2x64xf32, #tpu.memory_space<vmem>>, vector<2x64xf32>
    %42 = arith.mulf %40, %41 : vector<2x64xf32>
    %43 = arith.truncf %42 : vector<2x64xf32> to vector<2x64xbf16>
    %c0_22 = arith.constant 0 : index
    %c0_23 = arith.constant 0 : index
    %44 = vector.load %arg9[%c0_22, %c0_23] : memref<64x10xbf16, #tpu.memory_space<vmem>>, vector<64x10xbf16>
    %cst_24 = arith.constant dense<0.000000e+00> : vector<2x10xf32>
    %45 = tpu.matmul %43, %44, %cst_24 {dimension_numbers = #tpu.dot_dimension_numbers<[1], [0], [0], [1], [0, 0, 1, 1], [], []>} : vector<2x64xbf16>, vector<64x10xbf16>, vector<2x10xf32> -> vector<2x10xf32>
    %c0_25 = arith.constant 0 : index
    %c0_26 = arith.constant 0 : index
    %46 = vector.load %arg10[%c0_25, %c0_26] : memref<1x10xf32, #tpu.memory_space<vmem>>, vector<1x10xf32>
    %47 = vector.broadcast %46 : vector<1x10xf32> to vector<2x10xf32>
    %48 = arith.addf %45, %47 : vector<2x10xf32>
    %cst_27 = arith.constant dense<0xFF800000> : vector<2xf32>
    %49 = vector.multi_reduction <maximumf>, %48, %cst_27 [1] : vector<2x10xf32> to vector<2xf32>
    %50 = vector.shape_cast %49 : vector<2xf32> to vector<2x1xf32>
    %51 = vector.broadcast %50 : vector<2x1xf32> to vector<2x10xf32>
    %52 = arith.subf %48, %51 : vector<2x10xf32>
    %53 = math.exp %52 : vector<2x10xf32>
    %cst_28 = arith.constant dense<0.000000e+00> : vector<2xf32>
    %54 = vector.multi_reduction <add>, %53, %cst_28 [1] : vector<2x10xf32> to vector<2xf32>
    %55 = vector.shape_cast %54 : vector<2xf32> to vector<2x1xf32>
    %56 = math.log %55 : vector<2x1xf32>
    %57 = vector.broadcast %56 : vector<2x1xf32> to vector<2x10xf32>
    %58 = arith.subf %52, %57 : vector<2x10xf32>
    %c0_29 = arith.constant 0 : index
    %c0_30 = arith.constant 0 : index
    %59 = vector.load %arg11[%c0_29, %c0_30] : memref<2x10xf32, #tpu.memory_space<vmem>>, vector<2x10xf32>
    tpu.vector_store %arg11[%c0_29, %c0_30], %58 {strides = array<i32>} : memref<2x10xf32, #tpu.memory_space<vmem>>, vector<2x10xf32>,
    return
  }
}

</mosaic_0001>

<bundles_post_ra>
// kernel: cnn_forward.1
= control target key start
LH: loop header
LB: loop body
LE: loop exit
PB: predicated region body
PF: predicated region fallthrough
CT: control target
= control target key end

     0   :  { %16 = vsyncpa [#allocation3], 0  ;;  %s9405_s0 = inlined_call_operand.vmem [shape: f32[8,896], index: 0, kind: input, shape index: {}]   ;;  %s9406_s1 = inlined_call_operand.hbm [shape: f32[2,256], index: 1, kind: input, shape index: {}]   ;;  %s9407_s2 = inlined_call_operand.hbm [shape: f32[2,64], index: 2, kind: input, shape index: {}]   ;;  %s9408_s3 = inlined_call_operand.hbm [shape: bf16[896,896], index: 3, kind: input, shape index: {}]   ;;  %s9409_s4 = inlined_call_operand.hbm [shape: f32[1,896], index: 4, kind: input, shape index: {}]   ;;  %s9410_s5 = inlined_call_operand.hbm [shape: bf16[896,1024], index: 5, kind: input, shape index: {}]   ;;  %s9411_s6 = inlined_call_operand.hbm [shape: f32[1,256], index: 6, kind: input, shape index: {}]   ;;  %s9412_s7 = inlined_call_operand.vmem [shape: bf16[256,64], index: 7, kind: input, shape index: {}]   ;;  %s9413_s8 = inlined_call_operand.hbm [shape: f32[1,64], index: 8, kind: input, shape index: {}]   ;;  %s9414_s9 = inlined_call_operand.vmem [shape: bf16[64,10], index: 9, kind: input, shape index: {}]   ;;  %s9415_s10 = inlined_call_operand.hbm [shape: f32[1,10], index: 10, kind: input, shape index: {}]   ;;  %s9416_s11 = inlined_call_operand.hbm [shape: f32[2,10], index: 11, kind: output, shape index: {}]  }
   0x1   :  { %17 = vsyncpa [#allocation6], 0 }
   0x2   :  { %18 = vsyncpa [#allocation9], 0 }
   0x3   :  { %19 = vsyncpa [#allocation12], 0 }
   0x4   :  { %20 = vsyncpa [#allocation15], 0 }
   0x5   :  { %21 = vsyncpa [#allocation4], 0  ;;  %s8949_s17 = smov [#allocation5]   ;;  %s8950_s19 = smov [#allocation8]  }
   0x6   :  { %s40_s18 = sshll.u32 %s8949_s17, 4  ;;  %s62_s20 = sshll.u32 %s8950_s19, 4  ;;  %s41_s18 = int_to_ptr.vmem [resolvable:$true] %s40_s18  ;;  %s63_s20 = int_to_ptr.vmem [resolvable:$true] %s62_s20 }
   0x7   :  { %s8739_s23 = scalar_lea.hbm %s9407_s2, 32 }
   0x8   :  { %p8740_p0 = scmp.ne.s32.totalorder %s9407_s2, %s8739_s23  ;;  %p8743_p1 = scmp.lt.u32.totalorder %s8739_s23, %s9407_s2 }
   0xa   :  { %p8745_p2 = pnand %p8743_p1, %p8740_p0 }
   0xc   :  { %8748 = shalt.err (!%p8745_p2)
}
   0xd   :  { %s8749_s28 = scalar_lea.vmem %s41_s18, 32  ;;  %p8754_p4 = scmp.lt.s32.totalorder %s41_s18, %s41_s18 }
   0xe   :  { %p8750_p3 = scmp.ne.s32.totalorder %s41_s18, %s8749_s28  ;;  %p8755_p5 = scmp.lt.s32.totalorder %s8749_s28, %s8749_s28 }
  0x10   :  { %p8756_p6 = por %p8755_p5, %p8754_p4 }
  0x12   :  { %p8757_p7 = pnand %p8756_p6, %p8750_p3 }
  0x14   :  { %8760 = shalt.err (!%p8757_p7)
}
  0x15   :  { %43 = dma.hbm_to_vmem [thread:$0]  %s9407_s2, 32, %s41_s18, [#allocation6]  }
  0x16   :  { %s8761_s14 = scalar_lea.hbm %s9409_s4, 112 }
  0x17   :  { %p8762_p8 = scmp.ne.s32.totalorder %s9409_s4, %s8761_s14  ;;  %p8765_p9 = scmp.lt.u32.totalorder %s8761_s14, %s9409_s4 }
  0x19   :  { %p8767_p10 = pnand %p8765_p9, %p8762_p8 }
  0x1b   :  { %8770 = shalt.err (!%p8767_p10)
}
  0x1c   :  { %s8771_s21 = scalar_lea.vmem %s63_s20, 112  ;;  %s8775_s22 = scalar_lea.vmem %s63_s20, 128 }
  0x1d   :  { %p8772_p11 = scmp.ne.s32.totalorder %s63_s20, %s8771_s21  ;;  %p8776_p12 = scmp.lt.s32.totalorder %s63_s20, %s63_s20 }
  0x1e   :  { %p8777_p13 = scmp.lt.s32.totalorder %s8775_s22, %s8771_s21 }
  0x20   :  { %p8778_p0 = por %p8777_p13, %p8776_p12 }
  0x22   :  { %p8779_p1 = pnand %p8778_p0, %p8772_p11 }
  0x24   :  { %8782 = shalt.err (!%p8779_p1)
}
  0x25   :  { %65 = dma.hbm_to_vmem [thread:$0]  %s9409_s4, 112, %s63_s20, [#allocation9]  }
  0x26   :  { %s8951_s23 = smov [#allocation11]   ;;  %s8952_s25 = smov [#allocation2]  }
  0x27   :  { %s84_s24 = sshll.u32 %s8951_s23, 4  ;;  %s30_s26 = sshll.u32 %s8952_s25, 4  ;;  %s85_s24 = int_to_ptr.vmem [resolvable:$true] %s84_s24  ;;  %s31_s26 = int_to_ptr.vmem [resolvable:$true] %s30_s26 }
  0x28   :  { %s8783_s29 = scalar_lea.hbm %s9411_s6, 32 }
  0x29   :  { %p8784_p2 = scmp.ne.s32.totalorder %s9411_s6, %s8783_s29  ;;  %p8787_p3 = scmp.lt.u32.totalorder %s8783_s29, %s9411_s6 }
  0x2b   :  { %p8789_p4 = pnand %p8787_p3, %p8784_p2 }
  0x2d   :  { %8792 = shalt.err (!%p8789_p4)
}
  0x2e   :  { %s8793_s4 = scalar_lea.vmem %s85_s24, 32  ;;  %p8798_p6 = scmp.lt.s32.totalorder %s85_s24, %s85_s24 }
  0x2f   :  { %p8794_p5 = scmp.ne.s32.totalorder %s85_s24, %s8793_s4  ;;  %p8799_p7 = scmp.lt.s32.totalorder %s8793_s4, %s8793_s4 }
  0x31   :  { %p8800_p8 = por %p8799_p7, %p8798_p6 }
  0x33   :  { %p8801_p9 = pnand %p8800_p8, %p8794_p5 }
  0x35   :  { %8804 = shalt.err (!%p8801_p9)
}
  0x36   :  { %87 = dma.hbm_to_vmem [thread:$0]  %s9411_s6, 32, %s85_s24, [#allocation12]  }
  0x37   :  { %s8805_s19 = scalar_lea.hbm %s9406_s1, 64 }
  0x38   :  { %p8806_p10 = scmp.ne.s32.totalorder %s9406_s1, %s8805_s19  ;;  %p8809_p11 = scmp.lt.u32.totalorder %s8805_s19, %s9406_s1 }
  0x3a   :  { %p8811_p12 = pnand %p8809_p11, %p8806_p10 }
  0x3c   :  { %8814 = shalt.err (!%p8811_p12)
}
  0x3d   :  { %s8815_s23 = scalar_lea.vmem %s31_s26, 64  ;;  %p8820_p0 = scmp.lt.s32.totalorder %s31_s26, %s31_s26 }
  0x3e   :  { %p8816_p13 = scmp.ne.s32.totalorder %s31_s26, %s8815_s23  ;;  %p8821_p1 = scmp.lt.s32.totalorder %s8815_s23, %s8815_s23 }
  0x40   :  { %p8822_p2 = por %p8821_p1, %p8820_p0 }
  0x42   :  { %p8823_p3 = pnand %p8822_p2, %p8816_p13 }
  0x44   :  { %8826 = shalt.err (!%p8823_p3)
}
  0x45   :  { %33 = dma.hbm_to_vmem [thread:$0]  %s9406_s1, 64, %s31_s26, [#allocation3]  }
  0x46   :  { %s8953_s25 = smov [#allocation7]   ;;  %s8827_s30 = scalar_lea.hbm %s9408_s3, 50176 }
  0x47   :  { %s49_s27 = sshll.u32 %s8953_s25, 4  ;;  %p8828_p4 = scmp.ne.s32.totalorder %s9408_s3, %s8827_s30  ;;  %s50_s27 = int_to_ptr.vmem [resolvable:$true] %s49_s27 }
  0x48   :  { %p8831_p5 = scmp.lt.u32.totalorder %s8827_s30, %s9408_s3 }
  0x4a   :  { %p8833_p6 = pnand %p8831_p5, %p8828_p4 }
  0x4c   :  { %8836 = shalt.err (!%p8833_p6)
}
  0x4d   :  { %s8837_s20 = scalar_lea.vmem %s50_s27, 50176  ;;  %p8842_p8 = scmp.lt.s32.totalorder %s50_s27, %s50_s27 }
  0x4e   :  { %p8838_p7 = scmp.ne.s32.totalorder %s50_s27, %s8837_s20  ;;  %p8843_p9 = scmp.lt.s32.totalorder %s8837_s20, %s8837_s20 }
  0x50   :  { %p8844_p10 = por %p8843_p9, %p8842_p8 }
  0x52   :  { %p8845_p11 = pnand %p8844_p10, %p8838_p7 }
  0x54   :  { %8848 = shalt.err (!%p8845_p11)
}
  0x55   :  { %s8954_s1 = smov 448   ;;  %s8955_s26 = smov 28  }
  0x56   :  { %55 = dma.hbm_to_vmem [thread:$0]  %s9408_s3, 50176, %s50_s27, [#allocation6], %s8954_s1, %s8954_s1, %s8955_s26  }
  0x57   :  { %s8956_s17 = smov [#allocation10]   ;;  %s8849_s2 = scalar_lea.hbm %s9410_s5, 57344 }
  0x58   :  { %s71_s19 = sshll.u32 %s8956_s17, 4  ;;  %p8850_p12 = scmp.ne.s32.totalorder %s9410_s5, %s8849_s2  ;;  %s72_s19 = int_to_ptr.vmem [resolvable:$true] %s71_s19 }
  0x59   :  { %p8853_p13 = scmp.lt.u32.totalorder %s8849_s2, %s9410_s5 }
  0x5b   :  { %p8855_p0 = pnand %p8853_p13, %p8850_p12 }
  0x5d   :  { %8858 = shalt.err (!%p8855_p0)
}
  0x5e   :  { %s8859_s25 = scalar_lea.vmem %s72_s19, 57344  ;;  %p8864_p2 = scmp.lt.s32.totalorder %s72_s19, %s72_s19 }
  0x5f   :  { %p8860_p1 = scmp.ne.s32.totalorder %s72_s19, %s8859_s25  ;;  %p8865_p3 = scmp.lt.s32.totalorder %s8859_s25, %s8859_s25 }
  0x61   :  { %p8866_p4 = por %p8865_p3, %p8864_p2 }
  0x63   :  { %p8867_p5 = pnand %p8866_p4, %p8860_p1 }
  0x65   :  { %8870 = shalt.err (!%p8867_p5)
}
  0x66   :  { %s8957_s3 = smov 512   ;;  %s8958_s27 = smov 32  }
  0x67   :  { %77 = dma.hbm_to_vmem [thread:$0]  %s9410_s5, 57344, %s72_s19, [#allocation9], %s8957_s3, %s8957_s3, %s8958_s27  }
  0x68   :  { %s8959_s30 = smov [#allocation13]   ;;  %s8960_s13 = smov [#allocation14]  }
  0x69   :  { %s96_s12 = sshll.u32 %s8959_s30, 4  ;;  %s108_s14 = sshll.u32 %s8960_s13, 4  ;;  %s97_s12 = int_to_ptr.vmem [resolvable:$true] %s96_s12  ;;  %s109_s14 = int_to_ptr.vmem [resolvable:$true] %s108_s14 }
  0x6a   :  { %s8871_s1 = scalar_lea.hbm %s9413_s8, 16 }
  0x6b   :  { %p8872_p6 = scmp.ne.s32.totalorder %s9413_s8, %s8871_s1  ;;  %p8875_p7 = scmp.lt.u32.totalorder %s8871_s1, %s9413_s8 }
  0x6d   :  { %p8877_p8 = pnand %p8875_p7, %p8872_p6 }
  0x6f   :  { %8880 = shalt.err (!%p8877_p8)
}
  0x70   :  { %s8881_s5 = scalar_lea.vmem %s97_s12, 16  ;;  %s8885_s19 = scalar_lea.vmem %s97_s12, 32 }
  0x71   :  { %p8882_p9 = scmp.ne.s32.totalorder %s97_s12, %s8881_s5  ;;  %p8886_p10 = scmp.lt.s32.totalorder %s97_s12, %s97_s12 }
  0x72   :  { %p8887_p11 = scmp.lt.s32.totalorder %s8885_s19, %s8881_s5 }
  0x74   :  { %p8888_p12 = por %p8887_p11, %p8886_p10 }
  0x76   :  { %p8889_p13 = pnand %p8888_p12, %p8882_p9 }
  0x78   :  { %8892 = shalt.err (!%p8889_p13)
}
  0x79   :  { %99 = dma.hbm_to_vmem [thread:$0]  %s9413_s8, 16, %s97_s12, [#allocation12]  }
  0x7a   :  { %s8893_s23 = scalar_lea.hbm %s9415_s10, 16 }
  0x7b   :  { %p8894_p0 = scmp.ne.s32.totalorder %s9415_s10, %s8893_s23  ;;  %p8897_p1 = scmp.lt.u32.totalorder %s8893_s23, %s9415_s10 }
  0x7d   :  { %p8899_p2 = pnand %p8897_p1, %p8894_p0 }
  0x7f   :  { %8902 = shalt.err (!%p8899_p2)
}
  0x80   :  { %s8903_s27 = scalar_lea.vmem %s109_s14, 16  ;;  %s8907_s28 = scalar_lea.vmem %s109_s14, 32 }
  0x81   :  { %p8904_p3 = scmp.ne.s32.totalorder %s109_s14, %s8903_s27  ;;  %p8908_p4 = scmp.lt.s32.totalorder %s109_s14, %s109_s14 }
  0x82   :  { %p8909_p5 = scmp.lt.s32.totalorder %s8907_s28, %s8903_s27 }
  0x84   :  { %p8910_p6 = por %p8909_p5, %p8908_p4 }
  0x86   :  { %p8911_p7 = pnand %p8910_p6, %p8904_p3 }
  0x88   :  { %8914 = shalt.err (!%p8911_p7)
}
  0x89   :  { %111 = dma.hbm_to_vmem [thread:$0]  %s9415_s10, 16, %s109_s14, [#allocation15]  }
  0x8a   :  { %8937 = dma.done.wait [#allocation3], 64  }
  0x8b   :  { %8938 = vsyncadd [#allocation3], 4294967232 }
  0x8c   :  { %8939 = dma.done.wait [#allocation6], 50208  }
  0x8d   :  { %8940 = vsyncadd [#allocation6], 4294917088 }
  0x8e   :  { %8941 = dma.done.wait [#allocation9], 57456  }
  0x8f   :  { %8942 = vsyncadd [#allocation9], 4294909840 }
  0x90   :  { %8943 = dma.done.wait [#allocation12], 48  }
  0x91   :  { %8944 = vsyncadd [#allocation12], 4294967248 }
  0x92   :  { %8945 = dma.done.wait [#allocation15], 16  }
  0x93   :  { %8946 = vsyncadd [#allocation15], 4294967280  ;;  %v8961_v0 = vmov 0   ;;  %v8154_v1 = vld [vmem:[#allocation7 + $0x4] ss:$28 sps:$4 sm:$0xff]   ;;  %v143_v33 = vld [vmem:[%s9405_s0 + $0x30] sm:$0xff] }
  0x94   :  { %2770 = vmatprep.mubr.bf16.mxu1 %v8961_v0  ;;  %v8156_v2 = vld [vmem:[#allocation7 + $0xa84] ss:$28 sps:$4 sm:$0xff]   ;;  %2615 = vmatprep.subr.bf16.mxu0 %v8154_v1  ;;  %v8160_v5 = vld [vmem:[#allocation7 + $0x3c] ss:$28 sps:$4 sm:$0xff]   ;;  %v8166_v9 = vld [vmem:[#allocation7 + $0x74] ss:$28 sps:$4 sm:$0xff]   ;;  %v9125_v38 = vpack.c.bf16 %v143_v33, %v143_v33 }
  0x95   :  { %v8158_v3 = vld [vmem:[#allocation7] ss:$28 sps:$4 sm:$0xff]   ;;  %2738 = vmatprep.subr.bf16.mxu1 %v8156_v2  ;;  %v8164_v7 = vld [vmem:[#allocation7 + $0x38] ss:$28 sps:$4 sm:$0xff]   ;;  %v8170_v11 = vld [vmem:[#allocation7 + $0x70] ss:$28 sps:$4 sm:$0xff]  }
  0x96   :  { %v8159_v4 = vld [vmem:[#allocation7 + $0xa80] ss:$28 sps:$4 sm:$0xff]   ;;  %2616 = vmatpush1.bf16.msra.mxu0 %v8158_v3  ;;  %v8165_v8 = vld [vmem:[#allocation7 + $0xab8] ss:$28 sps:$4 sm:$0xff]   ;;  %v8171_v12 = vld [vmem:[#allocation7 + $0xaf0] ss:$28 sps:$4 sm:$0xff]  }
  0x97   :  { %2739 = vmatpush1.bf16.msra.mxu1 %v8159_v4  ;;  %v8162_v6 = vld [vmem:[#allocation7 + $0xabc] ss:$28 sps:$4 sm:$0xff]   ;;  %2617 = vmatprep.subr.bf16.mxu0 %v8160_v5  ;;  %v8168_v10 = vld [vmem:[#allocation7 + $0xaf4] ss:$28 sps:$4 sm:$0xff]   ;;  %v8172_v13 = vld [vmem:[#allocation7 + $0xac] ss:$28 sps:$4 sm:$0xff]  }
  0x98   :  { %2740 = vmatprep.subr.bf16.mxu1 %v8162_v6  ;;  %v8174_v14 = vld [vmem:[#allocation7 + $0xb2c] ss:$28 sps:$4 sm:$0xff]   ;;  %v8178_v17 = vld [vmem:[#allocation7 + $0xe4] ss:$28 sps:$4 sm:$0xff]   ;;  %v8184_v21 = vld [vmem:[#allocation7 + $0x11c] ss:$28 sps:$4 sm:$0xff]  }
  0x99   :  { %v8176_v15 = vld [vmem:[#allocation7 + $0xa8] ss:$28 sps:$4 sm:$0xff]   ;;  %v8182_v19 = vld [vmem:[#allocation7 + $0xe0] ss:$28 sps:$4 sm:$0xff]   ;;  %v8188_v23 = vld [vmem:[#allocation7 + $0x118] ss:$28 sps:$4 sm:$0xff]  }
  0x9a   :  { %2618 = vmatpush1.bf16.msra.mxu0 %v8164_v7  ;;  %v8177_v16 = vld [vmem:[#allocation7 + $0xb28] ss:$28 sps:$4 sm:$0xff]   ;;  %v8183_v20 = vld [vmem:[#allocation7 + $0xb60] ss:$28 sps:$4 sm:$0xff]   ;;  %v8189_v24 = vld [vmem:[#allocation7 + $0xb98] ss:$28 sps:$4 sm:$0xff]  }
  0x9b   :  { %2741 = vmatpush1.bf16.msra.mxu1 %v8165_v8  ;;  %2619 = vmatprep.subr.bf16.mxu0 %v8166_v9  ;;  %v8180_v18 = vld [vmem:[#allocation7 + $0xb64] ss:$28 sps:$4 sm:$0xff]   ;;  %v8186_v22 = vld [vmem:[#allocation7 + $0xb9c] ss:$28 sps:$4 sm:$0xff]   ;;  %v8190_v25 = vld [vmem:[#allocation7 + $0x154] ss:$28 sps:$4 sm:$0xff]  }
  0x9c   :  { %2742 = vmatprep.subr.bf16.mxu1 %v8168_v10  ;;  %v8192_v26 = vld [vmem:[#allocation7 + $0xbd4] ss:$28 sps:$4 sm:$0xff]   ;;  %v8196_v29 = vld [vmem:[#allocation7 + $0x18c] ss:$28 sps:$4 sm:$0xff]   ;;  %v8202_v34 = vld [vmem:[#allocation7 + $0x1c4] ss:$28 sps:$4 sm:$0xff]  }
  0x9d   :  { %v8194_v27 = vld [vmem:[#allocation7 + $0x150] ss:$28 sps:$4 sm:$0xff]   ;;  %v8200_v31 = vld [vmem:[#allocation7 + $0x188] ss:$28 sps:$4 sm:$0xff]   ;;  %v8207_v37 = vld [vmem:[#allocation7 + $0x1c0] ss:$28 sps:$4 sm:$0xff]  }
  0x9e   :  { %2620 = vmatpush1.bf16.msra.mxu0 %v8170_v11  ;;  %v8195_v28 = vld [vmem:[#allocation7 + $0xbd0] ss:$28 sps:$4 sm:$0xff]   ;;  %v8201_v32 = vld [vmem:[#allocation7 + $0xc08] ss:$28 sps:$4 sm:$0xff]   ;;  %v8208_v39 = vld [vmem:[#allocation7 + $0x1fc] ss:$28 sps:$4 sm:$0xff]  }
  0x9f   :  { %2743 = vmatpush1.bf16.msra.mxu1 %v8171_v12  ;;  %2621 = vmatprep.subr.bf16.mxu0 %v8172_v13  ;;  %v8198_v30 = vld [vmem:[#allocation7 + $0xc0c] ss:$28 sps:$4 sm:$0xff]   ;;  %v8212_v40 = vld [vmem:[#allocation7 + $0x44] ss:$28 sps:$4 sm:$0xff]   ;;  %v8213_v42 = vld [vmem:[#allocation7 + $0x1f8] ss:$28 sps:$4 sm:$0xff]  }
  0xa0   :  { %2744 = vmatprep.subr.bf16.mxu1 %v8174_v14  ;;  %v8206_v35 = vld [vmem:[#allocation7 + $0xc] ss:$28 sps:$4 sm:$0xff]   ;;  %v8210_v41 = vld [vmem:[#allocation7 + $0x40] ss:$28 sps:$4 sm:$0xff]   ;;  %v8214_v43 = vld [vmem:[#allocation7 + $0x234] ss:$28 sps:$4 sm:$0xff]  }
  0xa1   :  { %v8204_v36 = vld [vmem:[#allocation7 + $0x8] ss:$28 sps:$4 sm:$0xff]   ;;  %v8218_v44 = vld [vmem:[#allocation7 + $0x7c] ss:$28 sps:$4 sm:$0xff]   ;;  %v8219_v46 = vld [vmem:[#allocation7 + $0x230] ss:$28 sps:$4 sm:$0xff]  }
  0xa2   :  { %2622 = vmatpush1.bf16.msra.mxu0 %v8176_v15  ;;  %v8216_v45 = vld [vmem:[#allocation7 + $0x78] ss:$28 sps:$4 sm:$0xff]   ;;  %v8220_v47 = vld [vmem:[#allocation7 + $0x26c] ss:$28 sps:$4 sm:$0xff]   ;;  %v8226_v53 = vld [vmem:[#allocation7 + $0x2a4] ss:$28 sps:$4 sm:$0xff]  }
  0xa3   :  { %2745 = vmatpush1.bf16.msra.mxu1 %v8177_v16  ;;  %2623 = vmatprep.subr.bf16.mxu0 %v8178_v17  ;;  %v8224_v48 = vld [vmem:[#allocation7 + $0xb4] ss:$28 sps:$4 sm:$0xff]   ;;  %v138_v49 = vld [vmem:[%s9405_s0 + $0x8] sm:$0xff]  ;;  %v8232_v57 = vld [vmem:[#allocation7 + $0x2dc] ss:$28 sps:$4 sm:$0xff]   ;;  %vm8963_vm0 = vmmov 0  }
  0xa4   :  { %2746 = vmatprep.subr.bf16.mxu1 %v8180_v18  ;;  %v8222_v50 = vld [vmem:[#allocation7 + $0xb0] ss:$28 sps:$4 sm:$0xff]   ;;  %v8225_v51 = vld [vmem:[#allocation7 + $0x268] ss:$28 sps:$4 sm:$0xff]   ;;  %v9131_v52 = vpack.c.bf16 %v138_v49, %v138_v49  ;;  %v8231_v56 = vld [vmem:[#allocation7 + $0x2a0] ss:$28 sps:$4 sm:$0xff]  }
  0xa5   :  { %v8230_v54 = vld [vmem:[#allocation7 + $0xec] ss:$28 sps:$4 sm:$0xff]   ;;  %v8236_v58 = vld [vmem:[#allocation7 + $0x124] ss:$28 sps:$4 sm:$0xff]   ;;  %v8237_v60 = vld [vmem:[#allocation7 + $0x2d8] ss:$28 sps:$4 sm:$0xff]  }
  0xa6   :  { %2624 = vmatpush1.bf16.msra.mxu0 %v8182_v19  ;;  %2647 = vmatprep.mubr.bf16.mxu0 %v9131_v52  ;;  %v8228_v55 = vld [vmem:[#allocation7 + $0xe8] ss:$28 sps:$4 sm:$0xff]   ;;  %v8234_v59 = vld [vmem:[#allocation7 + $0x120] ss:$28 sps:$4 sm:$0xff]   ;;  %v8238_v61 = vld [vmem:[#allocation7 + $0x314] ss:$28 sps:$4 sm:$0xff]  }
  0xa7   :  { %2747 = vmatpush1.bf16.msra.mxu1 %v8183_v20  ;;  %2625 = vmatprep.subr.bf16.mxu0 %v8184_v21  ;;  %v8242_v62 = vld [vmem:[#allocation7 + $0x15c] ss:$28 sps:$4 sm:$0xff]   ;;  %v8243_v1 = vld [vmem:[#allocation7 + $0x310] ss:$28 sps:$4 sm:$0xff]   ;;  %v8249_v5 = vld [vmem:[#allocation7 + $0x348] ss:$28 sps:$4 sm:$0xff]  }
  0xa8   :  { %2748 = vmatprep.subr.bf16.mxu1 %v8186_v22  ;;  %v8240_v63 = vld [vmem:[#allocation7 + $0x158] ss:$28 sps:$4 sm:$0xff]   ;;  %v8244_v2 = vld [vmem:[#allocation7 + $0x34c] ss:$28 sps:$4 sm:$0xff]   ;;  %v8252_v6 = vld [vmem:[#allocation7 + $0x384] ss:$28 sps:$4 sm:$0xff]  }
  0xa9   :  { %v8248_v3 = vld [vmem:[#allocation7 + $0x194] ss:$28 sps:$4 sm:$0xff]   ;;  %v137_v7 = vld [vmem:[%s9405_s0] sm:$0xff]  ;;  %v8255_v8 = vld [vmem:[#allocation7 + $0x1cc] ss:$28 sps:$4 sm:$0xff]   ;;  %vm6981_vm1 = vcmask 523264  }
  0xaa   :  { %2626 = vmatpush1.bf16.msra.mxu0 %v8188_v23  ;;  %v8246_v4 = vld [vmem:[#allocation7 + $0x190] ss:$28 sps:$4 sm:$0xff]   ;;  %v8250_v9 = vld [vmem:[#allocation7 + $0x380] ss:$28 sps:$4 sm:$0xff]   ;;  %v9138_v10 = vpack.c.bf16 %v137_v7, %v137_v7  ;;  %v8253_v11 = vld [vmem:[#allocation7 + $0x1c8] ss:$28 sps:$4 sm:$0xff]  }
  0xab   :  { %2749 = vmatpush1.bf16.msra.mxu1 %v8189_v24  ;;  %2627 = vmatprep.subr.bf16.mxu0 %v8190_v25  ;;  %v8258_v12 = vld [vmem:[#allocation7 + $0x3bc] ss:$28 sps:$4 sm:$0xff]   ;;  %v8261_v13 = vld [vmem:[#allocation7 + $0x204] ss:$28 sps:$4 sm:$0xff]   ;;  %v8264_v16 = vld [vmem:[#allocation7 + $0x3f4] ss:$28 sps:$4 sm:$0xff]  }
  0xac   :  { %2750 = vmatprep.subr.bf16.mxu1 %v8192_v26  ;;  %v8256_v14 = vld [vmem:[#allocation7 + $0x3b8] ss:$28 sps:$4 sm:$0xff]   ;;  %v8259_v15 = vld [vmem:[#allocation7 + $0x200] ss:$28 sps:$4 sm:$0xff]   ;;  %v8262_v18 = vld [vmem:[#allocation7 + $0x3f0] ss:$28 sps:$4 sm:$0xff]  }
  0xad   :  { %v8267_v17 = vld [vmem:[#allocation7 + $0x23c] ss:$28 sps:$4 sm:$0xff]   ;;  %v8270_v20 = vld [vmem:[#allocation7 + $0x42c] ss:$28 sps:$4 sm:$0xff]   ;;  %v8273_v21 = vld [vmem:[#allocation7 + $0x274] ss:$28 sps:$4 sm:$0xff]  }
  0xae   :  { %2628 = vmatpush1.bf16.msra.mxu0 %v8194_v27  ;;  %v8265_v19 = vld [vmem:[#allocation7 + $0x238] ss:$28 sps:$4 sm:$0xff]   ;;  %v8268_v22 = vld [vmem:[#allocation7 + $0x428] ss:$28 sps:$4 sm:$0xff]   ;;  %v8271_v23 = vld [vmem:[#allocation7 + $0x270] ss:$28 sps:$4 sm:$0xff]  }
  0xaf   :  { %2751 = vmatpush1.bf16.msra.mxu1 %v8195_v28  ;;  %2629 = vmatprep.subr.bf16.mxu0 %v8196_v29  ;;  %v8276_v24 = vld [vmem:[#allocation7 + $0x464] ss:$28 sps:$4 sm:$0xff]   ;;  %v8279_v25 = vld [vmem:[#allocation7 + $0x2ac] ss:$28 sps:$4 sm:$0xff]   ;;  %v8282_v28 = vld [vmem:[#allocation7 + $0x49c] ss:$28 sps:$4 sm:$0xff]  }
  0xb0   :  { %2752 = vmatprep.subr.bf16.mxu1 %v8198_v30  ;;  %v8274_v26 = vld [vmem:[#allocation7 + $0x460] ss:$28 sps:$4 sm:$0xff]   ;;  %v8277_v27 = vld [vmem:[#allocation7 + $0x2a8] ss:$28 sps:$4 sm:$0xff]   ;;  %v8280_v30 = vld [vmem:[#allocation7 + $0x498] ss:$28 sps:$4 sm:$0xff]  }
  0xb1   :  { %v8285_v29 = vld [vmem:[#allocation7 + $0x2e4] ss:$28 sps:$4 sm:$0xff]   ;;  %v8291_v33 = vld [vmem:[#allocation7 + $0x31c] ss:$28 sps:$4 sm:$0xff]   ;;  %v8334_v7 = vld [vmem:[#allocation7 + $0x690] ss:$28 sps:$4 sm:$0xff]  }
  0xb2   :  { %2630 = vmatpush1.bf16.msra.mxu0 %v8200_v31  ;;  %v8283_v31 = vld [vmem:[#allocation7 + $0x2e0] ss:$28 sps:$4 sm:$0xff]   ;;  %v8304_v49 = vld [vmem:[#allocation7 + $0x578] ss:$28 sps:$4 sm:$0xff]   ;;  %vm7025_vm2 = vcmask 74752  }
  0xb3   :  { %2753 = vmatpush1.bf16.msra.mxu1 %v8201_v32  ;;  %2631 = vmatprep.subr.bf16.mxu0 %v8202_v34  ;;  %v8288_v32 = vld [vmem:[#allocation7 + $0x4d4] ss:$28 sps:$4 sm:$0xff]  }
  0xb4   :  { %2779 = vmatprep.subr.bf16.mxu1 %v8206_v35  ;;  %v140_v34 = vld [vmem:[%s9405_s0 + $0x18] sm:$0xff] }
  0xb5   :  { %v8286_v35 = vld [vmem:[#allocation7 + $0x4d0] ss:$28 sps:$4 sm:$0xff]  }
  0xb6   :  { %2771 = vmatmul.mubr.bf16.vlgmr.msra.gmra.mrb[0].mxu1 %v9125_v38  ;;  %2632 = vmatpush1.bf16.msra.mxu0 %v8207_v37  ;;  %v8289_v37 = vld [vmem:[#allocation7 + $0x318] ss:$28 sps:$4 sm:$0xff]  }
  0xb7   :  { %2780 = vmatpush1.bf16.msra.mxu1 %v8204_v36  ;;  %2633 = vmatprep.subr.bf16.mxu0 %v8208_v39  ;;  %v9144_v36 = vpack.c.bf16 %v140_v34, %v140_v34  ;;  %v8294_v39 = vld [vmem:[#allocation7 + $0x50c] ss:$28 sps:$4 sm:$0xff]   ;;  %v8372_v34 = vld [vmem:[#allocation7 + $0x7e4] ss:$28 sps:$4 sm:$0xff]  }
  0xb8   :  { %2781 = vmatprep.subr.bf16.mxu1 %v8212_v40  ;;  %2811 = vmatprep.mubr.bf16.mxu1 %v9131_v52  ;;  %v8297_v40 = vld [vmem:[#allocation7 + $0x354] ss:$28 sps:$4 sm:$0xff]  }
  0xba   :  { %2634 = vmatpush1.bf16.msra.mxu0 %v8213_v42  ;;  %v8295_v42 = vld [vmem:[#allocation7 + $0x350] ss:$28 sps:$4 sm:$0xff]  }
  0xbb   :  { %2782 = vmatpush1.bf16.msra.mxu1 %v8210_v41  ;;  %2635 = vmatprep.subr.bf16.mxu0 %v8214_v43  ;;  %v8292_v41 = vld [vmem:[#allocation7 + $0x508] ss:$28 sps:$4 sm:$0xff]  }
  0xbc   :  { %2783 = vmatprep.subr.bf16.mxu1 %v8218_v44  ;;  %v8300_v43 = vld [vmem:[#allocation7 + $0x544] ss:$28 sps:$4 sm:$0xff]   ;;  %v8303_v44 = vld [vmem:[#allocation7 + $0x38c] ss:$28 sps:$4 sm:$0xff]  }
  0xbe   :  { %2636 = vmatpush1.bf16.msra.mxu0 %v8219_v46  ;;  %v8301_v46 = vld [vmem:[#allocation7 + $0x388] ss:$28 sps:$4 sm:$0xff]  }
  0xbf   :  { %2784 = vmatpush1.bf16.msra.mxu1 %v8216_v45  ;;  %2637 = vmatprep.subr.bf16.mxu0 %v8220_v47  ;;  %v8298_v45 = vld [vmem:[#allocation7 + $0x540] ss:$28 sps:$4 sm:$0xff]  }
  0xc0   :  { %2785 = vmatprep.subr.bf16.mxu1 %v8224_v48  ;;  %v8306_v47 = vld [vmem:[#allocation7 + $0x57c] ss:$28 sps:$4 sm:$0xff]   ;;  %v8309_v48 = vld [vmem:[#allocation7 + $0x3c4] ss:$28 sps:$4 sm:$0xff]  }
  0xc2   :  { %2638 = vmatpush1.bf16.msra.mxu0 %v8225_v51  ;;  %v8312_v51 = vld [vmem:[#allocation7 + $0x5b4] ss:$28 sps:$4 sm:$0xff]  }
  0xc3   :  { %2786 = vmatpush1.bf16.msra.mxu1 %v8222_v50  ;;  %2639 = vmatprep.subr.bf16.mxu0 %v8226_v53  ;;  %v8307_v50 = vld [vmem:[#allocation7 + $0x3c0] ss:$28 sps:$4 sm:$0xff]  }
  0xc4   :  { %2787 = vmatprep.subr.bf16.mxu1 %v8230_v54  ;;  %v8315_v53 = vld [vmem:[#allocation7 + $0x3fc] ss:$28 sps:$4 sm:$0xff]   ;;  %v8310_v54 = vld [vmem:[#allocation7 + $0x5b0] ss:$28 sps:$4 sm:$0xff]  }
  0xc6   :  { %2640 = vmatpush1.bf16.msra.mxu0 %v8231_v56  ;;  %v8318_v56 = vld [vmem:[#allocation7 + $0x5ec] ss:$28 sps:$4 sm:$0xff]  }
  0xc7   :  { %2788 = vmatpush1.bf16.msra.mxu1 %v8228_v55  ;;  %2641 = vmatprep.subr.bf16.mxu0 %v8232_v57  ;;  %v8313_v55 = vld [vmem:[#allocation7 + $0x3f8] ss:$28 sps:$4 sm:$0xff]  }
  0xc8   :  { %2789 = vmatprep.subr.bf16.mxu1 %v8236_v58  ;;  %v8321_v57 = vld [vmem:[#allocation7 + $0x434] ss:$28 sps:$4 sm:$0xff]   ;;  %v8316_v58 = vld [vmem:[#allocation7 + $0x5e8] ss:$28 sps:$4 sm:$0xff]  }
  0xca   :  { %2642 = vmatpush1.bf16.msra.mxu0 %v8237_v60  ;;  %v8324_v60 = vld [vmem:[#allocation7 + $0x624] ss:$28 sps:$4 sm:$0xff]  }
  0xcb   :  { %2790 = vmatpush1.bf16.msra.mxu1 %v8234_v59  ;;  %2643 = vmatprep.subr.bf16.mxu0 %v8238_v61  ;;  %v8319_v59 = vld [vmem:[#allocation7 + $0x430] ss:$28 sps:$4 sm:$0xff]  }
  0xcc   :  { %2791 = vmatprep.subr.bf16.mxu1 %v8242_v62  ;;  %v8327_v61 = vld [vmem:[#allocation7 + $0x46c] ss:$28 sps:$4 sm:$0xff]   ;;  %v8322_v62 = vld [vmem:[#allocation7 + $0x620] ss:$28 sps:$4 sm:$0xff]  }
  0xce   :  { %2644 = vmatpush1.bf16.msra.mxu0 %v8243_v1  ;;  %v8330_v1 = vld [vmem:[#allocation7 + $0x65c] ss:$28 sps:$4 sm:$0xff]  }
  0xcf   :  { %2792 = vmatpush1.bf16.msra.mxu1 %v8240_v63  ;;  %2645 = vmatprep.subr.bf16.mxu0 %v8244_v2  ;;  %v8325_v63 = vld [vmem:[#allocation7 + $0x468] ss:$28 sps:$4 sm:$0xff]  }
  0xd0   :  { %2793 = vmatprep.subr.bf16.mxu1 %v8248_v3  ;;  %v8333_v2 = vld [vmem:[#allocation7 + $0x4a4] ss:$28 sps:$4 sm:$0xff]   ;;  %v8328_v3 = vld [vmem:[#allocation7 + $0x658] ss:$28 sps:$4 sm:$0xff]  }
  0xd2   :  { %2646 = vmatpush1.bf16.msra.mxu0 %v8249_v5  ;;  %v8336_v5 = vld [vmem:[#allocation7 + $0x694] ss:$28 sps:$4 sm:$0xff]  }
  0xd3   :  { %2794 = vmatpush1.bf16.msra.mxu1 %v8246_v4  ;;  %2656 = vmatprep.subr.bf16.mxu0 %v8252_v6  ;;  %v8331_v4 = vld [vmem:[#allocation7 + $0x4a0] ss:$28 sps:$4 sm:$0xff]  }
  0xd4   :  { %2795 = vmatprep.subr.bf16.mxu1 %v8255_v8  ;;  %v8339_v6 = vld [vmem:[#allocation7 + $0x4dc] ss:$28 sps:$4 sm:$0xff]  }
  0xd5   :  { %2648 = vmatmul.mubr.bf16.vlgmr.msra.gmra.mrb[0].mxu0 %v9138_v10  ;;  %v8337_v8 = vld [vmem:[#allocation7 + $0x4d8] ss:$28 sps:$4 sm:$0xff]  }
  0xd6   :  { %2657 = vmatpush1.bf16.msra.mxu0 %v8250_v9  ;;  %2688 = vmatprep.mubr.bf16.mxu0 %v9144_v36  ;;  %v8342_v9 = vld [vmem:[#allocation7 + $0x6cc] ss:$28 sps:$4 sm:$0xff]  }
  0xd7   :  { %2796 = vmatpush1.bf16.msra.mxu1 %v8253_v11  ;;  %2658 = vmatprep.subr.bf16.mxu0 %v8258_v12  ;;  %v8345_v11 = vld [vmem:[#allocation7 + $0x514] ss:$28 sps:$4 sm:$0xff]   ;;  %v8340_v12 = vld [vmem:[#allocation7 + $0x6c8] ss:$28 sps:$4 sm:$0xff]  }
  0xd8   :  { %2797 = vmatprep.subr.bf16.mxu1 %v8261_v13  ;;  %v8343_v13 = vld [vmem:[#allocation7 + $0x510] ss:$28 sps:$4 sm:$0xff]  }
  0xda   :  { %2659 = vmatpush1.bf16.msra.mxu0 %v8256_v14  ;;  %v139_v14 = vld [vmem:[%s9405_s0 + $0x10] sm:$0xff] }
  0xdb   :  { %2798 = vmatpush1.bf16.msra.mxu1 %v8259_v15  ;;  %2660 = vmatprep.subr.bf16.mxu0 %v8264_v16  ;;  %v8348_v15 = vld [vmem:[#allocation7 + $0x704] ss:$28 sps:$4 sm:$0xff]   ;;  %v8351_v16 = vld [vmem:[#allocation7 + $0x54c] ss:$28 sps:$4 sm:$0xff]  }
  0xdc   :  { %2799 = vmatprep.subr.bf16.mxu1 %v8267_v17  ;;  %v8346_v17 = vld [vmem:[#allocation7 + $0x700] ss:$28 sps:$4 sm:$0xff]  }
  0xde   :  { %2661 = vmatpush1.bf16.msra.mxu0 %v8262_v18  ;;  %v9152_v18 = vpack.c.bf16 %v139_v14, %v139_v14  ;;  %v8427_v14 = vld [vmem:[#allocation7 + $0x820] ss:$28 sps:$4 sm:$0xff]  }
  0xdf   :  { %2800 = vmatpush1.bf16.msra.mxu1 %v8265_v19  ;;  %2662 = vmatprep.subr.bf16.mxu0 %v8270_v20  ;;  %v8349_v19 = vld [vmem:[#allocation7 + $0x548] ss:$28 sps:$4 sm:$0xff]   ;;  %v8354_v20 = vld [vmem:[#allocation7 + $0x73c] ss:$28 sps:$4 sm:$0xff]  }
  0xe0   :  { %2801 = vmatprep.subr.bf16.mxu1 %v8273_v21  ;;  %v8357_v21 = vld [vmem:[#allocation7 + $0x584] ss:$28 sps:$4 sm:$0xff]  }
  0xe2   :  { %2663 = vmatpush1.bf16.msra.mxu0 %v8268_v22  ;;  %v142_v22 = vld [vmem:[%s9405_s0 + $0x28] sm:$0xff] }
  0xe3   :  { %2802 = vmatpush1.bf16.msra.mxu1 %v8271_v23  ;;  %2664 = vmatprep.subr.bf16.mxu0 %v8276_v24  ;;  %v9157_v23 = vpack.c.bf16 %v142_v22, %v142_v22  ;;  %v8352_v24 = vld [vmem:[#allocation7 + $0x738] ss:$28 sps:$4 sm:$0xff]   ;;  %v8436_v22 = vld [vmem:[#allocation7 + $0xa48] ss:$28 sps:$4 sm:$0xff]  }
  0xe4   :  { %2803 = vmatprep.subr.bf16.mxu1 %v8279_v25  ;;  %v8355_v25 = vld [vmem:[#allocation7 + $0x580] ss:$28 sps:$4 sm:$0xff]  }
  0xe6   :  { %2665 = vmatpush1.bf16.msra.mxu0 %v8274_v26  ;;  %v8360_v26 = vld [vmem:[#allocation7 + $0x774] ss:$28 sps:$4 sm:$0xff]  }
  0xe7   :  { %2804 = vmatpush1.bf16.msra.mxu1 %v8277_v27  ;;  %2666 = vmatprep.subr.bf16.mxu0 %v8282_v28  ;;  %v8363_v27 = vld [vmem:[#allocation7 + $0x5bc] ss:$28 sps:$4 sm:$0xff]   ;;  %v8358_v28 = vld [vmem:[#allocation7 + $0x770] ss:$28 sps:$4 sm:$0xff]  }
  0xe8   :  { %2805 = vmatprep.subr.bf16.mxu1 %v8285_v29  ;;  %v8361_v29 = vld [vmem:[#allocation7 + $0x5b8] ss:$28 sps:$4 sm:$0xff]  }
  0xea   :  { %2667 = vmatpush1.bf16.msra.mxu0 %v8280_v30  ;;  %v8366_v30 = vld [vmem:[#allocation7 + $0x7ac] ss:$28 sps:$4 sm:$0xff]  }
  0xeb   :  { %2806 = vmatpush1.bf16.msra.mxu1 %v8283_v31  ;;  %2668 = vmatprep.subr.bf16.mxu0 %v8288_v32  ;;  %v8369_v31 = vld [vmem:[#allocation7 + $0x5f4] ss:$28 sps:$4 sm:$0xff]   ;;  %v8364_v32 = vld [vmem:[#allocation7 + $0x7a8] ss:$28 sps:$4 sm:$0xff]  }
  0xec   :  { %2807 = vmatprep.subr.bf16.mxu1 %v8291_v33  ;;  %v8367_v33 = vld [vmem:[#allocation7 + $0x5f0] ss:$28 sps:$4 sm:$0xff]  }
  0xee   :  { %2669 = vmatpush1.bf16.msra.mxu0 %v8286_v35  ;;  %v8375_v35 = vld [vmem:[#allocation7 + $0x62c] ss:$28 sps:$4 sm:$0xff]  }
  0xef   :  { %2808 = vmatpush1.bf16.msra.mxu1 %v8289_v37  ;;  %2670 = vmatprep.subr.bf16.mxu0 %v8294_v39  ;;  %v8370_v37 = vld [vmem:[#allocation7 + $0x7e0] ss:$28 sps:$4 sm:$0xff]   ;;  %v8373_v39 = vld [vmem:[#allocation7 + $0x628] ss:$28 sps:$4 sm:$0xff]  }
  0xf0   :  { %2809 = vmatprep.subr.bf16.mxu1 %v8297_v40  ;;  %v8378_v40 = vld [vmem:[#allocation7 + $0x81c] ss:$28 sps:$4 sm:$0xff]  }
  0xf2   :  { %2671 = vmatpush1.bf16.msra.mxu0 %v8292_v41  ;;  %v8381_v41 = vld [vmem:[#allocation7 + $0x664] ss:$28 sps:$4 sm:$0xff]  }
  0xf3   :  { %2810 = vmatpush1.bf16.msra.mxu1 %v8295_v42  ;;  %2672 = vmatprep.subr.bf16.mxu0 %v8300_v43  ;;  %v8376_v42 = vld [vmem:[#allocation7 + $0x818] ss:$28 sps:$4 sm:$0xff]   ;;  %v8379_v43 = vld [vmem:[#allocation7 + $0x660] ss:$28 sps:$4 sm:$0xff]  }
  0xf4   :  { %2820 = vmatprep.subr.bf16.mxu1 %v8303_v44  ;;  %v8384_v44 = vld [vmem:[#allocation7 + $0x854] ss:$28 sps:$4 sm:$0xff]  }
  0xf6   :  { %2812 = vmatmul.mubr.bf16.vlgmr.msra.gmra.mrb[4].mxu1 %v9138_v10  ;;  %2673 = vmatpush1.bf16.msra.mxu0 %v8298_v45  ;;  %v8387_v45 = vld [vmem:[#allocation7 + $0x69c] ss:$28 sps:$4 sm:$0xff]  }
  0xf7   :  { %2821 = vmatpush1.bf16.msra.mxu1 %v8301_v46  ;;  %2674 = vmatprep.subr.bf16.mxu0 %v8306_v47  ;;  %v8382_v46 = vld [vmem:[#allocation7 + $0x850] ss:$28 sps:$4 sm:$0xff]   ;;  %v8385_v47 = vld [vmem:[#allocation7 + $0x698] ss:$28 sps:$4 sm:$0xff]  }
  0xf8   :  { %2822 = vmatprep.subr.bf16.mxu1 %v8309_v48  ;;  %2852 = vmatprep.mubr.bf16.mxu1 %v9144_v36  ;;  %v8390_v48 = vld [vmem:[#allocation7 + $0x88c] ss:$28 sps:$4 sm:$0xff]  }
  0xfa   :  { %2675 = vmatpush1.bf16.msra.mxu0 %v8304_v49  ;;  %v8393_v49 = vld [vmem:[#allocation7 + $0x6d4] ss:$28 sps:$4 sm:$0xff]  }
  0xfb   :  { %2823 = vmatpush1.bf16.msra.mxu1 %v8307_v50  ;;  %2676 = vmatprep.subr.bf16.mxu0 %v8312_v51  ;;  %v8388_v50 = vld [vmem:[#allocation7 + $0x888] ss:$28 sps:$4 sm:$0xff]   ;;  %v8391_v51 = vld [vmem:[#allocation7 + $0x6d0] ss:$28 sps:$4 sm:$0xff]  }
  0xfc   :  { %2824 = vmatprep.subr.bf16.mxu1 %v8315_v53  ;;  %v8396_v53 = vld [vmem:[#allocation7 + $0x8c4] ss:$28 sps:$4 sm:$0xff]  }
  0xfe   :  { %2677 = vmatpush1.bf16.msra.mxu0 %v8310_v54  ;;  %v8399_v54 = vld [vmem:[#allocation7 + $0x70c] ss:$28 sps:$4 sm:$0xff]  }
  0xff   :  { %2825 = vmatpush1.bf16.msra.mxu1 %v8313_v55  ;;  %2678 = vmatprep.subr.bf16.mxu0 %v8318_v56  ;;  %v8394_v55 = vld [vmem:[#allocation7 + $0x8c0] ss:$28 sps:$4 sm:$0xff]   ;;  %v8397_v56 = vld [vmem:[#allocation7 + $0x708] ss:$28 sps:$4 sm:$0xff]  }
 0x100   :  { %2826 = vmatprep.subr.bf16.mxu1 %v8321_v57  ;;  %v8402_v57 = vld [vmem:[#allocation7 + $0x8fc] ss:$28 sps:$4 sm:$0xff]  }
 0x102   :  { %2679 = vmatpush1.bf16.msra.mxu0 %v8316_v58  ;;  %v8405_v58 = vld [vmem:[#allocation7 + $0x744] ss:$28 sps:$4 sm:$0xff]  }
 0x103   :  { %2827 = vmatpush1.bf16.msra.mxu1 %v8319_v59  ;;  %2680 = vmatprep.subr.bf16.mxu0 %v8324_v60  ;;  %v8400_v59 = vld [vmem:[#allocation7 + $0x8f8] ss:$28 sps:$4 sm:$0xff]   ;;  %v8403_v60 = vld [vmem:[#allocation7 + $0x740] ss:$28 sps:$4 sm:$0xff]  }
 0x104   :  { %2828 = vmatprep.subr.bf16.mxu1 %v8327_v61  ;;  %v8408_v61 = vld [vmem:[#allocation7 + $0x934] ss:$28 sps:$4 sm:$0xff]  }
 0x106   :  { %2681 = vmatpush1.bf16.msra.mxu0 %v8322_v62  ;;  %v8411_v62 = vld [vmem:[#allocation7 + $0x77c] ss:$28 sps:$4 sm:$0xff]  }
 0x107   :  { %2829 = vmatpush1.bf16.msra.mxu1 %v8325_v63  ;;  %2682 = vmatprep.subr.bf16.mxu0 %v8330_v1  ;;  %v8406_v63 = vld [vmem:[#allocation7 + $0x930] ss:$28 sps:$4 sm:$0xff]   ;;  %v8409_v1 = vld [vmem:[#allocation7 + $0x778] ss:$28 sps:$4 sm:$0xff]  }
 0x108   :  { %2830 = vmatprep.subr.bf16.mxu1 %v8333_v2  ;;  %v8414_v2 = vld [vmem:[#allocation7 + $0x96c] ss:$28 sps:$4 sm:$0xff]  }
 0x10a   :  { %2683 = vmatpush1.bf16.msra.mxu0 %v8328_v3  ;;  %v8417_v3 = vld [vmem:[#allocation7 + $0x7b4] ss:$28 sps:$4 sm:$0xff]  }
 0x10b   :  { %2831 = vmatpush1.bf16.msra.mxu1 %v8331_v4  ;;  %2684 = vmatprep.subr.bf16.mxu0 %v8336_v5  ;;  %v8412_v4 = vld [vmem:[#allocation7 + $0x968] ss:$28 sps:$4 sm:$0xff]   ;;  %v8415_v5 = vld [vmem:[#allocation7 + $0x7b0] ss:$28 sps:$4 sm:$0xff]  }
 0x10c   :  { %2832 = vmatprep.subr.bf16.mxu1 %v8339_v6  ;;  %v8420_v6 = vld [vmem:[#allocation7 + $0x9a4] ss:$28 sps:$4 sm:$0xff]  }
 0x10e   :  { %2685 = vmatpush1.bf16.msra.mxu0 %v8334_v7  ;;  %v8423_v7 = vld [vmem:[#allocation7 + $0x7ec] ss:$28 sps:$4 sm:$0xff]  }
 0x10f   :  { %2833 = vmatpush1.bf16.msra.mxu1 %v8337_v8  ;;  %2686 = vmatprep.subr.bf16.mxu0 %v8342_v9  ;;  %v8418_v8 = vld [vmem:[#allocation7 + $0x9a0] ss:$28 sps:$4 sm:$0xff]   ;;  %v8421_v9 = vld [vmem:[#allocation7 + $0x7e8] ss:$28 sps:$4 sm:$0xff]  }
 0x110   :  { %2834 = vmatprep.subr.bf16.mxu1 %v8345_v11  ;;  %v8426_v11 = vld [vmem:[#allocation7 + $0x9dc] ss:$28 sps:$4 sm:$0xff]  }
 0x112   :  { %2687 = vmatpush1.bf16.msra.mxu0 %v8340_v12  ;;  %v8429_v12 = vld [vmem:[#allocation7 + $0x824] ss:$28 sps:$4 sm:$0xff]  }
 0x113   :  { %2835 = vmatpush1.bf16.msra.mxu1 %v8343_v13  ;;  %2697 = vmatprep.subr.bf16.mxu0 %v8348_v15  ;;  %v8424_v13 = vld [vmem:[#allocation7 + $0x9d8] ss:$28 sps:$4 sm:$0xff]  }
 0x114   :  { %2836 = vmatprep.subr.bf16.mxu1 %v8351_v16  ;;  %v8432_v15 = vld [vmem:[#allocation7 + $0xa14] ss:$28 sps:$4 sm:$0xff]   ;;  %v8435_v16 = vld [vmem:[#allocation7 + $0x85c] ss:$28 sps:$4 sm:$0xff]  }
 0x115   :  { %2689 = vmatmul.mubr.bf16.vlgmr.msra.gmra.mrb[0].mxu0 %v9152_v18 }
 0x116   :  { %2698 = vmatpush1.bf16.msra.mxu0 %v8346_v17  ;;  %2729 = vmatprep.mubr.bf16.mxu0 %v9157_v23  ;;  %v8430_v17 = vld [vmem:[#allocation7 + $0xa10] ss:$28 sps:$4 sm:$0xff]  }
 0x117   :  { %2837 = vmatpush1.bf16.msra.mxu1 %v8349_v19  ;;  %2699 = vmatprep.subr.bf16.mxu0 %v8354_v20  ;;  %v8433_v19 = vld [vmem:[#allocation7 + $0x858] ss:$28 sps:$4 sm:$0xff]   ;;  %v8438_v20 = vld [vmem:[#allocation7 + $0xa4c] ss:$28 sps:$4 sm:$0xff]  }
 0x118   :  { %2838 = vmatprep.subr.bf16.mxu1 %v8357_v21  ;;  %v8441_v21 = vld [vmem:[#allocation7 + $0x894] ss:$28 sps:$4 sm:$0xff]  }
 0x11a   :  { %2700 = vmatpush1.bf16.msra.mxu0 %v8352_v24  ;;  %v8439_v24 = vld [vmem:[#allocation7 + $0x890] ss:$28 sps:$4 sm:$0xff]  }
 0x11b   :  { %2839 = vmatpush1.bf16.msra.mxu1 %v8355_v25  ;;  %2701 = vmatprep.subr.bf16.mxu0 %v8360_v26  ;;  %v141_v25 = vld [vmem:[%s9405_s0 + $0x20] sm:$0xff]  ;;  %v8444_v26 = vld [vmem:[#allocation7 + $0x8cc] ss:$28 sps:$4 sm:$0xff]  }
 0x11c   :  { %2840 = vmatprep.subr.bf16.mxu1 %v8363_v27  ;;  %v8447_v27 = vld [vmem:[#allocation7 + $0x14] ss:$28 sps:$4 sm:$0xff]  }
 0x11e   :  { %2702 = vmatpush1.bf16.msra.mxu0 %v8358_v28  ;;  %v8442_v28 = vld [vmem:[#allocation7 + $0x8c8] ss:$28 sps:$4 sm:$0xff]  }
 0x11f   :  { %2841 = vmatpush1.bf16.msra.mxu1 %v8361_v29  ;;  %2703 = vmatprep.subr.bf16.mxu0 %v8366_v30  ;;  %v9166_v29 = vpack.c.bf16 %v141_v25, %v141_v25  ;;  %v8445_v30 = vld [vmem:[#allocation7 + $0x10] ss:$28 sps:$4 sm:$0xff]   ;;  %v8523_v25 = vld [vmem:[#allocation7 + $0x2e8] ss:$28 sps:$4 sm:$0xff]  }
 0x120   :  { %2842 = vmatprep.subr.bf16.mxu1 %v8369_v31  ;;  %v8450_v31 = vld [vmem:[#allocation7 + $0x904] ss:$28 sps:$4 sm:$0xff]  }
 0x122   :  { %2704 = vmatpush1.bf16.msra.mxu0 %v8364_v32  ;;  %v8453_v32 = vld [vmem:[#allocation7 + $0x4c] ss:$28 sps:$4 sm:$0xff]  }
 0x123   :  { %2843 = vmatpush1.bf16.msra.mxu1 %v8367_v33  ;;  %2705 = vmatprep.subr.bf16.mxu0 %v8372_v34  ;;  %v8448_v33 = vld [vmem:[#allocation7 + $0x900] ss:$28 sps:$4 sm:$0xff]   ;;  %v8451_v34 = vld [vmem:[#allocation7 + $0x48] ss:$28 sps:$4 sm:$0xff]  }
 0x124   :  { %2844 = vmatprep.subr.bf16.mxu1 %v8375_v35  ;;  %v8456_v35 = vld [vmem:[#allocation7 + $0x93c] ss:$28 sps:$4 sm:$0xff]  }
 0x126   :  { %2706 = vmatpush1.bf16.msra.mxu0 %v8370_v37  ;;  %v8459_v37 = vld [vmem:[#allocation7 + $0x84] ss:$28 sps:$4 sm:$0xff]  }
 0x127   :  { %2845 = vmatpush1.bf16.msra.mxu1 %v8373_v39  ;;  %2707 = vmatprep.subr.bf16.mxu0 %v8378_v40  ;;  %v8454_v39 = vld [vmem:[#allocation7 + $0x938] ss:$28 sps:$4 sm:$0xff]   ;;  %v8457_v40 = vld [vmem:[#allocation7 + $0x80] ss:$28 sps:$4 sm:$0xff]  }
 0x128   :  { %2846 = vmatprep.subr.bf16.mxu1 %v8381_v41  ;;  %v8462_v41 = vld [vmem:[#allocation7 + $0x974] ss:$28 sps:$4 sm:$0xff]  }
 0x12a   :  { %2708 = vmatpush1.bf16.msra.mxu0 %v8376_v42  ;;  %v8465_v42 = vld [vmem:[#allocation7 + $0xbc] ss:$28 sps:$4 sm:$0xff]  }
 0x12b   :  { %2847 = vmatpush1.bf16.msra.mxu1 %v8379_v43  ;;  %2709 = vmatprep.subr.bf16.mxu0 %v8384_v44  ;;  %v8460_v43 = vld [vmem:[#allocation7 + $0x970] ss:$28 sps:$4 sm:$0xff]   ;;  %v8463_v44 = vld [vmem:[#allocation7 + $0xb8] ss:$28 sps:$4 sm:$0xff]  }
 0x12c   :  { %2848 = vmatprep.subr.bf16.mxu1 %v8387_v45  ;;  %v8468_v45 = vld [vmem:[#allocation7 + $0x9ac] ss:$28 sps:$4 sm:$0xff]  }
 0x12e   :  { %2710 = vmatpush1.bf16.msra.mxu0 %v8382_v46  ;;  %v8471_v46 = vld [vmem:[#allocation7 + $0xf4] ss:$28 sps:$4 sm:$0xff]  }
 0x12f   :  { %2849 = vmatpush1.bf16.msra.mxu1 %v8385_v47  ;;  %2711 = vmatprep.subr.bf16.mxu0 %v8390_v48  ;;  %v8466_v47 = vld [vmem:[#allocation7 + $0x9a8] ss:$28 sps:$4 sm:$0xff]   ;;  %v8469_v48 = vld [vmem:[#allocation7 + $0xf0] ss:$28 sps:$4 sm:$0xff]  }
 0x130   :  { %2850 = vmatprep.subr.bf16.mxu1 %v8393_v49  ;;  %v8474_v49 = vld [vmem:[#allocation7 + $0x9e4] ss:$28 sps:$4 sm:$0xff]  }
 0x132   :  { %2712 = vmatpush1.bf16.msra.mxu0 %v8388_v50  ;;  %v8477_v50 = vld [vmem:[#allocation7 + $0x12c] ss:$28 sps:$4 sm:$0xff]  }
 0x133   :  { %2851 = vmatpush1.bf16.msra.mxu1 %v8391_v51  ;;  %2713 = vmatprep.subr.bf16.mxu0 %v8396_v53  ;;  %v8472_v51 = vld [vmem:[#allocation7 + $0x9e0] ss:$28 sps:$4 sm:$0xff]   ;;  %v8475_v53 = vld [vmem:[#allocation7 + $0x128] ss:$28 sps:$4 sm:$0xff]  }
 0x134   :  { %2861 = vmatprep.subr.bf16.mxu1 %v8399_v54  ;;  %v8480_v54 = vld [vmem:[#allocation7 + $0xa1c] ss:$28 sps:$4 sm:$0xff]  }
 0x136   :  { %2853 = vmatmul.mubr.bf16.vlgmr.msra.gmra.mrb[4].mxu1 %v9152_v18  ;;  %2714 = vmatpush1.bf16.msra.mxu0 %v8394_v55  ;;  %v8483_v55 = vld [vmem:[#allocation7 + $0x164] ss:$28 sps:$4 sm:$0xff]  }
 0x137   :  { %2862 = vmatpush1.bf16.msra.mxu1 %v8397_v56  ;;  %2715 = vmatprep.subr.bf16.mxu0 %v8402_v57  ;;  %v8478_v56 = vld [vmem:[#allocation7 + $0xa18] ss:$28 sps:$4 sm:$0xff]   ;;  %v8481_v57 = vld [vmem:[#allocation7 + $0x160] ss:$28 sps:$4 sm:$0xff]  }
 0x138   :  { %2863 = vmatprep.subr.bf16.mxu1 %v8405_v58  ;;  %2893 = vmatprep.mubr.bf16.mxu1 %v9157_v23  ;;  %v8486_v58 = vld [vmem:[#allocation7 + $0xa54] ss:$28 sps:$4 sm:$0xff]  }
 0x13a   :  { %2716 = vmatpush1.bf16.msra.mxu0 %v8400_v59  ;;  %v8489_v59 = vld [vmem:[#allocation7 + $0x19c] ss:$28 sps:$4 sm:$0xff]  }
 0x13b   :  { %2864 = vmatpush1.bf16.msra.mxu1 %v8403_v60  ;;  %2717 = vmatprep.subr.bf16.mxu0 %v8408_v61  ;;  %v8484_v60 = vld [vmem:[#allocation7 + $0xa50] ss:$28 sps:$4 sm:$0xff]   ;;  %v8487_v61 = vld [vmem:[#allocation7 + $0x198] ss:$28 sps:$4 sm:$0xff]  }
 0x13c   :  { %2865 = vmatprep.subr.bf16.mxu1 %v8411_v62  ;;  %v8492_v62 = vld [vmem:[#allocation7 + $0xa8c] ss:$28 sps:$4 sm:$0xff]  }
 0x13e   :  { %2718 = vmatpush1.bf16.msra.mxu0 %v8406_v63  ;;  %v8495_v63 = vld [vmem:[#allocation7 + $0x1d4] ss:$28 sps:$4 sm:$0xff]  }
 0x13f   :  { %2866 = vmatpush1.bf16.msra.mxu1 %v8409_v1  ;;  %2719 = vmatprep.subr.bf16.mxu0 %v8414_v2  ;;  %v8490_v1 = vld [vmem:[#allocation7 + $0xa88] ss:$28 sps:$4 sm:$0xff]   ;;  %v8493_v2 = vld [vmem:[#allocation7 + $0x1d0] ss:$28 sps:$4 sm:$0xff]  }
 0x140   :  { %2867 = vmatprep.subr.bf16.mxu1 %v8417_v3  ;;  %v8498_v3 = vld [vmem:[#allocation7 + $0xac4] ss:$28 sps:$4 sm:$0xff]  }
 0x142   :  { %2720 = vmatpush1.bf16.msra.mxu0 %v8412_v4  ;;  %v8501_v4 = vld [vmem:[#allocation7 + $0x20c] ss:$28 sps:$4 sm:$0xff]  }
 0x143   :  { %2868 = vmatpush1.bf16.msra.mxu1 %v8415_v5  ;;  %2721 = vmatprep.subr.bf16.mxu0 %v8420_v6  ;;  %v8496_v5 = vld [vmem:[#allocation7 + $0xac0] ss:$28 sps:$4 sm:$0xff]   ;;  %v8499_v6 = vld [vmem:[#allocation7 + $0x208] ss:$28 sps:$4 sm:$0xff]  }
 0x144   :  { %2869 = vmatprep.subr.bf16.mxu1 %v8423_v7  ;;  %v8504_v7 = vld [vmem:[#allocation7 + $0xafc] ss:$28 sps:$4 sm:$0xff]  }
 0x146   :  { %2722 = vmatpush1.bf16.msra.mxu0 %v8418_v8  ;;  %v8507_v8 = vld [vmem:[#allocation7 + $0x244] ss:$28 sps:$4 sm:$0xff]  }
 0x147   :  { %2870 = vmatpush1.bf16.msra.mxu1 %v8421_v9  ;;  %2723 = vmatprep.subr.bf16.mxu0 %v8426_v11  ;;  %v8502_v9 = vld [vmem:[#allocation7 + $0xaf8] ss:$28 sps:$4 sm:$0xff]   ;;  %v8505_v11 = vld [vmem:[#allocation7 + $0x240] ss:$28 sps:$4 sm:$0xff]  }
 0x148   :  { %2871 = vmatprep.subr.bf16.mxu1 %v8429_v12  ;;  %v8510_v12 = vld [vmem:[#allocation7 + $0xb34] ss:$28 sps:$4 sm:$0xff]  }
 0x14a   :  { %2724 = vmatpush1.bf16.msra.mxu0 %v8424_v13  ;;  %v8513_v13 = vld [vmem:[#allocation7 + $0x27c] ss:$28 sps:$4 sm:$0xff]  }
 0x14b   :  { %2872 = vmatpush1.bf16.msra.mxu1 %v8427_v14  ;;  %2725 = vmatprep.subr.bf16.mxu0 %v8432_v15  ;;  %v8508_v14 = vld [vmem:[#allocation7 + $0xb30] ss:$28 sps:$4 sm:$0xff]   ;;  %v8511_v15 = vld [vmem:[#allocation7 + $0x278] ss:$28 sps:$4 sm:$0xff]  }
 0x14c   :  { %2873 = vmatprep.subr.bf16.mxu1 %v8435_v16  ;;  %v8516_v16 = vld [vmem:[#allocation7 + $0xb6c] ss:$28 sps:$4 sm:$0xff]  }
 0x14e   :  { %2726 = vmatpush1.bf16.msra.mxu0 %v8430_v17  ;;  %v8519_v17 = vld [vmem:[#allocation7 + $0x2b4] ss:$28 sps:$4 sm:$0xff]  }
 0x14f   :  { %2874 = vmatpush1.bf16.msra.mxu1 %v8433_v19  ;;  %2727 = vmatprep.subr.bf16.mxu0 %v8438_v20  ;;  %v8514_v19 = vld [vmem:[#allocation7 + $0xb68] ss:$28 sps:$4 sm:$0xff]   ;;  %v8517_v20 = vld [vmem:[#allocation7 + $0x2b0] ss:$28 sps:$4 sm:$0xff]  }
 0x150   :  { %2875 = vmatprep.subr.bf16.mxu1 %v8441_v21  ;;  %v8522_v21 = vld [vmem:[#allocation7 + $0xba4] ss:$28 sps:$4 sm:$0xff]  }
 0x152   :  { %2728 = vmatpush1.bf16.msra.mxu0 %v8436_v22  ;;  %v8525_v22 = vld [vmem:[#allocation7 + $0x2ec] ss:$28 sps:$4 sm:$0xff]  }
 0x153   :  { %2876 = vmatpush1.bf16.msra.mxu1 %v8439_v24  ;;  %2943 = vmatprep.subr.bf16.mxu0 %v8447_v27  ;;  %v8520_v24 = vld [vmem:[#allocation7 + $0xba0] ss:$28 sps:$4 sm:$0xff]  }
 0x154   :  { %2877 = vmatprep.subr.bf16.mxu1 %v8444_v26  ;;  %v8528_v26 = vld [vmem:[#allocation7 + $0xbdc] ss:$28 sps:$4 sm:$0xff]   ;;  %v8531_v27 = vld [vmem:[#allocation7 + $0x324] ss:$28 sps:$4 sm:$0xff]  }
 0x155   :  { %2730 = vmatmul.mubr.bf16.vlgmr.msra.gmra.mrb[0].mxu0 %v9166_v29 }
 0x156   :  { %2944 = vmatpush1.bf16.msra.mxu0 %v8445_v30  ;;  %2975 = vmatprep.mubr.bf16.mxu0 %v9131_v52 }
 0x157   :  { %2878 = vmatpush1.bf16.msra.mxu1 %v8442_v28  ;;  %2945 = vmatprep.subr.bf16.mxu0 %v8453_v32  ;;  %v8526_v28 = vld [vmem:[#allocation7 + $0xbd8] ss:$28 sps:$4 sm:$0xff]  }
 0x158   :  { %2879 = vmatprep.subr.bf16.mxu1 %v8450_v31  ;;  %v8529_v31 = vld [vmem:[#allocation7 + $0x320] ss:$28 sps:$4 sm:$0xff]   ;;  %v8534_v32 = vld [vmem:[#allocation7 + $0xc14] ss:$28 sps:$4 sm:$0xff]  }
 0x15a   :  { %2946 = vmatpush1.bf16.msra.mxu0 %v8451_v34 }
 0x15b   :  { %2880 = vmatpush1.bf16.msra.mxu1 %v8448_v33  ;;  %2947 = vmatprep.subr.bf16.mxu0 %v8459_v37 }
 0x15c   :  { %2881 = vmatprep.subr.bf16.mxu1 %v8456_v35  ;;  %v8537_v35 = vld [vmem:[#allocation7 + $0x35c] ss:$28 sps:$4 sm:$0xff]  }
 0x15e   :  { %2948 = vmatpush1.bf16.msra.mxu0 %v8457_v40  ;;  %v8535_v40 = vld [vmem:[#allocation7 + $0x358] ss:$28 sps:$4 sm:$0xff]  }
 0x15f   :  { %2882 = vmatpush1.bf16.msra.mxu1 %v8454_v39  ;;  %2949 = vmatprep.subr.bf16.mxu0 %v8465_v42  ;;  %v8532_v39 = vld [vmem:[#allocation7 + $0xc10] ss:$28 sps:$4 sm:$0xff]   ;;  %v8541_v42 = vld [vmem:[#allocation7 + $0x1d8] ss:$28 sps:$4 sm:$0xff]  }
 0x160   :  { %2883 = vmatprep.subr.bf16.mxu1 %v8462_v41  ;;  %v8540_v41 = vld [vmem:[#allocation7 + $0x394] ss:$28 sps:$4 sm:$0xff]  }
 0x162   :  { %2950 = vmatpush1.bf16.msra.mxu0 %v8463_v44  ;;  %v8542_v44 = vld [vmem:[#allocation7 + $0x18] ss:$28 sps:$4 sm:$0xff]  }
 0x163   :  { %2884 = vmatpush1.bf16.msra.mxu1 %v8460_v43  ;;  %2951 = vmatprep.subr.bf16.mxu0 %v8471_v46  ;;  %v8538_v43 = vld [vmem:[#allocation7 + $0x390] ss:$28 sps:$4 sm:$0xff]  }
 0x164   :  { %2885 = vmatprep.subr.bf16.mxu1 %v8468_v45  ;;  %v8545_v45 = vld [vmem:[#allocation7 + $0x3cc] ss:$28 sps:$4 sm:$0xff]  }
 0x165   :  { %v8546_v46 = vld [vmem:[#allocation7 + $0x210] ss:$28 sps:$4 sm:$0xff]  }
 0x166   :  { %2952 = vmatpush1.bf16.msra.mxu0 %v8469_v48  ;;  %v8547_v48 = vld [vmem:[#allocation7 + $0x50] ss:$28 sps:$4 sm:$0xff]  }
 0x167   :  { %2886 = vmatpush1.bf16.msra.mxu1 %v8466_v47  ;;  %2953 = vmatprep.subr.bf16.mxu0 %v8477_v50  ;;  %v8543_v47 = vld [vmem:[#allocation7 + $0x3c8] ss:$28 sps:$4 sm:$0xff]  }
 0x168   :  { %2887 = vmatprep.subr.bf16.mxu1 %v8474_v49  ;;  %v8550_v49 = vld [vmem:[#allocation7 + $0x404] ss:$28 sps:$4 sm:$0xff]  }
 0x169   :  { %v8551_v50 = vld [vmem:[#allocation7 + $0x248] ss:$28 sps:$4 sm:$0xff]  }
 0x16a   :  { %2954 = vmatpush1.bf16.msra.mxu0 %v8475_v53  ;;  %v8552_v53 = vld [vmem:[#allocation7 + $0x88] ss:$28 sps:$4 sm:$0xff]  }
 0x16b   :  { %2888 = vmatpush1.bf16.msra.mxu1 %v8472_v51  ;;  %2955 = vmatprep.subr.bf16.mxu0 %v8483_v55  ;;  %v8548_v51 = vld [vmem:[#allocation7 + $0x400] ss:$28 sps:$4 sm:$0xff]  }
 0x16c   :  { %2889 = vmatprep.subr.bf16.mxu1 %v8480_v54  ;;  %v8555_v54 = vld [vmem:[#allocation7 + $0x43c] ss:$28 sps:$4 sm:$0xff]  }
 0x16d   :  { %v8556_v55 = vld [vmem:[#allocation7 + $0x280] ss:$28 sps:$4 sm:$0xff]  }
 0x16e   :  { %2956 = vmatpush1.bf16.msra.mxu0 %v8481_v57  ;;  %v8557_v57 = vld [vmem:[#allocation7 + $0xc0] ss:$28 sps:$4 sm:$0xff]  }
 0x16f   :  { %2890 = vmatpush1.bf16.msra.mxu1 %v8478_v56  ;;  %2957 = vmatprep.subr.bf16.mxu0 %v8489_v59  ;;  %v8553_v56 = vld [vmem:[#allocation7 + $0x438] ss:$28 sps:$4 sm:$0xff]  }
 0x170   :  { %2891 = vmatprep.subr.bf16.mxu1 %v8486_v58  ;;  %v8560_v58 = vld [vmem:[#allocation7 + $0x474] ss:$28 sps:$4 sm:$0xff]  }
 0x171   :  { %v8561_v59 = vld [vmem:[#allocation7 + $0x2b8] ss:$28 sps:$4 sm:$0xff]  }
 0x172   :  { %2958 = vmatpush1.bf16.msra.mxu0 %v8487_v61  ;;  %v8565_v61 = vld [vmem:[#allocation7 + $0x4ac] ss:$28 sps:$4 sm:$0xff]  }
 0x173   :  { %2892 = vmatpush1.bf16.msra.mxu1 %v8484_v60  ;;  %2959 = vmatprep.subr.bf16.mxu0 %v8495_v63  ;;  %v8562_v60 = vld [vmem:[#allocation7 + $0xf8] ss:$28 sps:$4 sm:$0xff]   ;;  %v8563_v63 = vld [vmem:[#allocation7 + $0x4a8] ss:$28 sps:$4 sm:$0xff]  }
 0x174   :  { %2902 = vmatprep.subr.bf16.mxu1 %v8492_v62  ;;  %v8566_v62 = vld [vmem:[#allocation7 + $0x2f0] ss:$28 sps:$4 sm:$0xff]  }
 0x176   :  { %2894 = vmatmul.mubr.bf16.vlgmr.msra.gmra.mrb[4].mxu1 %v9166_v29  ;;  %2960 = vmatpush1.bf16.msra.mxu0 %v8493_v2  ;;  %v8570_v2 = vld [vmem:[#allocation7 + $0x4e4] ss:$28 sps:$4 sm:$0xff]  }
 0x177   :  { %2903 = vmatpush1.bf16.msra.mxu1 %v8490_v1  ;;  %2961 = vmatprep.subr.bf16.mxu0 %v8501_v4  ;;  %v8567_v1 = vld [vmem:[#allocation7 + $0x130] ss:$28 sps:$4 sm:$0xff]   ;;  %v8568_v4 = vld [vmem:[#allocation7 + $0x4e0] ss:$28 sps:$4 sm:$0xff]  }
 0x178   :  { %2904 = vmatprep.subr.bf16.mxu1 %v8498_v3  ;;  %2934 = vmatprep.mubr.bf16.mxu1 %v8961_v0  ;;  %v8571_v3 = vld [vmem:[#allocation7 + $0x328] ss:$28 sps:$4 sm:$0xff]  }
 0x17a   :  { %2962 = vmatpush1.bf16.msra.mxu0 %v8499_v6  ;;  %v8575_v6 = vld [vmem:[#allocation7 + $0x51c] ss:$28 sps:$4 sm:$0xff]  }
 0x17b   :  { %2905 = vmatpush1.bf16.msra.mxu1 %v8496_v5  ;;  %2963 = vmatprep.subr.bf16.mxu0 %v8507_v8  ;;  %v8572_v5 = vld [vmem:[#allocation7 + $0x168] ss:$28 sps:$4 sm:$0xff]   ;;  %v8573_v8 = vld [vmem:[#allocation7 + $0x518] ss:$28 sps:$4 sm:$0xff]  }
 0x17c   :  { %2906 = vmatprep.subr.bf16.mxu1 %v8504_v7  ;;  %v8576_v7 = vld [vmem:[#allocation7 + $0x360] ss:$28 sps:$4 sm:$0xff]  }
 0x17e   :  { %2964 = vmatpush1.bf16.msra.mxu0 %v8505_v11  ;;  %v8580_v11 = vld [vmem:[#allocation7 + $0x554] ss:$28 sps:$4 sm:$0xff]  }
 0x17f   :  { %2907 = vmatpush1.bf16.msra.mxu1 %v8502_v9  ;;  %2965 = vmatprep.subr.bf16.mxu0 %v8513_v13  ;;  %v8577_v9 = vld [vmem:[#allocation7 + $0x1a0] ss:$28 sps:$4 sm:$0xff]   ;;  %v8578_v13 = vld [vmem:[#allocation7 + $0x550] ss:$28 sps:$4 sm:$0xff]  }
 0x180   :  { %2908 = vmatprep.subr.bf16.mxu1 %v8510_v12  ;;  %v8581_v12 = vld [vmem:[#allocation7 + $0x558] ss:$28 sps:$4 sm:$0xff]  }
 0x182   :  { %2966 = vmatpush1.bf16.msra.mxu0 %v8511_v15  ;;  %v8585_v15 = vld [vmem:[#allocation7 + $0x58c] ss:$28 sps:$4 sm:$0xff]  }
 0x183   :  { %2909 = vmatpush1.bf16.msra.mxu1 %v8508_v14  ;;  %2967 = vmatprep.subr.bf16.mxu0 %v8519_v17  ;;  %v8582_v14 = vld [vmem:[#allocation7 + $0x398] ss:$28 sps:$4 sm:$0xff]   ;;  %v8583_v17 = vld [vmem:[#allocation7 + $0x588] ss:$28 sps:$4 sm:$0xff]  }
 0x184   :  { %2910 = vmatprep.subr.bf16.mxu1 %v8516_v16  ;;  %v8586_v16 = vld [vmem:[#allocation7 + $0x590] ss:$28 sps:$4 sm:$0xff]  }
 0x186   :  { %2968 = vmatpush1.bf16.msra.mxu0 %v8517_v20  ;;  %v8590_v20 = vld [vmem:[#allocation7 + $0x5c4] ss:$28 sps:$4 sm:$0xff]  }
 0x187   :  { %2911 = vmatpush1.bf16.msra.mxu1 %v8514_v19  ;;  %2969 = vmatprep.subr.bf16.mxu0 %v8525_v22  ;;  %v8587_v19 = vld [vmem:[#allocation7 + $0x3d0] ss:$28 sps:$4 sm:$0xff]   ;;  %v8588_v22 = vld [vmem:[#allocation7 + $0x5c0] ss:$28 sps:$4 sm:$0xff]  }
 0x188   :  { %2912 = vmatprep.subr.bf16.mxu1 %v8522_v21  ;;  %v8591_v21 = vld [vmem:[#allocation7 + $0x5c8] ss:$28 sps:$4 sm:$0xff]  }
 0x189   :  { %v9172_v30 = vpop.f32.mrb[0].mxu1 }
 0x18a   :  { %v9174_v33 = vpop.f32.mrb[1].mxu1  ;;  %2970 = vmatpush1.bf16.msra.mxu0 %v8523_v25  ;;  %v8595_v25 = vld [vmem:[#allocation7 + $0x5fc] ss:$28 sps:$4 sm:$0xff]  }
 0x18b   :  { %2913 = vmatpush1.bf16.msra.mxu1 %v8520_v24  ;;  %v2776_v34 = vpop.f32.mrb[2].mxu1  ;;  %2971 = vmatprep.subr.bf16.mxu0 %v8531_v27  ;;  %v8592_v24 = vld [vmem:[#allocation7 + $0x408] ss:$28 sps:$4 sm:$0xff]   ;;  %v8593_v27 = vld [vmem:[#allocation7 + $0x5f8] ss:$28 sps:$4 sm:$0xff]  }
 0x18c   :  { %2914 = vmatprep.subr.bf16.mxu1 %v8528_v26  ;;  %v2777_v37 = vpop.f32.mrb[3].mxu1  ;;  %v8596_v26 = vld [vmem:[#allocation7 + $0x600] ss:$28 sps:$4 sm:$0xff]   ;;  %v8602_v34 = vld [vmem:[#allocation7 + $0x478] ss:$28 sps:$4 sm:$0xff]  }
 0x18d   :  { %v8603_v37 = vld [vmem:[#allocation7 + $0x668] ss:$28 sps:$4 sm:$0xff]  }
 0x18e   :  { %2972 = vmatpush1.bf16.msra.mxu0 %v8529_v31  ;;  %v8601_v31 = vld [vmem:[#allocation7 + $0x638] ss:$28 sps:$4 sm:$0xff]  }
 0x18f   :  { %2915 = vmatpush1.bf16.msra.mxu1 %v8526_v28  ;;  %2973 = vmatprep.subr.bf16.mxu0 %v8537_v35  ;;  %v8600_v28 = vld [vmem:[#allocation7 + $0x634] ss:$28 sps:$4 sm:$0xff]  }
 0x190   :  { %2916 = vmatprep.subr.bf16.mxu1 %v8534_v32  ;;  %v8598_v32 = vld [vmem:[#allocation7 + $0x630] ss:$28 sps:$4 sm:$0xff]  }
 0x191   :  { %v8606_v35 = vld [vmem:[#allocation7 + $0x670] ss:$28 sps:$4 sm:$0xff]  }
 0x192   :  { %2974 = vmatpush1.bf16.msra.mxu0 %v8535_v40  ;;  %v8610_v40 = vld [vmem:[#allocation7 + $0x6a4] ss:$28 sps:$4 sm:$0xff]  }
 0x193   :  { %2917 = vmatpush1.bf16.msra.mxu1 %v8532_v39  ;;  %2984 = vmatprep.subr.bf16.mxu0 %v8540_v41  ;;  %v8607_v39 = vld [vmem:[#allocation7 + $0x4b0] ss:$28 sps:$4 sm:$0xff]   ;;  %v8611_v41 = vld [vmem:[#allocation7 + $0x6a8] ss:$28 sps:$4 sm:$0xff]  }
 0x194   :  { %7922 = vmatprep.subr.bf16.mxu1 %v8541_v42  ;;  %v8608_v42 = vld [vmem:[#allocation7 + $0x6a0] ss:$28 sps:$4 sm:$0xff]  }
 0x195   :  { %2976 = vmatmul.mubr.bf16.vlgmr.msra.gmra.mrb[4].mxu0 %v9138_v10 }
 0x196   :  { %2935 = vmatmul.mubr.bf16.vlgmr.msra.gmra.mrb[4].mxu1 %v9125_v38  ;;  %2985 = vmatpush1.bf16.msra.mxu0 %v8538_v43  ;;  %v8612_v43 = vld [vmem:[#allocation7 + $0x4e8] ss:$28 sps:$4 sm:$0xff]  }
 0x197   :  { %7923 = vmatpush3.bf16.msra.mxu1 %v8542_v44  ;;  %2986 = vmatprep.subr.bf16.mxu0 %v8545_v45  ;;  %v8615_v44 = vld [vmem:[#allocation7 + $0x6dc] ss:$28 sps:$4 sm:$0xff]  }
 0x198   :  { %7924 = vmatprep.subr.bf16.mxu1 %v8546_v46  ;;  %3139 = vmatprep.mubr.bf16.mxu1 %v9131_v52  ;;  %v8558_v52 = vld [vmem:[#allocation7 + $0x470] ss:$28 sps:$4 sm:$0xff]   ;;  %v8616_v45 = vld [vmem:[#allocation7 + $0x6e0] ss:$28 sps:$4 sm:$0xff]   ;;  %v8613_v46 = vld [vmem:[#allocation7 + $0x6d8] ss:$28 sps:$4 sm:$0xff]  }
 0x199   :  { %3016 = vmatprep.mubr.bf16.mxu0 %v9144_v36 }
 0x19a   :  { %2987 = vmatpush1.bf16.msra.mxu0 %v8543_v47  ;;  %v8617_v47 = vld [vmem:[#allocation7 + $0x520] ss:$28 sps:$4 sm:$0xff]  }
 0x19b   :  { %7925 = vmatpush3.bf16.msra.mxu1 %v8547_v48  ;;  %2988 = vmatprep.subr.bf16.mxu0 %v8550_v49  ;;  %v8620_v48 = vld [vmem:[#allocation7 + $0x714] ss:$28 sps:$4 sm:$0xff]  }
 0x19c   :  { %7926 = vmatprep.subr.bf16.mxu1 %v8551_v50  ;;  %v8621_v49 = vld [vmem:[#allocation7 + $0x8d8] ss:$28 sps:$4 sm:$0xff]   ;;  %v8618_v50 = vld [vmem:[#allocation7 + $0x710] ss:$28 sps:$4 sm:$0xff]  }
 0x19e   :  { %2989 = vmatpush1.bf16.msra.mxu0 %v8548_v51  ;;  %v8622_v51 = vld [vmem:[#allocation7 + $0x718] ss:$28 sps:$4 sm:$0xff]  }
 0x19f   :  { %7927 = vmatpush3.bf16.msra.mxu1 %v8552_v53  ;;  %2990 = vmatprep.subr.bf16.mxu0 %v8555_v54  ;;  %v8625_v53 = vld [vmem:[#allocation7 + $0x74c] ss:$28 sps:$4 sm:$0xff]  }
 0x1a0   :  { %7928 = vmatprep.subr.bf16.mxu1 %v8556_v55  ;;  %v8626_v54 = vld [vmem:[#allocation7 + $0x910] ss:$28 sps:$4 sm:$0xff]   ;;  %v8623_v55 = vld [vmem:[#allocation7 + $0x748] ss:$28 sps:$4 sm:$0xff]  }
 0x1a2   :  { %2991 = vmatpush1.bf16.msra.mxu0 %v8553_v56  ;;  %v8627_v56 = vld [vmem:[#allocation7 + $0x750] ss:$28 sps:$4 sm:$0xff]  }
 0x1a3   :  { %7929 = vmatpush3.bf16.msra.mxu1 %v8557_v57  ;;  %2992 = vmatprep.subr.bf16.mxu0 %v8560_v58  ;;  %v8630_v57 = vld [vmem:[#allocation7 + $0x784] ss:$28 sps:$4 sm:$0xff]  }
 0x1a4   :  { %7930 = vmatprep.subr.bf16.mxu1 %v8561_v59  ;;  %v8631_v58 = vld [vmem:[#allocation7 + $0x948] ss:$28 sps:$4 sm:$0xff]   ;;  %v8628_v59 = vld [vmem:[#allocation7 + $0x780] ss:$28 sps:$4 sm:$0xff]  }
 0x1a6   :  { %2993 = vmatpush1.bf16.msra.mxu0 %v8558_v52  ;;  %v8632_v52 = vld [vmem:[#allocation7 + $0x788] ss:$28 sps:$4 sm:$0xff]  }
 0x1a7   :  { %7931 = vmatpush3.bf16.msra.mxu1 %v8562_v60  ;;  %2994 = vmatprep.subr.bf16.mxu0 %v8565_v61  ;;  %v8635_v60 = vld [vmem:[#allocation7 + $0x7bc] ss:$28 sps:$4 sm:$0xff]  }
 0x1a8   :  { %7932 = vmatprep.subr.bf16.mxu1 %v8566_v62  ;;  %v8633_v61 = vld [vmem:[#allocation7 + $0x7b8] ss:$28 sps:$4 sm:$0xff]   ;;  %v8637_v62 = vld [vmem:[#allocation7 + $0x7c0] ss:$28 sps:$4 sm:$0xff]  }
 0x1aa   :  { %2995 = vmatpush1.bf16.msra.mxu0 %v8563_v63  ;;  %v8640_v63 = vld [vmem:[#allocation7 + $0x7f4] ss:$28 sps:$4 sm:$0xff]  }
 0x1ab   :  { %7933 = vmatpush3.bf16.msra.mxu1 %v8567_v1  ;;  %2996 = vmatprep.subr.bf16.mxu0 %v8570_v2  ;;  %v8641_v1 = vld [vmem:[#allocation7 + $0x9b8] ss:$28 sps:$4 sm:$0xff]   ;;  %v8638_v2 = vld [vmem:[#allocation7 + $0x7f0] ss:$28 sps:$4 sm:$0xff]  }
 0x1ac   :  { %7934 = vmatprep.subr.bf16.mxu1 %v8571_v3  ;;  %v8645_v3 = vld [vmem:[#allocation7 + $0x82c] ss:$28 sps:$4 sm:$0xff]  }
 0x1ae   :  { %2997 = vmatpush1.bf16.msra.mxu0 %v8568_v4  ;;  %v8646_v4 = vld [vmem:[#allocation7 + $0x9f0] ss:$28 sps:$4 sm:$0xff]  }
 0x1af   :  { %7935 = vmatpush3.bf16.msra.mxu1 %v8572_v5  ;;  %2998 = vmatprep.subr.bf16.mxu0 %v8575_v6  ;;  %v8643_v5 = vld [vmem:[#allocation7 + $0x828] ss:$28 sps:$4 sm:$0xff]   ;;  %v8647_v6 = vld [vmem:[#allocation7 + $0x830] ss:$28 sps:$4 sm:$0xff]  }
 0x1b0   :  { %7936 = vmatprep.subr.bf16.mxu1 %v8576_v7  ;;  %v8650_v7 = vld [vmem:[#allocation7 + $0x864] ss:$28 sps:$4 sm:$0xff]  }
 0x1b2   :  { %2999 = vmatpush1.bf16.msra.mxu0 %v8573_v8  ;;  %v8651_v8 = vld [vmem:[#allocation7 + $0xa28] ss:$28 sps:$4 sm:$0xff]  }
 0x1b3   :  { %7937 = vmatpush3.bf16.msra.mxu1 %v8577_v9  ;;  %3000 = vmatprep.subr.bf16.mxu0 %v8580_v11  ;;  %v8648_v9 = vld [vmem:[#allocation7 + $0x860] ss:$28 sps:$4 sm:$0xff]   ;;  %v8652_v11 = vld [vmem:[#allocation7 + $0x868] ss:$28 sps:$4 sm:$0xff]  }
 0x1b4   :  { %7944 = vmatprep.subr.bf16.mxu1 %v8581_v12  ;;  %v8655_v12 = vld [vmem:[#allocation7 + $0x89c] ss:$28 sps:$4 sm:$0xff]  }
 0x1b6   :  { %3140 = vmatmul.mubr.bf16.vlgmr.msra.gmra.mrb[8].mxu1 %v9138_v10  ;;  %3001 = vmatpush1.bf16.msra.mxu0 %v8578_v13  ;;  %v8597_v10 = vld [vmem:[#allocation7 + $0x440] ss:$28 sps:$4 sm:$0xff]  }
 0x1b7   :  { %7945 = vmatpush3.bf16.msra.mxu1 %v8582_v14  ;;  %3002 = vmatprep.subr.bf16.mxu0 %v8585_v15  ;;  %v8656_v13 = vld [vmem:[#allocation7 + $0xa60] ss:$28 sps:$4 sm:$0xff]   ;;  %v8653_v14 = vld [vmem:[#allocation7 + $0x898] ss:$28 sps:$4 sm:$0xff]  }
 0x1b8   :  { %7946 = vmatprep.subr.bf16.mxu1 %v8586_v16  ;;  %3179 = vmatprep.mubr.bf16.mxu1 %v9144_v36  ;;  %v8605_v36 = vld [vmem:[#allocation7 + $0x66c] ss:$28 sps:$4 sm:$0xff]   ;;  %v8657_v15 = vld [vmem:[#allocation7 + $0x8a0] ss:$28 sps:$4 sm:$0xff]   ;;  %v8660_v16 = vld [vmem:[#allocation7 + $0x8d4] ss:$28 sps:$4 sm:$0xff]  }
 0x1ba   :  { %3003 = vmatpush1.bf16.msra.mxu0 %v8583_v17  ;;  %v8658_v17 = vld [vmem:[#allocation7 + $0x8d0] ss:$28 sps:$4 sm:$0xff]  }
 0x1bb   :  { %7947 = vmatpush3.bf16.msra.mxu1 %v8587_v19  ;;  %3004 = vmatprep.subr.bf16.mxu0 %v8590_v20  ;;  %v8661_v19 = vld [vmem:[#allocation7 + $0xa98] ss:$28 sps:$4 sm:$0xff]   ;;  %v8962_v20 = vmov 0.0  }
 0x1bc   :  { %7948 = vmatprep.subr.bf16.mxu1 %v8591_v21  ;;  %v8664_v21 = vld [vmem:[#allocation7 + $0x90c] ss:$28 sps:$4 sm:$0xff]  }
 0x1be   :  { %3005 = vmatpush1.bf16.msra.mxu0 %v8588_v22  ;;  %v8662_v22 = vld [vmem:[#allocation7 + $0x908] ss:$28 sps:$4 sm:$0xff]  }
 0x1bf   :  { %7949 = vmatpush3.bf16.msra.mxu1 %v8592_v24  ;;  %3006 = vmatprep.subr.bf16.mxu0 %v8595_v25  ;;  %v8665_v24 = vld [vmem:[#allocation7 + $0xad0] ss:$28 sps:$4 sm:$0xff]   ;;  %v8668_v25 = vld [vmem:[#allocation7 + $0x944] ss:$28 sps:$4 sm:$0xff]  }
 0x1c0   :  { %7950 = vmatprep.subr.bf16.mxu1 %v8596_v26  ;;  %v8666_v26 = vld [vmem:[#allocation7 + $0x940] ss:$28 sps:$4 sm:$0xff]  }
 0x1c2   :  { %3007 = vmatpush1.bf16.msra.mxu0 %v8593_v27  ;;  %v8669_v27 = vld [vmem:[#allocation7 + $0xb08] ss:$28 sps:$4 sm:$0xff]  }
 0x1c3   :  { %7951 = vmatpush3.bf16.msra.mxu1 %v8597_v10  ;;  %3008 = vmatprep.subr.bf16.mxu0 %v8600_v28  ;;  %v8672_v10 = vld [vmem:[#allocation7 + $0x97c] ss:$28 sps:$4 sm:$0xff]  }
 0x1c4   :  { %7952 = vmatprep.subr.bf16.mxu1 %v8601_v31  ;;  %v8670_v28 = vld [vmem:[#allocation7 + $0x978] ss:$28 sps:$4 sm:$0xff]   ;;  %v8673_v31 = vld [vmem:[#allocation7 + $0xb40] ss:$28 sps:$4 sm:$0xff]  }
 0x1c6   :  { %3009 = vmatpush1.bf16.msra.mxu0 %v8598_v32  ;;  %v8676_v32 = vld [vmem:[#allocation7 + $0x9b4] ss:$28 sps:$4 sm:$0xff]  }
 0x1c7   :  { %7953 = vmatpush3.bf16.msra.mxu1 %v8602_v34  ;;  %3010 = vmatprep.subr.bf16.mxu0 %v8605_v36  ;;  %v8674_v34 = vld [vmem:[#allocation7 + $0x9b0] ss:$28 sps:$4 sm:$0xff]   ;;  %v8677_v36 = vld [vmem:[#allocation7 + $0xb78] ss:$28 sps:$4 sm:$0xff]  }
 0x1c8   :  { %7954 = vmatprep.subr.bf16.mxu1 %v8606_v35  ;;  %v8680_v35 = vld [vmem:[#allocation7 + $0x9ec] ss:$28 sps:$4 sm:$0xff]  }
 0x1ca   :  { %3011 = vmatpush1.bf16.msra.mxu0 %v8603_v37  ;;  %v8678_v37 = vld [vmem:[#allocation7 + $0x9e8] ss:$28 sps:$4 sm:$0xff]  }
 0x1cb   :  { %7955 = vmatpush3.bf16.msra.mxu1 %v8607_v39  ;;  %3012 = vmatprep.subr.bf16.mxu0 %v8610_v40  ;;  %v8681_v39 = vld [vmem:[#allocation7 + $0xbb0] ss:$28 sps:$4 sm:$0xff]   ;;  %v8684_v40 = vld [vmem:[#allocation7 + $0xa24] ss:$28 sps:$4 sm:$0xff]  }
 0x1cc   :  { %7956 = vmatprep.subr.bf16.mxu1 %v8611_v41  ;;  %v8682_v41 = vld [vmem:[#allocation7 + $0xa20] ss:$28 sps:$4 sm:$0xff]  }
 0x1ce   :  { %3013 = vmatpush1.bf16.msra.mxu0 %v8608_v42  ;;  %v8685_v42 = vld [vmem:[#allocation7 + $0xbe8] ss:$28 sps:$4 sm:$0xff]  }
 0x1cf   :  { %7957 = vmatpush3.bf16.msra.mxu1 %v8612_v43  ;;  %3014 = vmatprep.subr.bf16.mxu0 %v8615_v44  ;;  %v8688_v43 = vld [vmem:[#allocation7 + $0xa5c] ss:$28 sps:$4 sm:$0xff]   ;;  %v3381_v44 = vld [vmem:[#allocation10] sm:$0xff] }
 0x1d0   :  { %7958 = vmatprep.subr.bf16.mxu1 %v8616_v45  ;;  %v3385_v45 = vld [vmem:[#allocation10 + $0x20] sm:$0xff] }
 0x1d2   :  { %3015 = vmatpush1.bf16.msra.mxu0 %v8613_v46  ;;  %v8686_v46 = vld [vmem:[#allocation7 + $0xa58] ss:$28 sps:$4 sm:$0xff]  }
 0x1d3   :  { %7959 = vmatpush3.bf16.msra.mxu1 %v8617_v47  ;;  %3025 = vmatprep.subr.bf16.mxu0 %v8620_v48  ;;  %v8689_v47 = vld [vmem:[#allocation7 + $0xc20] ss:$28 sps:$4 sm:$0xff]   ;;  %v8692_v48 = vld [vmem:[#allocation7 + $0xa94] ss:$28 sps:$4 sm:$0xff]  }
 0x1d4   :  { %7966 = vmatprep.subr.bf16.mxu1 %v8621_v49  ;;  %v7451_v49 = vcombine.high %v3381_v44, %v3385_v45 }
 0x1d5   :  { %3017 = vmatmul.mubr.bf16.vlgmr.msra.gmra.mrb[4].mxu0 %v9152_v18 }
 0x1d6   :  { %3180 = vmatmul.mubr.bf16.vlgmr.msra.gmra.mrb[12].mxu1 %v9152_v18  ;;  %3026 = vmatpush1.bf16.msra.mxu0 %v8618_v50  ;;  %v8636_v18 = vld [vmem:[#allocation7 + $0x980] ss:$28 sps:$4 sm:$0xff]   ;;  %v3389_v50 = vld [vmem:[#allocation10 + $0x40] sm:$0xff] }
 0x1d7   :  { %7967 = vmatpush3.bf16.msra.mxu1 %v8622_v51  ;;  %3027 = vmatprep.subr.bf16.mxu0 %v8625_v53  ;;  %v3393_v51 = vld [vmem:[#allocation10 + $0x60] sm:$0xff] }
 0x1d8   :  { %7968 = vmatprep.subr.bf16.mxu1 %v8626_v54  ;;  %3219 = vmatprep.mubr.bf16.mxu1 %v9157_v23  ;;  %v8690_v53 = vld [vmem:[#allocation7 + $0xa90] ss:$28 sps:$4 sm:$0xff]   ;;  %v7450_v54 = vcombine.low %v3381_v44, %v3385_v45 }
 0x1d9   :  { %3057 = vmatprep.mubr.bf16.mxu0 %v9157_v23  ;;  %v8642_v23 = vld [vmem:[#allocation7 + $0x7f8] ss:$28 sps:$4 sm:$0xff]   ;;  %v3449_v44 = vld [vmem:[#allocation10 + $0x220] sm:$0xff] }
 0x1da   :  { %3028 = vmatpush1.bf16.msra.mxu0 %v8623_v55  ;;  %v8695_v55 = vld [vmem:[#allocation7 + $0xacc] ss:$28 sps:$4 sm:$0xff]   ;;  %v3386_v45 = vld [vmem:[#allocation10 + $0x28] sm:$0xff] }
 0x1db   :  { %7969 = vmatpush3.bf16.msra.mxu1 %v8627_v56  ;;  %3029 = vmatprep.subr.bf16.mxu0 %v8630_v57  ;;  %v7459_v56 = vcombine.high %v3389_v50, %v3393_v51  ;;  %v3397_v57 = vld [vmem:[#allocation10 + $0x80] sm:$0xff] }
 0x1dc   :  { %7970 = vmatprep.subr.bf16.mxu1 %v8631_v58  ;;  %v3401_v58 = vld [vmem:[#allocation10 + $0xa0] sm:$0xff] }
 0x1de   :  { %3030 = vmatpush1.bf16.msra.mxu0 %v8628_v59  ;;  %v8693_v59 = vld [vmem:[#allocation7 + $0xac8] ss:$28 sps:$4 sm:$0xff]  }
 0x1df   :  { %7971 = vmatpush3.bf16.msra.mxu1 %v8632_v52  ;;  %3031 = vmatprep.subr.bf16.mxu0 %v8635_v60  ;;  %v7458_v52 = vcombine.low %v3389_v50, %v3393_v51  ;;  %v8698_v60 = vld [vmem:[#allocation7 + $0xb04] ss:$28 sps:$4 sm:$0xff]   ;;  %v3453_v51 = vld [vmem:[#allocation10 + $0x240] sm:$0xff] }
 0x1e0   :  { %7972 = vmatprep.subr.bf16.mxu1 %v8636_v18  ;;  %v7467_v18 = vcombine.high %v3397_v57, %v3401_v58 }
 0x1e2   :  { %3032 = vmatpush1.bf16.msra.mxu0 %v8633_v61  ;;  %v3405_v61 = vld [vmem:[#allocation10 + $0xc0] sm:$0xff] }
 0x1e3   :  { %7973 = vmatpush3.bf16.msra.mxu1 %v8637_v62  ;;  %3033 = vmatprep.subr.bf16.mxu0 %v8640_v63  ;;  %v3409_v62 = vld [vmem:[#allocation10 + $0xe0] sm:$0xff]  ;;  %v8696_v63 = vld [vmem:[#allocation7 + $0xb00] ss:$28 sps:$4 sm:$0xff]  }
 0x1e4   :  { %7974 = vmatprep.subr.bf16.mxu1 %v8641_v1  ;;  %v7466_v1 = vcombine.low %v3397_v57, %v3401_v58  ;;  %v3394_v57 = vld [vmem:[#allocation10 + $0x68] sm:$0xff] }
 0x1e6   :  { %3034 = vmatpush1.bf16.msra.mxu0 %v8638_v2  ;;  %v8701_v2 = vld [vmem:[#allocation7 + $0xb3c] ss:$28 sps:$4 sm:$0xff]  }
 0x1e7   :  { %7975 = vmatpush3.bf16.msra.mxu1 %v8642_v23  ;;  %3035 = vmatprep.subr.bf16.mxu0 %v8645_v3  ;;  %v3413_v23 = vld [vmem:[#allocation10 + $0x100] sm:$0xff] }
 0x1e8   :  { %7976 = vmatprep.subr.bf16.mxu1 %v8646_v4  ;;  %v3417_v3 = vld [vmem:[#allocation10 + $0x120] sm:$0xff]  ;;  %v8699_v4 = vld [vmem:[#allocation7 + $0xb38] ss:$28 sps:$4 sm:$0xff]  }
 0x1ea   :  { %3036 = vmatpush1.bf16.msra.mxu0 %v8643_v5  ;;  %v7474_v5 = vcombine.low %v3405_v61, %v3409_v62 }
 0x1eb   :  { %7977 = vmatpush3.bf16.msra.mxu1 %v8647_v6  ;;  %3037 = vmatprep.subr.bf16.mxu0 %v8650_v7  ;;  %v8704_v6 = vld [vmem:[#allocation7 + $0xb74] ss:$28 sps:$4 sm:$0xff]   ;;  %v7483_v7 = vcombine.high %v3413_v23, %v3417_v3 }
 0x1ec   :  { %7978 = vmatprep.subr.bf16.mxu1 %v8651_v8  ;;  %v3421_v8 = vld [vmem:[#allocation10 + $0x140] sm:$0xff] }
 0x1ee   :  { %3038 = vmatpush1.bf16.msra.mxu0 %v8648_v9  ;;  %v3425_v9 = vld [vmem:[#allocation10 + $0x160] sm:$0xff] }
 0x1ef   :  { %7979 = vmatpush3.bf16.msra.mxu1 %v8652_v11  ;;  %3039 = vmatprep.subr.bf16.mxu0 %v8655_v12  ;;  %v8702_v11 = vld [vmem:[#allocation7 + $0xb70] ss:$28 sps:$4 sm:$0xff]   ;;  %v7482_v12 = vcombine.low %v3413_v23, %v3417_v3 }
 0x1f0   :  { %7980 = vmatprep.subr.bf16.mxu1 %v8656_v13  ;;  %v8707_v13 = vld [vmem:[#allocation7 + $0xbac] ss:$28 sps:$4 sm:$0xff]  }
 0x1f2   :  { %3040 = vmatpush1.bf16.msra.mxu0 %v8653_v14  ;;  %v7491_v14 = vcombine.high %v3421_v8, %v3425_v9 }
 0x1f3   :  { %7981 = vmatpush3.bf16.msra.mxu1 %v8657_v15  ;;  %3041 = vmatprep.subr.bf16.mxu0 %v8660_v16  ;;  %v3325_v15 = vlaneseq  ;;  %v3429_v16 = vld [vmem:[#allocation10 + $0x180] sm:$0xff] }
 0x1f4   :  { %8024 = vmatprep.subr.bf16.mxu1 %v8962_v20 }
 0x1f6   :  { %3220 = vmatmul.mubr.bf16.vlgmr.msra.gmra.mrb[16].mxu1 %v9166_v29  ;;  %3042 = vmatpush1.bf16.msra.mxu0 %v8658_v17  ;;  %v3433_v17 = vld [vmem:[#allocation10 + $0x1a0] sm:$0xff] }
 0x1f7   :  { %8025 = vmatpush3.bf16.msra.mxu1 %v8661_v19  ;;  %3043 = vmatprep.subr.bf16.mxu0 %v8664_v21  ;;  %v8705_v19 = vld [vmem:[#allocation7 + $0xba8] ss:$28 sps:$4 sm:$0xff]   ;;  %v7490_v21 = vcombine.low %v3421_v8, %v3425_v9  ;;  %v3406_v9 = vld [vmem:[#allocation10 + $0xc8] sm:$0xff] }
 0x1f8   :  { %8026 = vmatprep.subr.bf16.mxu1 %v8962_v20  ;;  %8040 = vmatprep.mubr.msk.bf16.mxu1 %vm8963_vm0, %v8962_v20  ;;  %v3473_v8 = vld [vmem:[#allocation10 + $0x2e0] sm:$0xff] }
 0x1fa   :  { %3044 = vmatpush1.bf16.msra.mxu0 %v8662_v22  ;;  %v8710_v22 = vld [vmem:[#allocation7 + $0xbe4] ss:$28 sps:$4 sm:$0xff]  }
 0x1fb   :  { %8027 = vmatpush3.bf16.msra.mxu1 %v8665_v24  ;;  %3045 = vmatprep.subr.bf16.mxu0 %v8668_v25  ;;  %v7499_v24 = vcombine.high %v3429_v16, %v3433_v17 }
 0x1fc   :  { %8028 = vmatprep.subr.bf16.mxu1 %v8962_v20 }
 0x1fe   :  { %3046 = vmatpush1.bf16.msra.mxu0 %v8666_v26  ;;  %v9200_v26 = vshrl.u32 %v3325_v15, 7 }
 0x1ff   :  { %8029 = vmatpush3.bf16.msra.mxu1 %v8669_v27  ;;  %3047 = vmatprep.subr.bf16.mxu0 %v8672_v10  ;;  %v3437_v27 = vld [vmem:[#allocation10 + $0x1c0] sm:$0xff] }
 0x200   :  { %8030 = vmatprep.subr.bf16.mxu1 %v8962_v20  ;;  %v3441_v10 = vld [vmem:[#allocation10 + $0x1e0] sm:$0xff] }
 0x202   :  { %3048 = vmatpush1.bf16.msra.mxu0 %v8670_v28 }
 0x203   :  { %8031 = vmatpush3.bf16.msra.mxu1 %v8673_v31  ;;  %3049 = vmatprep.subr.bf16.mxu0 %v8676_v32 }
 0x204   :  { %8032 = vmatprep.subr.bf16.mxu1 %v8962_v20 }
 0x206   :  { %3050 = vmatpush1.bf16.msra.mxu0 %v8674_v34 }
 0x207   :  { %8033 = vmatpush3.bf16.msra.mxu1 %v8677_v36  ;;  %3051 = vmatprep.subr.bf16.mxu0 %v8680_v35  ;;  %v8708_v36 = vld [vmem:[#allocation7 + $0xbe0] ss:$28 sps:$4 sm:$0xff]   ;;  %v7498_v35 = vcombine.low %v3429_v16, %v3433_v17  ;;  %v3477_v16 = vld [vmem:[#allocation10 + $0x300] sm:$0xff] }
 0x208   :  { %8034 = vmatprep.subr.bf16.mxu1 %v8962_v20  ;;  %v3481_v17 = vld [vmem:[#allocation10 + $0x320] sm:$0xff] }
 0x20a   :  { %3052 = vmatpush1.bf16.msra.mxu0 %v8678_v37 }
 0x20b   :  { %8035 = vmatpush3.bf16.msra.mxu1 %v8681_v39  ;;  %3053 = vmatprep.subr.bf16.mxu0 %v8684_v40  ;;  %v8713_v39 = vld [vmem:[#allocation7 + $0xc1c] ss:$28 sps:$4 sm:$0xff]   ;;  %v7507_v40 = vcombine.high %v3437_v27, %v3441_v10 }
 0x20c   :  { %8036 = vmatprep.subr.bf16.mxu1 %v8962_v20 }
 0x20e   :  { %3054 = vmatpush1.bf16.msra.mxu0 %v8682_v41  ;;  %v3445_v41 = vld [vmem:[#allocation10 + $0x200] sm:$0xff] }
 0x20f   :  { %8037 = vmatpush3.bf16.msra.mxu1 %v8685_v42  ;;  %3055 = vmatprep.subr.bf16.mxu0 %v8688_v43  ;;  %v3331_v43 = vsub.s32 1, %v9200_v26 }
 0x210   :  { %8038 = vmatprep.subr.bf16.mxu1 %v8962_v20 }
 0x212   :  { %3056 = vmatpush1.bf16.msra.mxu0 %v8686_v46  ;;  %v9207_v46 = vld [vmem:[#allocation8] sm:$0xff] }
 0x213   :  { %8039 = vmatpush3.bf16.msra.mxu1 %v8689_v47  ;;  %3066 = vmatprep.subr.bf16.mxu0 %v8692_v48  ;;  %v8711_v47 = vld [vmem:[#allocation7 + $0xc18] ss:$28 sps:$4 sm:$0xff]   ;;  %v7506_v48 = vcombine.low %v3437_v27, %v3441_v10  ;;  %v7547_v27 = vcombine.high %v3477_v16, %v3481_v17 }
 0x214   :  { %6069 = vmatprep.subr.bf16.mxu1 %v7451_v49  ;;  %v7515_v49 = vcombine.high %v3445_v41, %v3449_v44 }
 0x215   :  { %3058 = vmatmul.mubr.bf16.vlgmr.msra.gmra.mrb[4].mxu0 %v9166_v29  ;;  %v7475_v29 = vcombine.high %v3405_v61, %v3409_v62  ;;  %v3461_v62 = vld [vmem:[#allocation10 + $0x280] sm:$0xff] }
 0x216   :  { %8041 = vmatmul.mubr.bf16.vlgmr.msra.gmra.mrb[20].mxu1 %v9125_v38  ;;  %3067 = vmatpush1.bf16.msra.mxu0 %v8690_v53 }
 0x217   :  { %6070 = vmatpush1.bf16.msra.mxu1 %v7450_v54  ;;  %3068 = vmatprep.subr.bf16.mxu0 %v8695_v55  ;;  %v3332_v54 = vrot.slane %v9207_v46, %v3331_v43  ;;  %v3457_v55 = vld [vmem:[#allocation10 + $0x260] sm:$0xff] }
 0x218   :  { %6071 = vmatprep.subr.bf16.mxu1 %v7459_v56  ;;  %3098 = vmatprep.mubr.bf16.mxu0 %v8961_v0  ;;  %v3390_v56 = vld [vmem:[#allocation10 + $0x48] sm:$0xff]  ;;  %v7522_v23 = vcombine.low %v3453_v51, %v3457_v55 }
 0x219   :  { %v7460_v3 = vcombine.low %v3390_v56, %v3394_v57 }
 0x21a   :  { %3069 = vmatpush1.bf16.msra.mxu0 %v8693_v59  ;;  %v7514_v59 = vcombine.low %v3445_v41, %v3449_v44  ;;  %v3497_v44 = vld [vmem:[#allocation10 + $0x3a0] sm:$0xff] }
 0x21b   :  { %6072 = vmatpush1.bf16.msra.mxu1 %v7458_v52  ;;  %3070 = vmatprep.subr.bf16.mxu0 %v8698_v60  ;;  %v7523_v60 = vcombine.high %v3453_v51, %v3457_v55  ;;  %v3438_v55 = vld [vmem:[#allocation10 + $0x1c8] sm:$0xff] }
 0x21c   :  { %6073 = vmatprep.subr.bf16.mxu1 %v7467_v18  ;;  %v7461_v18 = vcombine.high %v3390_v56, %v3394_v57  ;;  %v3442_v56 = vld [vmem:[#allocation10 + $0x1e8] sm:$0xff] }
 0x21e   :  { %3071 = vmatpush1.bf16.msra.mxu0 %v8696_v63  ;;  %v3465_v63 = vld [vmem:[#allocation10 + $0x2a0] sm:$0xff] }
 0x21f   :  { %6074 = vmatpush1.bf16.msra.mxu1 %v7466_v1  ;;  %3072 = vmatprep.subr.bf16.mxu0 %v8701_v2  ;;  %v3398_v1 = vld [vmem:[#allocation10 + $0x88] sm:$0xff] }
 0x220   :  { %6075 = vmatprep.subr.bf16.mxu1 %v7475_v29  ;;  %v3402_v2 = vld [vmem:[#allocation10 + $0xa8] sm:$0xff] }
 0x222   :  { %3073 = vmatpush1.bf16.msra.mxu0 %v8699_v4 }
 0x223   :  { %6076 = vmatpush1.bf16.msra.mxu1 %v7474_v5  ;;  %3074 = vmatprep.subr.bf16.mxu0 %v8704_v6  ;;  %v7531_v5 = vcombine.high %v3461_v62, %v3465_v63  ;;  %v7469_v6 = vcombine.high %v3398_v1, %v3402_v2 }
 0x224   :  { %6077 = vmatprep.subr.bf16.mxu1 %v7483_v7  ;;  %v3469_v7 = vld [vmem:[#allocation10 + $0x2c0] sm:$0xff] }
 0x226   :  { %3075 = vmatpush1.bf16.msra.mxu0 %v8702_v11  ;;  %v3410_v11 = vld [vmem:[#allocation10 + $0xe8] sm:$0xff] }
 0x227   :  { %6078 = vmatpush1.bf16.msra.mxu1 %v7482_v12  ;;  %3076 = vmatprep.subr.bf16.mxu0 %v8707_v13  ;;  %v7468_v13 = vcombine.low %v3398_v1, %v3402_v2  ;;  %v7477_v15 = vcombine.high %v3406_v9, %v3410_v11 }
 0x228   :  { %6079 = vmatprep.subr.bf16.mxu1 %v7491_v14  ;;  %v2731_v25 = vpop.f32.mrb[0].mxu0  ;;  %v7539_v14 = vcombine.high %v3469_v7, %v3473_v8 }
 0x229   :  { %v9203_v28 = vadd.f32 %v9172_v30, %v2731_v25  ;;  %v2733_v31 = vpop.f32.mrb[1].mxu0  ;;  %v3382_v30 = vld [vmem:[#allocation10 + $0x8] sm:$0xff]  ;;  %v7476_v25 = vcombine.low %v3406_v9, %v3410_v11 }
 0x22a   :  { %v8057_v32 = vadd.f32 %v9174_v33, %v2733_v31  ;;  %v2735_v34 = vpop.f32.mrb[2].mxu0  ;;  %3077 = vmatpush1.bf16.msra.mxu0 %v8705_v19  ;;  %v7453_v50 = vcombine.high %v3382_v30, %v3386_v45  ;;  %v7452_v52 = vcombine.low %v3382_v30, %v3386_v45  ;;  %v3414_v19 = vld [vmem:[#allocation10 + $0x108] sm:$0xff]  ;;  %v3485_v31 = vld [vmem:[#allocation10 + $0x340] sm:$0xff] }
 0x22b   :  { %6080 = vmatpush1.bf16.msra.mxu1 %v7490_v21  ;;  %v2736_v37 = vpop.f32.mrb[3].mxu0  ;;  %3078 = vmatprep.subr.bf16.mxu0 %v8710_v22  ;;  %v3274_v12 = vrot.slane %v9203_v28, 2  ;;  %v3418_v21 = vld [vmem:[#allocation10 + $0x128] sm:$0xff]  ;;  %v7538_v22 = vcombine.low %v3469_v7, %v3473_v8 }
 0x22c   :  { %6081 = vmatprep.subr.bf16.mxu1 %v7499_v24  ;;  %v3275_v42 = vrot.slane %v8057_v32, 2  ;;  %v7485_v10 = vcombine.high %v3414_v19, %v3418_v21  ;;  %v3422_v34 = vld [vmem:[#allocation10 + $0x148] sm:$0xff]  ;;  %v7546_v37 = vcombine.low %v3477_v16, %v3481_v17 }
 0x22d   :  { %v3288_v24 = vmax.f32 %v9203_v28, %v3274_v12  ;;  %v3430_v30 = vld [vmem:[#allocation10 + $0x188] sm:$0xff] }
 0x22e   :  { %v3289_v33 = vmax.f32 %v8057_v32, %v3275_v42  ;;  %3079 = vmatpush1.bf16.msra.mxu0 %v8708_v36  ;;  %v3489_v32 = vld [vmem:[#allocation10 + $0x360] sm:$0xff]  ;;  %v3426_v36 = vld [vmem:[#allocation10 + $0x168] sm:$0xff] }
 0x22f   :  { %6082 = vmatpush1.bf16.msra.mxu1 %v7498_v35  ;;  %3080 = vmatprep.subr.bf16.mxu0 %v8713_v39  ;;  %v3327_v35 = vsub.s32 0, %v9200_v26  ;;  %v3302_v39 = vrot.slane %v3288_v24, 4  ;;  %v7555_v41 = vcombine.high %v3485_v31, %v3489_v32  ;;  %v7493_v28 = vcombine.high %v3422_v34, %v3426_v36  ;;  %v3493_v42 = vld [vmem:[#allocation10 + $0x380] sm:$0xff]  ;;  %v3434_v45 = vld [vmem:[#allocation10 + $0x1a8] sm:$0xff] }
 0x230   :  { %6083 = vmatprep.subr.bf16.mxu1 %v7507_v40  ;;  %v3303_v53 = vrot.slane %v3289_v33, 4  ;;  %v7484_v40 = vcombine.low %v3414_v19, %v3418_v21  ;;  %v7501_v51 = vcombine.high %v3430_v30, %v3434_v45  ;;  %v7562_v57 = vcombine.low %v3493_v42, %v3497_v44  ;;  %v3454_v7 = vld [vmem:[#allocation10 + $0x248] sm:$0xff] }
 0x231   :  { %v3458_v8 = vld [vmem:[#allocation10 + $0x268] sm:$0xff] }
 0x232   :  { %v3317_v58 = vmax.f32 %v3289_v33, %v3303_v53  ;;  %3081 = vmatpush1.bf16.msra.mxu0 %v8711_v47  ;;  %v3328_v33 = vrot.slane %v9207_v46, %v3327_v35  ;;  %v7554_v47 = vcombine.low %v3485_v31, %v3489_v32  ;;  %v3501_v53 = vld [vmem:[#allocation10 + $0x3c0] sm:$0xff]  ;;  %v3462_v16 = vld [vmem:[#allocation10 + $0x288] sm:$0xff]  ;;  %v7524_v21 = vcombine.low %v3454_v7, %v3458_v8 }
 0x233   :  { %6084 = vmatpush1.bf16.msra.mxu1 %v7506_v48  ;;  %6233 = vmatprep.subr.bf16.mxu0 %v7453_v50  ;;  %v3316_v48 = vmax.f32 %v3288_v24, %v3302_v39  ;;  %v7563_v50 = vcombine.high %v3493_v42, %v3497_v44  ;;  %v3466_v17 = vld [vmem:[#allocation10 + $0x2a8] sm:$0xff]  ;;  %v3541_v39 = vld [vmem:[#allocation10 + $0x500] sm:$0xff] }
 0x234   :  { %6085 = vmatprep.subr.bf16.mxu1 %v7515_v49  ;;  %v3361_v61 = vadd.f32 %v3332_v54, %v3317_v58  ;;  %v7492_v49 = vcombine.low %v3422_v34, %v3426_v36  ;;  %v3505_v54 = vld [vmem:[#allocation10 + $0x3e0] sm:$0xff]  ;;  %v7533_v24 = vcombine.high %v3462_v16, %v3466_v17  ;;  %v3474_v31 = vld [vmem:[#allocation10 + $0x2e8] sm:$0xff]  ;;  %v7532_v34 = vcombine.low %v3462_v16, %v3466_v17 }
 0x235   :  { %3099 = vmatmul.mubr.bf16.vlgmr.msra.gmra.mrb[4].mxu0 %v9125_v38  ;;  %v7530_v38 = vcombine.low %v3461_v62, %v3465_v63  ;;  %v3360_v58 = vadd.f32 %v3328_v33, %v3316_v48  ;;  %v3446_v62 = vld [vmem:[#allocation10 + $0x208] sm:$0xff]  ;;  %v7570_v1 = vcombine.low %v3501_v53, %v3505_v54  ;;  %v3549_v33 = vld [vmem:[#allocation10 + $0x540] sm:$0xff] }
 0x236   :  { %v3368_v29 = vmax.f32 %v3361_v61, 0.0  ;;  %6234 = vmatpush1.bf16.msra.mxu0 %v7452_v52  ;;  %v7571_v52 = vcombine.high %v3501_v53, %v3505_v54  ;;  %v3513_v61 = vld [vmem:[#allocation10 + $0x420] sm:$0xff]  ;;  %v3450_v63 = vld [vmem:[#allocation10 + $0x228] sm:$0xff] }
 0x237   :  { %6086 = vmatpush1.bf16.msra.mxu1 %v7514_v59  ;;  %6235 = vmatprep.subr.bf16.mxu0 %v7461_v18  ;;  %v7500_v59 = vcombine.low %v3430_v30, %v3434_v45  ;;  %v3509_v18 = vld [vmem:[#allocation10 + $0x400] sm:$0xff]  ;;  %v3367_v2 = vmax.f32 %v3360_v58, 0.0  ;;  %v3486_v48 = vld [vmem:[#allocation10 + $0x348] sm:$0xff] }
 0x238   :  { %6087 = vmatprep.subr.bf16.mxu1 %v7523_v60  ;;  %v9213_v4 = vpack.c.bf16 %v3368_v29, %v3368_v29  ;;  %v7509_v60 = vcombine.high %v3438_v55, %v3442_v56  ;;  %v7508_v29 = vcombine.low %v3438_v55, %v3442_v56  ;;  %v7578_v9 = vcombine.low %v3509_v18, %v3513_v61  ;;  %v3557_v55 = vld [vmem:[#allocation10 + $0x580] sm:$0xff]  ;;  %v3498_v58 = vld [vmem:[#allocation10 + $0x3a8] sm:$0xff] }
 0x239   :  { %v9223_v11 = vpack.c.bf16 %v3367_v2, %v3367_v2  ;;  %v3561_v56 = vld [vmem:[#allocation10 + $0x5a0] sm:$0xff]  ;;  %v3502_v2 = vld [vmem:[#allocation10 + $0x3c8] sm:$0xff] }
 0x23a   :  { %6101 = vmatprep.mubr.bf16.mxu1 %v9213_v4  ;;  %6236 = vmatpush1.bf16.msra.mxu0 %v7460_v3  ;;  %v7517_v3 = vcombine.high %v3446_v62, %v3450_v63  ;;  %v3514_v16 = vld [vmem:[#allocation10 + $0x428] sm:$0xff] }
 0x23b   :  { %6088 = vmatpush1.bf16.msra.mxu1 %v7522_v23  ;;  %6265 = vmatprep.mubr.bf16.mxu0 %v9213_v4  ;;  %v7579_v23 = vcombine.high %v3509_v18, %v3513_v61 }
 0x23c   :  { %6089 = vmatprep.subr.bf16.mxu1 %v7531_v5  ;;  %6237 = vmatprep.subr.bf16.mxu0 %v7469_v6  ;;  %v3517_v5 = vld [vmem:[#allocation10 + $0x440] sm:$0xff] }
 0x23d   :  { %v3521_v6 = vld [vmem:[#allocation10 + $0x460] sm:$0xff] }
 0x23e   :  { %6238 = vmatpush1.bf16.msra.mxu0 %v7468_v13  ;;  %v7587_v12 = vcombine.high %v3517_v5, %v3521_v6  ;;  %v7525_v13 = vcombine.high %v3454_v7, %v3458_v8  ;;  %v7586_v19 = vcombine.low %v3517_v5, %v3521_v6  ;;  %v7626_v6 = vcombine.low %v3557_v55, %v3561_v56 }
 0x23f   :  { %6090 = vmatpush1.bf16.msra.mxu1 %v7530_v38  ;;  %6239 = vmatprep.subr.bf16.mxu0 %v7477_v15  ;;  %v7516_v38 = vcombine.low %v3446_v62, %v3450_v63  ;;  %v3529_v15 = vld [vmem:[#allocation10 + $0x4a0] sm:$0xff] }
 0x240   :  { %6091 = vmatprep.subr.bf16.mxu1 %v7539_v14  ;;  %v3525_v14 = vld [vmem:[#allocation10 + $0x480] sm:$0xff] }
 0x241   :  { %v7594_v32 = vcombine.low %v3525_v14, %v3529_v15  ;;  %v3565_v62 = vld [vmem:[#allocation10 + $0x5c0] sm:$0xff] }
 0x242   :  { %6240 = vmatpush1.bf16.msra.mxu0 %v7476_v25  ;;  %v3533_v25 = vld [vmem:[#allocation10 + $0x4c0] sm:$0xff] }
 0x243   :  { %6092 = vmatpush1.bf16.msra.mxu1 %v7538_v22  ;;  %6241 = vmatprep.subr.bf16.mxu0 %v7485_v10  ;;  %v7595_v22 = vcombine.high %v3525_v14, %v3529_v15  ;;  %v3470_v10 = vld [vmem:[#allocation10 + $0x2c8] sm:$0xff]  ;;  %v3569_v63 = vld [vmem:[#allocation10 + $0x5e0] sm:$0xff] }
 0x244   :  { %6093 = vmatprep.subr.bf16.mxu1 %v7547_v27  ;;  %v3537_v27 = vld [vmem:[#allocation10 + $0x4e0] sm:$0xff]  ;;  %v7540_v44 = vcombine.low %v3470_v10, %v3474_v31  ;;  %v3510_v15 = vld [vmem:[#allocation10 + $0x408] sm:$0xff] }
 0x245   :  { %v7603_v36 = vcombine.high %v3533_v25, %v3537_v27  ;;  %v7602_v42 = vcombine.low %v3533_v25, %v3537_v27  ;;  %v3577_v14 = vld [vmem:[#allocation10 + $0x620] sm:$0xff]  ;;  %v7581_v27 = vcombine.high %v3510_v15, %v3514_v16 }
 0x246   :  { %6242 = vmatpush1.bf16.msra.mxu0 %v7484_v40  ;;  %v3545_v40 = vld [vmem:[#allocation10 + $0x520] sm:$0xff] }
 0x247   :  { %6094 = vmatpush1.bf16.msra.mxu1 %v7546_v37  ;;  %6243 = vmatprep.subr.bf16.mxu0 %v7493_v28  ;;  %v7541_v37 = vcombine.high %v3470_v10, %v3474_v31  ;;  %v3482_v28 = vld [vmem:[#allocation10 + $0x328] sm:$0xff]  ;;  %v7611_v30 = vcombine.high %v3541_v39, %v3545_v40  ;;  %v3581_v10 = vld [vmem:[#allocation10 + $0x640] sm:$0xff] }
 0x248   :  { %6095 = vmatprep.subr.bf16.mxu1 %v7555_v41  ;;  %v3478_v41 = vld [vmem:[#allocation10 + $0x308] sm:$0xff]  ;;  %v3585_v31 = vld [vmem:[#allocation10 + $0x660] sm:$0xff] }
 0x249   :  { %v7549_v45 = vcombine.high %v3478_v41, %v3482_v28 }
 0x24a   :  { %6244 = vmatpush1.bf16.msra.mxu0 %v7492_v49  ;;  %v3490_v49 = vld [vmem:[#allocation10 + $0x368] sm:$0xff] }
 0x24b   :  { %6096 = vmatpush1.bf16.msra.mxu1 %v7554_v47  ;;  %6245 = vmatprep.subr.bf16.mxu0 %v7501_v51  ;;  %v3553_v47 = vld [vmem:[#allocation10 + $0x560] sm:$0xff]  ;;  %v7548_v51 = vcombine.low %v3478_v41, %v3482_v28  ;;  %v7557_v54 = vcombine.high %v3486_v48, %v3490_v49 }
 0x24c   :  { %6097 = vmatprep.subr.bf16.mxu1 %v7563_v50  ;;  %v7610_v50 = vcombine.low %v3541_v39, %v3545_v40  ;;  %v7619_v53 = vcombine.high %v3549_v33, %v3553_v47  ;;  %v7580_v39 = vcombine.low %v3510_v15, %v3514_v16  ;;  %v7651_v40 = vcombine.high %v3581_v10, %v3585_v31  ;;  %v3589_v28 = vld [vmem:[#allocation10 + $0x680] sm:$0xff] }
 0x24d   :  { %v3621_v15 = vld [vmem:[#allocation10 + $0x780] sm:$0xff] }
 0x24e   :  { %6246 = vmatpush1.bf16.msra.mxu0 %v7500_v59  ;;  %v7618_v59 = vcombine.low %v3549_v33, %v3553_v47  ;;  %v7650_v47 = vcombine.low %v3581_v10, %v3585_v31  ;;  %v3625_v16 = vld [vmem:[#allocation10 + $0x7a0] sm:$0xff] }
 0x24f   :  { %6098 = vmatpush1.bf16.msra.mxu1 %v7562_v57  ;;  %6247 = vmatprep.subr.bf16.mxu0 %v7509_v60  ;;  %v3494_v57 = vld [vmem:[#allocation10 + $0x388] sm:$0xff]  ;;  %v7627_v60 = vcombine.high %v3557_v55, %v3561_v56  ;;  %v3629_v31 = vld [vmem:[#allocation10 + $0x7c0] sm:$0xff] }
 0x250   :  { %6099 = vmatprep.subr.bf16.mxu1 %v7571_v52  ;;  %v7556_v52 = vcombine.low %v3486_v48, %v3490_v49  ;;  %v7565_v61 = vcombine.high %v3494_v57, %v3498_v58  ;;  %v7564_v8 = vcombine.low %v3494_v57, %v3498_v58  ;;  %v3538_v55 = vld [vmem:[#allocation10 + $0x4e8] sm:$0xff] }
 0x252   :  { %6248 = vmatpush1.bf16.msra.mxu0 %v7508_v29  ;;  %v3506_v29 = vld [vmem:[#allocation10 + $0x3e8] sm:$0xff] }
 0x253   :  { %6100 = vmatpush1.bf16.msra.mxu1 %v7570_v1  ;;  %6249 = vmatprep.subr.bf16.mxu0 %v7517_v3  ;;  %v3339_v3 = vsub.s32 3, %v9200_v26 }
 0x254   :  { %6110 = vmatprep.subr.bf16.mxu1 %v7579_v23 }
 0x256   :  { %6102 = vmatmul.mubr.bf16.vlgmr.msra.gmra.mrb[24].mxu1 %v9223_v11  ;;  %6250 = vmatpush1.bf16.msra.mxu0 %v7516_v38 }
 0x257   :  { %6111 = vmatpush1.bf16.msra.mxu1 %v7578_v9  ;;  %6251 = vmatprep.subr.bf16.mxu0 %v7525_v13  ;;  %v7635_v9 = vcombine.high %v3565_v62, %v3569_v63  ;;  %v3573_v13 = vld [vmem:[#allocation10 + $0x600] sm:$0xff] }
 0x258   :  { %6112 = vmatprep.subr.bf16.mxu1 %v7587_v12  ;;  %v7573_v12 = vcombine.high %v3502_v2, %v3506_v29 }
 0x25a   :  { %6252 = vmatpush1.bf16.msra.mxu0 %v7524_v21  ;;  %v7634_v21 = vcombine.low %v3565_v62, %v3569_v63  ;;  %v3542_v62 = vld [vmem:[#allocation10 + $0x508] sm:$0xff] }
 0x25b   :  { %6113 = vmatpush1.bf16.msra.mxu1 %v7586_v19  ;;  %6253 = vmatprep.subr.bf16.mxu0 %v7533_v24  ;;  %v3340_v19 = vrot.slane %v9207_v46, %v3339_v3  ;;  %v7643_v24 = vcombine.high %v3573_v13, %v3577_v14  ;;  %v3546_v63 = vld [vmem:[#allocation10 + $0x528] sm:$0xff] }
 0x25c   :  { %6114 = vmatprep.subr.bf16.mxu1 %v7595_v22  ;;  %v7572_v22 = vcombine.low %v3502_v2, %v3506_v29  ;;  %v7613_v3 = vcombine.high %v3542_v62, %v3546_v63 }
 0x25e   :  { %6254 = vmatpush1.bf16.msra.mxu0 %v7532_v34  ;;  %v7642_v34 = vcombine.low %v3573_v13, %v3577_v14  ;;  %v7612_v13 = vcombine.low %v3542_v62, %v3546_v63 }
 0x25f   :  { %6115 = vmatpush1.bf16.msra.mxu1 %v7594_v32  ;;  %6255 = vmatprep.subr.bf16.mxu0 %v7541_v37  ;;  %v3522_v37 = vld [vmem:[#allocation10 + $0x468] sm:$0xff] }
 0x260   :  { %6116 = vmatprep.subr.bf16.mxu1 %v7603_v36  ;;  %v3518_v36 = vld [vmem:[#allocation10 + $0x448] sm:$0xff] }
 0x261   :  { %v7588_v48 = vcombine.low %v3518_v36, %v3522_v37 }
 0x262   :  { %6256 = vmatpush1.bf16.msra.mxu0 %v7540_v44  ;;  %v7589_v44 = vcombine.high %v3518_v36, %v3522_v37  ;;  %v3566_v36 = vld [vmem:[#allocation10 + $0x5c8] sm:$0xff] }
 0x263   :  { %6117 = vmatpush1.bf16.msra.mxu1 %v7602_v42  ;;  %6257 = vmatprep.subr.bf16.mxu0 %v7549_v45  ;;  %v3593_v42 = vld [vmem:[#allocation10 + $0x6a0] sm:$0xff]  ;;  %v3530_v45 = vld [vmem:[#allocation10 + $0x4a8] sm:$0xff] }
 0x264   :  { %6118 = vmatprep.subr.bf16.mxu1 %v7611_v30  ;;  %v3526_v30 = vld [vmem:[#allocation10 + $0x488] sm:$0xff]  ;;  %v7659_v49 = vcombine.high %v3589_v28, %v3593_v42  ;;  %v7658_v56 = vcombine.low %v3589_v28, %v3593_v42 }
 0x265   :  { %v7596_v58 = vcombine.low %v3526_v30, %v3530_v45  ;;  %v3570_v37 = vld [vmem:[#allocation10 + $0x5e8] sm:$0xff] }
 0x266   :  { %6258 = vmatpush1.bf16.msra.mxu0 %v7548_v51  ;;  %v3597_v51 = vld [vmem:[#allocation10 + $0x6c0] sm:$0xff] }
 0x267   :  { %6119 = vmatpush1.bf16.msra.mxu1 %v7610_v50  ;;  %6259 = vmatprep.subr.bf16.mxu0 %v7557_v54  ;;  %v7597_v50 = vcombine.high %v3526_v30, %v3530_v45  ;;  %v3534_v54 = vld [vmem:[#allocation10 + $0x4c8] sm:$0xff]  ;;  %v7637_v45 = vcombine.high %v3566_v36, %v3570_v37 }
 0x268   :  { %6120 = vmatprep.subr.bf16.mxu1 %v7619_v53  ;;  %v3601_v53 = vld [vmem:[#allocation10 + $0x6e0] sm:$0xff]  ;;  %v7604_v29 = vcombine.low %v3534_v54, %v3538_v55 }
 0x269   :  { %v9226_v18 = vpop.f32.mrb[4].mxu1 }
 0x26a   :  { %v2938_v1 = vpop.f32.mrb[5].mxu1  ;;  %6260 = vmatpush1.bf16.msra.mxu0 %v7556_v52  ;;  %v3276_v57 = vrot.slane %v9226_v18, 2  ;;  %v7605_v52 = vcombine.high %v3534_v54, %v3538_v55  ;;  %v7636_v54 = vcombine.low %v3566_v36, %v3570_v37  ;;  %v3677_v36 = vld [vmem:[#allocation10 + $0x940] sm:$0xff] }
 0x26b   :  { %v3277_v23 = vrot.slane %v2938_v1, 2  ;;  %v2940_v5 = vpop.f32.mrb[6].mxu1  ;;  %6121 = vmatpush1.bf16.msra.mxu1 %v7618_v59  ;;  %6261 = vmatprep.subr.bf16.mxu0 %v7565_v61  ;;  %v7667_v59 = vcombine.high %v3597_v51, %v3601_v53  ;;  %v3609_v61 = vld [vmem:[#allocation10 + $0x720] sm:$0xff] }
 0x26c   :  { %v2941_v7 = vpop.f32.mrb[7].mxu1  ;;  %6122 = vmatprep.subr.bf16.mxu1 %v7627_v60  ;;  %v3605_v60 = vld [vmem:[#allocation10 + $0x700] sm:$0xff]  ;;  %v3290_v2 = vmax.f32 %v9226_v18, %v3276_v57 }
 0x26d   :  { %v3291_v38 = vmax.f32 %v2938_v1, %v3277_v23  ;;  %v7666_v1 = vcombine.low %v3597_v51, %v3601_v53  ;;  %v7675_v23 = vcombine.high %v3605_v60, %v3609_v61  ;;  %v3613_v5 = vld [vmem:[#allocation10 + $0x740] sm:$0xff]  ;;  %v3550_v7 = vld [vmem:[#allocation10 + $0x548] sm:$0xff] }
 0x26e   :  { %6262 = vmatpush1.bf16.msra.mxu0 %v7564_v8  ;;  %v3554_v8 = vld [vmem:[#allocation10 + $0x568] sm:$0xff]  ;;  %v3645_v57 = vld [vmem:[#allocation10 + $0x840] sm:$0xff] }
 0x26f   :  { %v3305_v17 = vrot.slane %v3291_v38, 4  ;;  %6123 = vmatpush1.bf16.msra.mxu1 %v7626_v6  ;;  %6263 = vmatprep.subr.bf16.mxu0 %v7573_v12  ;;  %v3617_v6 = vld [vmem:[#allocation10 + $0x760] sm:$0xff]  ;;  %v3304_v12 = vrot.slane %v3290_v2, 4  ;;  %v7621_v18 = vcombine.high %v3550_v7, %v3554_v8 }
 0x270   :  { %6124 = vmatprep.subr.bf16.mxu1 %v7635_v9  ;;  %v3335_v9 = vsub.s32 2, %v9200_v26  ;;  %v7683_v14 = vcombine.high %v3613_v5, %v3617_v6  ;;  %v3681_v37 = vld [vmem:[#allocation10 + $0x960] sm:$0xff] }
 0x271   :  { %v3319_v25 = vmax.f32 %v3291_v38, %v3305_v17  ;;  %v7674_v38 = vcombine.low %v3605_v60, %v3609_v61  ;;  %v3558_v17 = vld [vmem:[#allocation10 + $0x588] sm:$0xff] }
 0x272   :  { %6264 = vmatpush1.bf16.msra.mxu0 %v7572_v22  ;;  %v7682_v22 = vcombine.low %v3613_v5, %v3617_v6  ;;  %v9244_v6 = vld [vmem:[#allocation10 + $0xc00] sm:$0xff] }
 0x273   :  { %v3363_v32 = vadd.f32 %v3340_v19, %v3319_v25  ;;  %6125 = vmatpush1.bf16.msra.mxu1 %v7634_v21  ;;  %6274 = vmatprep.subr.bf16.mxu0 %v7581_v27  ;;  %v3562_v19 = vld [vmem:[#allocation10 + $0x5a8] sm:$0xff]  ;;  %v3336_v21 = vrot.slane %v9207_v46, %v3335_v9  ;;  %v7620_v25 = vcombine.low %v3550_v7, %v3554_v8  ;;  %v9246_v7 = vld [vmem:[#allocation10 + $0xc20] sm:$0xff] }
 0x274   :  { %6126 = vmatprep.subr.bf16.mxu1 %v7643_v24  ;;  %v3318_v24 = vmax.f32 %v3290_v2, %v3304_v12  ;;  %v7691_v27 = vcombine.high %v3621_v15, %v3625_v16  ;;  %v7629_v10 = vcombine.high %v3558_v17, %v3562_v19  ;;  %v7628_v42 = vcombine.low %v3558_v17, %v3562_v19  ;;  %v3653_v2 = vld [vmem:[#allocation10 + $0x880] sm:$0xff] }
 0x275   :  { %v3370_v41 = vmax.f32 %v3363_v32, 0.0  ;;  %6266 = vmatmul.mubr.bf16.vlgmr.msra.gmra.mrb[8].mxu0 %v9223_v11  ;;  %v3633_v32 = vld [vmem:[#allocation10 + $0x7e0] sm:$0xff] }
 0x276   :  { %6275 = vmatpush1.bf16.msra.mxu0 %v7580_v39  ;;  %v3362_v28 = vadd.f32 %v3336_v21, %v3318_v24  ;;  %v7698_v51 = vcombine.low %v3629_v31, %v3633_v32  ;;  %v3661_v12 = vld [vmem:[#allocation10 + $0x8c0] sm:$0xff] }
 0x277   :  { %v9230_v33 = vpack.c.bf16 %v3370_v41, %v3370_v41  ;;  %6127 = vmatpush1.bf16.msra.mxu1 %v7642_v34  ;;  %6276 = vmatprep.subr.bf16.mxu0 %v7589_v44  ;;  %v7699_v44 = vcombine.high %v3629_v31, %v3633_v32  ;;  %v3673_v24 = vld [vmem:[#allocation10 + $0x920] sm:$0xff] }
 0x278   :  { %6128 = vmatprep.subr.bf16.mxu1 %v7651_v40  ;;  %v7690_v40 = vcombine.low %v3621_v15, %v3625_v16  ;;  %v3369_v53 = vmax.f32 %v3362_v28, 0.0  ;;  %v3602_v15 = vld [vmem:[#allocation10 + $0x6e8] sm:$0xff] }
 0x279   :  { %6142 = vmatprep.mubr.bf16.mxu1 %v9230_v33  ;;  %6306 = vmatprep.mubr.bf16.mxu0 %v9230_v33 }
 0x27a   :  { %6277 = vmatpush1.bf16.msra.mxu0 %v7588_v48  ;;  %v3641_v48 = vld [vmem:[#allocation10 + $0x820] sm:$0xff]  ;;  %v9241_v61 = vpack.c.bf16 %v3369_v53, %v3369_v53 }
 0x27b   :  { %6129 = vmatpush1.bf16.msra.mxu1 %v7650_v47  ;;  %6278 = vmatprep.subr.bf16.mxu0 %v7597_v50  ;;  %v3637_v47 = vld [vmem:[#allocation10 + $0x800] sm:$0xff]  ;;  %v3578_v50 = vld [vmem:[#allocation10 + $0x628] sm:$0xff] }
 0x27c   :  { %6130 = vmatprep.subr.bf16.mxu1 %v7659_v49  ;;  %v3574_v49 = vld [vmem:[#allocation10 + $0x608] sm:$0xff]  ;;  %v7707_v55 = vcombine.high %v3637_v47, %v3641_v48  ;;  %v7706_v60 = vcombine.low %v3637_v47, %v3641_v48 }
 0x27d   :  { %v7644_v62 = vcombine.low %v3574_v49, %v3578_v50  ;;  %v3622_v47 = vld [vmem:[#allocation10 + $0x788] sm:$0xff] }
 0x27e   :  { %6279 = vmatpush1.bf16.msra.mxu0 %v7596_v58  ;;  %v3649_v58 = vld [vmem:[#allocation10 + $0x860] sm:$0xff]  ;;  %v3626_v48 = vld [vmem:[#allocation10 + $0x7a8] sm:$0xff] }
 0x27f   :  { %6131 = vmatpush1.bf16.msra.mxu1 %v7658_v56  ;;  %6280 = vmatprep.subr.bf16.mxu0 %v7605_v52  ;;  %v7645_v56 = vcombine.high %v3574_v49, %v3578_v50  ;;  %v3586_v52 = vld [vmem:[#allocation10 + $0x668] sm:$0xff]  ;;  %v7715_v63 = vcombine.high %v3645_v57, %v3649_v58  ;;  %v7714_v5 = vcombine.low %v3645_v57, %v3649_v58 }
 0x280   :  { %6132 = vmatprep.subr.bf16.mxu1 %v7667_v59  ;;  %v3582_v59 = vld [vmem:[#allocation10 + $0x648] sm:$0xff]  ;;  %v7746_v49 = vcombine.low %v3677_v36, %v3681_v37  ;;  %v7693_v53 = vcombine.high %v3622_v47, %v3626_v48 }
 0x281   :  { %v7652_v8 = vcombine.low %v3582_v59, %v3586_v52  ;;  %v3630_v57 = vld [vmem:[#allocation10 + $0x7c8] sm:$0xff] }
 0x282   :  { %6281 = vmatpush1.bf16.msra.mxu0 %v7604_v29  ;;  %v3657_v29 = vld [vmem:[#allocation10 + $0x8a0] sm:$0xff]  ;;  %v3634_v58 = vld [vmem:[#allocation10 + $0x7e8] sm:$0xff] }
 0x283   :  { %6133 = vmatpush1.bf16.msra.mxu1 %v7666_v1  ;;  %6282 = vmatprep.subr.bf16.mxu0 %v7613_v3  ;;  %v7653_v1 = vcombine.high %v3582_v59, %v3586_v52  ;;  %v3594_v3 = vld [vmem:[#allocation10 + $0x6a8] sm:$0xff]  ;;  %v7723_v9 = vcombine.high %v3653_v2, %v3657_v29  ;;  %v7722_v16 = vcombine.low %v3653_v2, %v3657_v29 }
 0x284   :  { %6134 = vmatprep.subr.bf16.mxu1 %v7675_v23  ;;  %v3590_v23 = vld [vmem:[#allocation10 + $0x688] sm:$0xff]  ;;  %v7701_v29 = vcombine.high %v3630_v57, %v3634_v58 }
 0x285   :  { %v7660_v17 = vcombine.low %v3590_v23, %v3594_v3 }
 0x286   :  { %6283 = vmatpush1.bf16.msra.mxu0 %v7612_v13  ;;  %v3665_v13 = vld [vmem:[#allocation10 + $0x8e0] sm:$0xff] }
 0x287   :  { %6135 = vmatpush1.bf16.msra.mxu1 %v7674_v38  ;;  %6284 = vmatprep.subr.bf16.mxu0 %v7621_v18  ;;  %v7661_v38 = vcombine.high %v3590_v23, %v3594_v3  ;;  %v3598_v18 = vld [vmem:[#allocation10 + $0x6c8] sm:$0xff]  ;;  %v7731_v19 = vcombine.high %v3661_v12, %v3665_v13  ;;  %v3701_v3 = vld [vmem:[#allocation10 + $0xa00] sm:$0xff] }
 0x288   :  { %6136 = vmatprep.subr.bf16.mxu1 %v7683_v14  ;;  %v7834_v14 = vcombine.low %v9244_v6, %v9246_v7  ;;  %v7669_v21 = vcombine.high %v3598_v18, %v3602_v15  ;;  %v7668_v31 = vcombine.low %v3598_v18, %v3602_v15  ;;  %v3709_v15 = vld [vmem:[#allocation10 + $0xa40] sm:$0xff] }
 0x289   :  { %v7938_v34 = vpop.f32.mrb[8].mxu1 }
 0x28a   :  { %v7939_v39 = vpop.f32.mrb[9].mxu1  ;;  %6285 = vmatpush1.bf16.msra.mxu0 %v7620_v25  ;;  %v3606_v25 = vld [vmem:[#allocation10 + $0x708] sm:$0xff] }
 0x28b   :  { %6137 = vmatpush1.bf16.msra.mxu1 %v7682_v22  ;;  %v9239_v41 = vadd.f32 %v7939_v39, %v7938_v34  ;;  %v7941_v46 = vpop.f32.mrb[10].mxu1  ;;  %6286 = vmatprep.subr.bf16.mxu0 %v7629_v10  ;;  %v3669_v22 = vld [vmem:[#allocation10 + $0x900] sm:$0xff]  ;;  %v7730_v10 = vcombine.low %v3661_v12, %v3665_v13  ;;  %v3614_v39 = vld [vmem:[#allocation10 + $0x748] sm:$0xff]  ;;  %v7700_v12 = vcombine.low %v3630_v57, %v3634_v58 }
 0x28c   :  { %6138 = vmatprep.subr.bf16.mxu1 %v7691_v27  ;;  %v7942_v30 = vpop.f32.mrb[11].mxu1  ;;  %v3610_v27 = vld [vmem:[#allocation10 + $0x728] sm:$0xff]  ;;  %v7739_v32 = vcombine.high %v3669_v22, %v3673_v24  ;;  %v7738_v46 = vcombine.low %v3669_v22, %v3673_v24  ;;  %v3745_v57 = vld [vmem:[#allocation10 + $0xb60] sm:$0xff] }
 0x28d   :  { %v7677_v34 = vcombine.high %v3606_v25, %v3610_v27  ;;  %v7676_v28 = vcombine.low %v3606_v25, %v3610_v27  ;;  %v3685_v30 = vld [vmem:[#allocation10 + $0x980] sm:$0xff]  ;;  %v3678_v58 = vld [vmem:[#allocation10 + $0x948] sm:$0xff] }
 0x28e   :  { %6287 = vmatpush1.bf16.msra.mxu0 %v7628_v42  ;;  %v7747_v42 = vcombine.high %v3677_v36, %v3681_v37  ;;  %v3717_v25 = vld [vmem:[#allocation10 + $0xa80] sm:$0xff] }
 0x28f   :  { %6139 = vmatpush1.bf16.msra.mxu1 %v7690_v40  ;;  %6288 = vmatprep.subr.bf16.mxu0 %v7637_v45  ;;  %v3618_v40 = vld [vmem:[#allocation10 + $0x768] sm:$0xff]  ;;  %v3689_v45 = vld [vmem:[#allocation10 + $0x9a0] sm:$0xff] }
 0x290   :  { %6140 = vmatprep.subr.bf16.mxu1 %v7699_v44  ;;  %v7685_v44 = vcombine.high %v3614_v39, %v3618_v40  ;;  %v7684_v50 = vcombine.low %v3614_v39, %v3618_v40  ;;  %v3721_v27 = vld [vmem:[#allocation10 + $0xaa0] sm:$0xff] }
 0x291   :  { %v7787_v36 = vcombine.high %v3717_v25, %v3721_v27  ;;  %v3725_v39 = vld [vmem:[#allocation10 + $0xac0] sm:$0xff] }
 0x292   :  { %6289 = vmatpush1.bf16.msra.mxu0 %v7636_v54  ;;  %v3729_v40 = vld [vmem:[#allocation10 + $0xae0] sm:$0xff] }
 0x293   :  { %6141 = vmatpush1.bf16.msra.mxu1 %v7698_v51  ;;  %6290 = vmatprep.subr.bf16.mxu0 %v7645_v56  ;;  %v7755_v51 = vcombine.high %v3685_v30, %v3689_v45  ;;  %v3697_v56 = vld [vmem:[#allocation10 + $0x9e0] sm:$0xff] }
 0x294   :  { %6151 = vmatprep.subr.bf16.mxu1 %v7707_v55  ;;  %v3693_v55 = vld [vmem:[#allocation10 + $0x9c0] sm:$0xff] }
 0x295   :  { %v7763_v2 = vcombine.high %v3693_v55, %v3697_v56 }
 0x296   :  { %6143 = vmatmul.mubr.bf16.vlgmr.msra.gmra.mrb[24].mxu1 %v9241_v61  ;;  %6291 = vmatpush1.bf16.msra.mxu0 %v7644_v62  ;;  %v7754_v62 = vcombine.low %v3685_v30, %v3689_v45  ;;  %v7795_v30 = vcombine.high %v3725_v39, %v3729_v40 }
 0x297   :  { %6152 = vmatpush1.bf16.msra.mxu1 %v7706_v60  ;;  %6292 = vmatprep.subr.bf16.mxu0 %v7653_v1 }
 0x298   :  { %6153 = vmatprep.subr.bf16.mxu1 %v7715_v63  ;;  %v7692_v63 = vcombine.low %v3622_v47, %v3626_v48  ;;  %v3733_v47 = vld [vmem:[#allocation10 + $0xb00] sm:$0xff] }
 0x299   :  { %v3737_v48 = vld [vmem:[#allocation10 + $0xb20] sm:$0xff] }
 0x29a   :  { %6293 = vmatpush1.bf16.msra.mxu0 %v7652_v8  ;;  %v3638_v8 = vld [vmem:[#allocation10 + $0x808] sm:$0xff] }
 0x29b   :  { %6154 = vmatpush1.bf16.msra.mxu1 %v7714_v5  ;;  %6294 = vmatprep.subr.bf16.mxu0 %v7661_v38  ;;  %v3705_v5 = vld [vmem:[#allocation10 + $0xa20] sm:$0xff]  ;;  %v7762_v38 = vcombine.low %v3693_v55, %v3697_v56 }
 0x29c   :  { %6155 = vmatprep.subr.bf16.mxu1 %v7723_v9  ;;  %v3642_v9 = vld [vmem:[#allocation10 + $0x828] sm:$0xff]  ;;  %v7771_v13 = vcombine.high %v3701_v3, %v3705_v5  ;;  %v3741_v56 = vld [vmem:[#allocation10 + $0xb40] sm:$0xff] }
 0x29d   :  { %v7709_v18 = vcombine.high %v3638_v8, %v3642_v9 }
 0x29e   :  { %6295 = vmatpush1.bf16.msra.mxu0 %v7660_v17  ;;  %v3646_v17 = vld [vmem:[#allocation10 + $0x848] sm:$0xff] }
 0x29f   :  { %6156 = vmatpush1.bf16.msra.mxu1 %v7722_v16  ;;  %6296 = vmatprep.subr.bf16.mxu0 %v7669_v21  ;;  %v3713_v16 = vld [vmem:[#allocation10 + $0xa60] sm:$0xff]  ;;  %v7770_v21 = vcombine.low %v3701_v3, %v3705_v5  ;;  %v3690_v3 = vld [vmem:[#allocation10 + $0x9a8] sm:$0xff]  ;;  %v7810_v5 = vcombine.low %v3741_v56, %v3745_v57 }
 0x2a0   :  { %6157 = vmatprep.subr.bf16.mxu1 %v7731_v19  ;;  %v3650_v19 = vld [vmem:[#allocation10 + $0x868] sm:$0xff]  ;;  %v7779_v22 = vcombine.high %v3709_v15, %v3713_v16 }
 0x2a1   :  { %v7717_v24 = vcombine.high %v3646_v17, %v3650_v19 }
 0x2a2   :  { %6297 = vmatpush1.bf16.msra.mxu0 %v7668_v31  ;;  %v3658_v31 = vld [vmem:[#allocation10 + $0x8a8] sm:$0xff] }
 0x2a3   :  { %6158 = vmatpush1.bf16.msra.mxu1 %v7730_v10  ;;  %6298 = vmatprep.subr.bf16.mxu0 %v7677_v34  ;;  %v3654_v10 = vld [vmem:[#allocation10 + $0x888] sm:$0xff]  ;;  %v7716_v34 = vcombine.low %v3646_v17, %v3650_v19 }
 0x2a4   :  { %6159 = vmatprep.subr.bf16.mxu1 %v7739_v32  ;;  %v7778_v32 = vcombine.low %v3709_v15, %v3713_v16  ;;  %v7725_v37 = vcombine.high %v3654_v10, %v3658_v31  ;;  %v3694_v16 = vld [vmem:[#allocation10 + $0x9c8] sm:$0xff] }
 0x2a5   :  { %v3698_v17 = vld [vmem:[#allocation10 + $0x9e8] sm:$0xff] }
 0x2a6   :  { %6299 = vmatpush1.bf16.msra.mxu0 %v7676_v28  ;;  %v3666_v28 = vld [vmem:[#allocation10 + $0x8e8] sm:$0xff] }
 0x2a7   :  { %6160 = vmatpush1.bf16.msra.mxu1 %v7738_v46  ;;  %6300 = vmatprep.subr.bf16.mxu0 %v7685_v44  ;;  %v3662_v46 = vld [vmem:[#allocation10 + $0x8c8] sm:$0xff]  ;;  %v7724_v44 = vcombine.low %v3654_v10, %v3658_v31  ;;  %v7765_v10 = vcombine.high %v3694_v16, %v3698_v17 }
 0x2a8   :  { %6161 = vmatprep.subr.bf16.mxu1 %v7747_v42  ;;  %v7786_v42 = vcombine.low %v3717_v25, %v3721_v27  ;;  %v7733_v45 = vcombine.high %v3662_v46, %v3666_v28  ;;  %v3702_v31 = vld [vmem:[#allocation10 + $0xa08] sm:$0xff] }
 0x2a9   :  { %v7960_v54 = vpop.f32.mrb[12].mxu1 }
 0x2aa   :  { %v7961_v59 = vpop.f32.mrb[13].mxu1  ;;  %6301 = vmatpush1.bf16.msra.mxu0 %v7684_v50  ;;  %v3674_v50 = vld [vmem:[#allocation10 + $0x928] sm:$0xff] }
 0x2ab   :  { %v7962_v52 = vadd.f32 %v7961_v59, %v7960_v54  ;;  %v7963_v60 = vpop.f32.mrb[14].mxu1  ;;  %6162 = vmatpush1.bf16.msra.mxu1 %v7746_v49  ;;  %6302 = vmatprep.subr.bf16.mxu0 %v7693_v53  ;;  %v3670_v49 = vld [vmem:[#allocation10 + $0x908] sm:$0xff]  ;;  %v7732_v53 = vcombine.low %v3662_v46, %v3666_v28  ;;  %v7803_v54 = vcombine.high %v3733_v47, %v3737_v48 }
 0x2ac   :  { %v7964_v1 = vpop.f32.mrb[15].mxu1  ;;  %6163 = vmatprep.subr.bf16.mxu1 %v7755_v51  ;;  %v7794_v51 = vcombine.low %v3725_v39, %v3729_v40  ;;  %v7741_v55 = vcombine.high %v3670_v49, %v3674_v50  ;;  %v3682_v59 = vld [vmem:[#allocation10 + $0x968] sm:$0xff]  ;;  %v7740_v60 = vcombine.low %v3670_v49, %v3674_v50 }
 0x2ad   :  { %v9251_v23 = vadd.f32 %v7962_v52, %v9239_v41  ;;  %v7708_v41 = vcombine.low %v3638_v8, %v3642_v9  ;;  %v7802_v52 = vcombine.low %v3733_v47, %v3737_v48  ;;  %v3749_v1 = vld [vmem:[#allocation10 + $0xb80] sm:$0xff]  ;;  %v7748_v8 = vcombine.low %v3678_v58, %v3682_v59  ;;  %v3710_v40 = vld [vmem:[#allocation10 + $0xa48] sm:$0xff] }
 0x2ae   :  { %6303 = vmatpush1.bf16.msra.mxu0 %v7692_v63  ;;  %v7749_v63 = vcombine.high %v3678_v58, %v3682_v59  ;;  %v3714_v46 = vld [vmem:[#allocation10 + $0xa68] sm:$0xff] }
 0x2af   :  { %6164 = vmatpush1.bf16.msra.mxu1 %v7754_v62  ;;  %6304 = vmatprep.subr.bf16.mxu0 %v7701_v29  ;;  %v7811_v62 = vcombine.high %v3741_v56, %v3745_v57  ;;  %v3686_v29 = vld [vmem:[#allocation10 + $0x988] sm:$0xff] }
 0x2b0   :  { %6165 = vmatprep.subr.bf16.mxu1 %v7763_v2  ;;  %v3753_v2 = vld [vmem:[#allocation10 + $0xba0] sm:$0xff]  ;;  %v3726_v47 = vld [vmem:[#allocation10 + $0xac8] sm:$0xff] }
 0x2b1   :  { %v7819_v9 = vcombine.high %v3749_v1, %v3753_v2  ;;  %v3730_v48 = vld [vmem:[#allocation10 + $0xae8] sm:$0xff] }
 0x2b2   :  { %6305 = vmatpush1.bf16.msra.mxu0 %v7700_v12  ;;  %v7757_v12 = vcombine.high %v3686_v29, %v3690_v3  ;;  %v7797_v50 = vcombine.high %v3726_v47, %v3730_v48  ;;  %v3742_v56 = vld [vmem:[#allocation10 + $0xb48] sm:$0xff] }
 0x2b3   :  { %6166 = vmatpush1.bf16.msra.mxu1 %v7762_v38  ;;  %6315 = vmatprep.subr.bf16.mxu0 %v7709_v18  ;;  %v3761_v18 = vld [vmem:[#allocation10 + $0xbe0] sm:$0xff]  ;;  %v3746_v57 = vld [vmem:[#allocation10 + $0xb68] sm:$0xff] }
 0x2b4   :  { %6167 = vmatprep.subr.bf16.mxu1 %v7771_v13  ;;  %v3757_v13 = vld [vmem:[#allocation10 + $0xbc0] sm:$0xff]  ;;  %v7813_v59 = vcombine.high %v3742_v56, %v3746_v57 }
 0x2b5   :  { %6307 = vmatmul.mubr.bf16.vlgmr.msra.gmra.mrb[8].mxu0 %v9241_v61  ;;  %v7827_v25 = vcombine.high %v3757_v13, %v3761_v18 }
 0x2b6   :  { %6316 = vmatpush1.bf16.msra.mxu0 %v7708_v41  ;;  %v7818_v41 = vcombine.low %v3749_v1, %v3753_v2 }
 0x2b7   :  { %6168 = vmatpush1.bf16.msra.mxu1 %v7770_v21  ;;  %6317 = vmatprep.subr.bf16.mxu0 %v7717_v24  ;;  %v7756_v24 = vcombine.low %v3686_v29, %v3690_v3  ;;  %v3758_v29 = vld [vmem:[#allocation10 + $0xbc8] sm:$0xff] }
 0x2b8   :  { %6169 = vmatprep.subr.bf16.mxu1 %v7779_v22  ;;  %v3762_v3 = vld [vmem:[#allocation10 + $0xbe8] sm:$0xff] }
 0x2ba   :  { %6318 = vmatpush1.bf16.msra.mxu0 %v7716_v34  ;;  %v7826_v34 = vcombine.low %v3757_v13, %v3761_v18  ;;  %v3766_v13 = vld [vmem:[#allocation10 + $0xc08] sm:$0xff] }
 0x2bb   :  { %6170 = vmatpush1.bf16.msra.mxu1 %v7778_v32  ;;  %6319 = vmatprep.subr.bf16.mxu0 %v7725_v37  ;;  %v3706_v32 = vld [vmem:[#allocation10 + $0xa28] sm:$0xff]  ;;  %v7835_v37 = vcombine.high %v9244_v6, %v9246_v7 }
 0x2bc   :  { %6171 = vmatprep.subr.bf16.mxu1 %v7787_v36  ;;  %v7764_v36 = vcombine.low %v3694_v16, %v3698_v17  ;;  %v7773_v39 = vcombine.high %v3702_v31, %v3706_v32  ;;  %v7772_v28 = vcombine.low %v3702_v31, %v3706_v32  ;;  %v3770_v18 = vld [vmem:[#allocation10 + $0xc28] sm:$0xff] }
 0x2bd   :  { %v7837_v16 = vcombine.high %v3766_v13, %v3770_v18 }
 0x2be   :  { %6320 = vmatpush1.bf16.msra.mxu0 %v7724_v44  ;;  %v3722_v44 = vld [vmem:[#allocation10 + $0xaa8] sm:$0xff] }
 0x2bf   :  { %6172 = vmatpush1.bf16.msra.mxu1 %v7786_v42  ;;  %6321 = vmatprep.subr.bf16.mxu0 %v7733_v45  ;;  %v3718_v42 = vld [vmem:[#allocation10 + $0xa88] sm:$0xff] }
 0x2c0   :  { %6173 = vmatprep.subr.bf16.mxu1 %v7795_v30  ;;  %v7780_v30 = vcombine.low %v3710_v40, %v3714_v46  ;;  %v7789_v45 = vcombine.high %v3718_v42, %v3722_v44  ;;  %v7788_v49 = vcombine.low %v3718_v42, %v3722_v44  ;;  %v3773_v44 = vld [vmem:[#allocation10 + $0xc40] sm:$0xff] }
 0x2c2   :  { %6322 = vmatpush1.bf16.msra.mxu0 %v7732_v53  ;;  %v3738_v53 = vld [vmem:[#allocation10 + $0xb28] sm:$0xff] }
 0x2c3   :  { %6174 = vmatpush1.bf16.msra.mxu1 %v7794_v51  ;;  %6323 = vmatprep.subr.bf16.mxu0 %v7741_v55  ;;  %v3734_v51 = vld [vmem:[#allocation10 + $0xb08] sm:$0xff] }
 0x2c4   :  { %6175 = vmatprep.subr.bf16.mxu1 %v7803_v54  ;;  %v7796_v54 = vcombine.low %v3726_v47, %v3730_v48  ;;  %v7805_v55 = vcombine.high %v3734_v51, %v3738_v53  ;;  %v7804_v58 = vcombine.low %v3734_v51, %v3738_v53  ;;  %v3774_v47 = vld [vmem:[#allocation10 + $0xc48] sm:$0xff] }
 0x2c5   :  { %v3778_v48 = vld [vmem:[#allocation10 + $0xc68] sm:$0xff] }
 0x2c6   :  { %6324 = vmatpush1.bf16.msra.mxu0 %v7740_v60  ;;  %v3754_v60 = vld [vmem:[#allocation10 + $0xba8] sm:$0xff] }
 0x2c7   :  { %6176 = vmatpush1.bf16.msra.mxu1 %v7802_v52  ;;  %6325 = vmatprep.subr.bf16.mxu0 %v7749_v63  ;;  %v3750_v52 = vld [vmem:[#allocation10 + $0xb88] sm:$0xff] }
 0x2c8   :  { %6177 = vmatprep.subr.bf16.mxu1 %v7811_v62  ;;  %v7812_v62 = vcombine.low %v3742_v56, %v3746_v57  ;;  %v7821_v1 = vcombine.high %v3750_v52, %v3754_v60  ;;  %v3785_v56 = vld [vmem:[#allocation10 + $0xca0] sm:$0xff]  ;;  %v3782_v57 = vld [vmem:[#allocation10 + $0xc88] sm:$0xff] }
 0x2c9   :  { %v7982_v38 = vpop.f32.mrb[16].mxu1 }
 0x2ca   :  { %v7983_v15 = vpop.f32.mrb[17].mxu1  ;;  %6326 = vmatpush1.bf16.msra.mxu0 %v7748_v8 }
 0x2cb   :  { %v7984_v19 = vadd.f32 %v7983_v15, %v7982_v38  ;;  %v7985_v21 = vpop.f32.mrb[18].mxu1  ;;  %6178 = vmatpush1.bf16.msra.mxu1 %v7810_v5  ;;  %6327 = vmatprep.subr.bf16.mxu0 %v7757_v12  ;;  %v7829_v12 = vcombine.high %v3758_v29, %v3762_v3  ;;  %v7828_v15 = vcombine.low %v3758_v29, %v3762_v3  ;;  %v3790_v29 = vld [vmem:[#allocation10 + $0xcc8] sm:$0xff] }
 0x2cc   :  { %v7986_v22 = vpop.f32.mrb[19].mxu1  ;;  %6179 = vmatprep.subr.bf16.mxu1 %v7819_v9  ;;  %v7820_v9 = vcombine.low %v3750_v52, %v3754_v60  ;;  %v3343_v21 = vsub.s32 4, %v9200_v26  ;;  %v7844_v52 = vcombine.low %v3774_v47, %v3778_v48  ;;  %v3794_v3 = vld [vmem:[#allocation10 + $0xce8] sm:$0xff] }
 0x2cd   :  { %v3222_v27 = vadd.f32 %v7984_v19, %v9251_v23  ;;  %v7781_v23 = vcombine.high %v3710_v40, %v3714_v46 }
 0x2ce   :  { %6328 = vmatpush1.bf16.msra.mxu0 %v7756_v24  ;;  %v3347_v24 = vsub.s32 5, %v9200_v26 }
 0x2cf   :  { %6180 = vmatpush1.bf16.msra.mxu1 %v7818_v41  ;;  %6329 = vmatprep.subr.bf16.mxu0 %v7765_v10 }
 0x2d0   :  { %6181 = vmatprep.subr.bf16.mxu1 %v7827_v25 }
 0x2d2   :  { %6330 = vmatpush1.bf16.msra.mxu0 %v7764_v36 }
 0x2d3   :  { %6182 = vmatpush1.bf16.msra.mxu1 %v7826_v34  ;;  %6331 = vmatprep.subr.bf16.mxu0 %v7773_v39  ;;  %v9261_v34 = vld [vmem:[#allocation8] sm:$0xff] }
 0x2d4   :  { %6192 = vmatprep.subr.bf16.mxu1 %v7835_v37  ;;  %v3344_v36 = vrot.slane %v9261_v34, %v3343_v21  ;;  %v3348_v39 = vrot.slane %v9261_v34, %v3347_v24  ;;  %v3805_v21 = vld [vmem:[#allocation10 + $0xd40] sm:$0xff]  ;;  %v3810_v24 = vld [vmem:[#allocation10 + $0xd68] sm:$0xff] }
 0x2d6   :  { %6332 = vmatpush1.bf16.msra.mxu0 %v7772_v28 }
 0x2d7   :  { %6333 = vmatprep.subr.bf16.mxu0 %v7781_v23 }
 0x2da   :  { %6334 = vmatpush1.bf16.msra.mxu0 %v7780_v30 }
 0x2db   :  { %6335 = vmatprep.subr.bf16.mxu0 %v7789_v45  ;;  %v3777_v45 = vld [vmem:[#allocation10 + $0xc60] sm:$0xff] }
 0x2dc   :  { %v7843_v53 = vcombine.high %v3773_v44, %v3777_v45 }
 0x2de   :  { %6336 = vmatpush1.bf16.msra.mxu0 %v7788_v49 }
 0x2df   :  { %6337 = vmatprep.subr.bf16.mxu0 %v7797_v50  ;;  %v7836_v50 = vcombine.low %v3766_v13, %v3770_v18  ;;  %v3802_v13 = vld [vmem:[#allocation10 + $0xd28] sm:$0xff] }
 0x2e2   :  { %6338 = vmatpush1.bf16.msra.mxu0 %v7796_v54  ;;  %v7845_v54 = vcombine.high %v3774_v47, %v3778_v48  ;;  %v3825_v47 = vld [vmem:[#allocation10 + $0xde0] sm:$0xff]  ;;  %v3822_v48 = vld [vmem:[#allocation10 + $0xdc8] sm:$0xff] }
 0x2e3   :  { %6339 = vmatprep.subr.bf16.mxu0 %v7805_v55  ;;  %v3781_v55 = vld [vmem:[#allocation10 + $0xc80] sm:$0xff] }
 0x2e4   :  { %v7851_v60 = vcombine.high %v3781_v55, %v3785_v56 }
 0x2e6   :  { %6340 = vmatpush1.bf16.msra.mxu0 %v7804_v58  ;;  %v3786_v58 = vld [vmem:[#allocation10 + $0xca8] sm:$0xff] }
 0x2e7   :  { %6341 = vmatprep.subr.bf16.mxu0 %v7813_v59  ;;  %v7842_v59 = vcombine.low %v3773_v44, %v3777_v45  ;;  %v7852_v6 = vcombine.low %v3782_v57, %v3786_v58  ;;  %v3821_v45 = vld [vmem:[#allocation10 + $0xdc0] sm:$0xff] }
 0x2e9   :  { %v3261_v63 = vpop.f32.mrb[20].mxu1 }
 0x2ea   :  { %v9257_v2 = vadd.f32 %v3261_v63, %v3222_v27  ;;  %v8042_v5 = vpop.f32.mrb[21].mxu1  ;;  %6342 = vmatpush1.bf16.msra.mxu0 %v7812_v62  ;;  %v7853_v62 = vcombine.high %v3782_v57, %v3786_v58  ;;  %v3789_v63 = vld [vmem:[#allocation10 + $0xcc0] sm:$0xff]  ;;  %v3383_v57 = vld [vmem:[#allocation10 + $0x10] sm:$0xff] }
 0x2eb   :  { %v3264_v8 = vpop.f32.mrb[22].mxu1  ;;  %6343 = vmatprep.subr.bf16.mxu0 %v7821_v1  ;;  %v3793_v1 = vld [vmem:[#allocation10 + $0xce0] sm:$0xff]  ;;  %v7850_v5 = vcombine.low %v3781_v55, %v3785_v56  ;;  %v3387_v58 = vld [vmem:[#allocation10 + $0x30] sm:$0xff] }
 0x2ec   :  { %v8043_v38 = vpop.f32.mrb[23].mxu1  ;;  %v3280_v7 = vrot.slane %v9257_v2, 2  ;;  %v7861_v8 = vcombine.high %v3790_v29, %v3794_v3  ;;  %v7858_v18 = vcombine.low %v3789_v63, %v3793_v1 }
 0x2ed   :  { %v3801_v38 = vld [vmem:[#allocation10 + $0xd20] sm:$0xff] }
 0x2ee   :  { %6344 = vmatpush1.bf16.msra.mxu0 %v7820_v9  ;;  %v3797_v9 = vld [vmem:[#allocation10 + $0xd00] sm:$0xff] }
 0x2ef   :  { %6345 = vmatprep.subr.bf16.mxu0 %v7829_v12  ;;  %v3798_v12 = vld [vmem:[#allocation10 + $0xd08] sm:$0xff] }
 0x2f2   :  { %6346 = vmatpush1.bf16.msra.mxu0 %v7828_v15  ;;  %v7860_v15 = vcombine.low %v3790_v29, %v3794_v3  ;;  %v3391_v3 = vld [vmem:[#allocation10 + $0x50] sm:$0xff] }
 0x2f3   :  { %6356 = vmatprep.subr.bf16.mxu0 %v7837_v16  ;;  %v3294_v16 = vmax.f32 %v9257_v2, %v3280_v7  ;;  %v3813_v2 = vld [vmem:[#allocation10 + $0xd80] sm:$0xff]  ;;  %v3396_v7 = vld [vmem:[#allocation10 + $0x78] sm:$0xff] }
 0x308   :  { %v3100_v17 = vpop.f32.mrb[4].mxu0 }
 0x309   :  { %v3278_v19 = vrot.slane %v3100_v17, 2  ;;  %v3102_v41 = vpop.f32.mrb[5].mxu0 }
 0x30a   :  { %v3279_v22 = vrot.slane %v3102_v41, 2  ;;  %v3104_v25 = vpop.f32.mrb[6].mxu0 }
 0x30b   :  { %v3292_v27 = vmax.f32 %v3100_v17, %v3278_v19  ;;  %v3105_v10 = vpop.f32.mrb[7].mxu0  ;;  %v7867_v17 = vcombine.high %v3797_v9, %v3801_v38  ;;  %v7869_v19 = vcombine.high %v3798_v12, %v3802_v13  ;;  %v3351_v25 = vsub.s32 6, %v9200_v26 }
 0x30c   :  { %v3293_v31 = vmax.f32 %v3102_v41, %v3279_v22  ;;  %v3809_v41 = vld [vmem:[#allocation10 + $0xd60] sm:$0xff]  ;;  %v3806_v22 = vld [vmem:[#allocation10 + $0xd48] sm:$0xff]  ;;  %v7868_v10 = vcombine.low %v3798_v12, %v3802_v13  ;;  %v3399_v13 = vld [vmem:[#allocation10 + $0x90] sm:$0xff] }
 0x30d   :  { %v3306_v32 = vrot.slane %v3292_v27, 4 }
 0x30e   :  { %v3307_v37 = vrot.slane %v3293_v31, 4 }
 0x30f   :  { %v3320_v40 = vmax.f32 %v3292_v27, %v3306_v32  ;;  %v7866_v27 = vcombine.low %v3797_v9, %v3801_v38  ;;  %v7875_v32 = vcombine.high %v3805_v21, %v3809_v41 }
 0x310   :  { %v3321_v46 = vmax.f32 %v3293_v31, %v3307_v37  ;;  %v3308_v31 = vrot.slane %v3294_v16, 4  ;;  %v3817_v37 = vld [vmem:[#allocation10 + $0xda0] sm:$0xff] }
 0x311   :  { %v3364_v28 = vadd.f32 %v3344_v36, %v3320_v40  ;;  %v7877_v36 = vcombine.high %v3806_v22, %v3810_v24  ;;  %v3818_v40 = vld [vmem:[#allocation10 + $0xda8] sm:$0xff]  ;;  %v7883_v44 = vcombine.high %v3813_v2, %v3817_v37 }
 0x312   :  { %v3365_v23 = vadd.f32 %v3348_v39, %v3321_v46  ;;  %v3814_v39 = vld [vmem:[#allocation10 + $0xd88] sm:$0xff]  ;;  %v3352_v46 = vrot.slane %v9261_v34, %v3351_v25  ;;  %v7891_v34 = vcombine.high %v3821_v45, %v3825_v47  ;;  %v3408_v25 = vld [vmem:[#allocation10 + $0xd8] sm:$0xff] }
 0x313   :  { %v3371_v42 = vmax.f32 %v3364_v28, 0.0  ;;  %v7874_v28 = vcombine.low %v3805_v21, %v3809_v41 }
 0x314   :  { %v3372_v30 = vmax.f32 %v3365_v23, 0.0  ;;  %v7876_v23 = vcombine.low %v3806_v22, %v3810_v24  ;;  %v3407_v22 = vld [vmem:[#allocation10 + $0xd0] sm:$0xff] }
 0x315   :  { %v9267_v51 = vpack.c.bf16 %v3371_v42, %v3371_v42  ;;  %v3322_v42 = vmax.f32 %v3294_v16, %v3308_v31  ;;  %v3404_v16 = vld [vmem:[#allocation10 + $0xb8] sm:$0xff]  ;;  %v3411_v24 = vld [vmem:[#allocation10 + $0xf0] sm:$0xff] }
 0x316   :  { %v9265_v49 = vpack.c.bf16 %v3372_v30, %v3372_v30  ;;  %v7885_v30 = vcombine.high %v3814_v39, %v3818_v40 }
 0x317   :  { %v3366_v55 = vadd.f32 %v3352_v46, %v3322_v42  ;;  %v3423_v42 = vld [vmem:[#allocation10 + $0x150] sm:$0xff] }
 0x318   :  { %6183 = vmatprep.mubr.bf16.mxu1 %v9265_v49  ;;  %6347 = vmatprep.mubr.bf16.mxu0 %v9265_v49 }
 0x319   :  { %6184 = vmatmul.mubr.bf16.vlgmr.msra.gmra.mrb[24].mxu1 %v9267_v51  ;;  %6348 = vmatmul.mubr.bf16.vlgmr.msra.gmra.mrb[8].mxu0 %v9267_v51 }
 0x31a   :  { %6193 = vmatpush1.bf16.msra.mxu1 %v7834_v14  ;;  %6357 = vmatpush1.bf16.msra.mxu0 %v7836_v50  ;;  %v7859_v14 = vcombine.high %v3789_v63, %v3793_v1  ;;  %v3826_v50 = vld [vmem:[#allocation10 + $0xde8] sm:$0xff]  ;;  %v3373_v63 = vmax.f32 %v3366_v55, 0.0  ;;  %v7455_v1 = vcombine.high %v3383_v57, %v3387_v58  ;;  %v3435_v55 = vld [vmem:[#allocation10 + $0x1b0] sm:$0xff] }
 0x31b   :  { %6194 = vmatprep.subr.bf16.mxu1 %v7843_v53  ;;  %6358 = vmatprep.subr.bf16.mxu0 %v7845_v54  ;;  %v7882_v53 = vcombine.low %v3813_v2, %v3817_v37  ;;  %v7884_v54 = vcombine.low %v3814_v39, %v3818_v40  ;;  %v7893_v56 = vcombine.high %v3822_v48, %v3826_v50  ;;  %v3415_v2 = vld [vmem:[#allocation10 + $0x110] sm:$0xff]  ;;  %v3420_v39 = vld [vmem:[#allocation10 + $0x138] sm:$0xff] }
 0x31c   :  { %6224 = vmatprep.mubr.bf16.mxu1 %v8961_v0  ;;  %6388 = vmatprep.mubr.bf16.mxu0 %v8961_v0  ;;  %v3419_v37 = vld [vmem:[#allocation10 + $0x130] sm:$0xff]  ;;  %v7478_v40 = vcombine.low %v3407_v22, %v3411_v24 }
 0x31e   :  { %6195 = vmatpush1.bf16.msra.mxu1 %v7842_v59  ;;  %6359 = vmatpush1.bf16.msra.mxu0 %v7844_v52  ;;  %v3384_v59 = vld [vmem:[#allocation10 + $0x18] sm:$0xff] }
 0x31f   :  { %6196 = vmatprep.subr.bf16.mxu1 %v7851_v60  ;;  %6360 = vmatprep.subr.bf16.mxu0 %v7853_v62  ;;  %v3388_v52 = vld [vmem:[#allocation10 + $0x38] sm:$0xff]  ;;  %v7890_v60 = vcombine.low %v3821_v45, %v3825_v47  ;;  %v7892_v62 = vcombine.low %v3822_v48, %v3826_v50  ;;  %v7486_v47 = vcombine.low %v3415_v2, %v3419_v37 }
 0x320   :  { %v7457_v29 = vcombine.high %v3384_v59, %v3388_v52  ;;  %v7456_v9 = vcombine.low %v3384_v59, %v3388_v52  ;;  %v3428_v45 = vld [vmem:[#allocation10 + $0x178] sm:$0xff] }
 0x322   :  { %6197 = vmatpush1.bf16.msra.mxu1 %v7850_v5  ;;  %6361 = vmatpush1.bf16.msra.mxu0 %v7852_v6  ;;  %v3395_v5 = vld [vmem:[#allocation10 + $0x70] sm:$0xff]  ;;  %v3392_v6 = vld [vmem:[#allocation10 + $0x58] sm:$0xff] }
 0x323   :  { %6198 = vmatprep.subr.bf16.mxu1 %v7859_v14  ;;  %6362 = vmatprep.subr.bf16.mxu0 %v7861_v8  ;;  %v7454_v14 = vcombine.low %v3383_v57, %v3387_v58  ;;  %v9282_v8 = vpack.c.bf16 %v3373_v63, %v3373_v63  ;;  %v7463_v38 = vcombine.high %v3391_v3, %v3395_v5  ;;  %v3440_v63 = vld [vmem:[#allocation10 + $0x1d8] sm:$0xff] }
 0x324   :  { %v7465_v12 = vcombine.high %v3392_v6, %v3396_v7 }
 0x326   :  { %6199 = vmatpush1.bf16.msra.mxu1 %v7858_v18  ;;  %6363 = vmatpush1.bf16.msra.mxu0 %v7860_v15  ;;  %v3403_v18 = vld [vmem:[#allocation10 + $0xb0] sm:$0xff]  ;;  %v3400_v15 = vld [vmem:[#allocation10 + $0x98] sm:$0xff] }
 0x327   :  { %6200 = vmatprep.subr.bf16.mxu1 %v7867_v17  ;;  %6364 = vmatprep.subr.bf16.mxu0 %v7869_v19  ;;  %v7462_v17 = vcombine.low %v3391_v3, %v3395_v5  ;;  %v7464_v19 = vcombine.low %v3392_v6, %v3396_v7  ;;  %v7471_v21 = vcombine.high %v3399_v13, %v3403_v18  ;;  %v3447_v7 = vld [vmem:[#allocation10 + $0x210] sm:$0xff] }
 0x328   :  { %v7473_v41 = vcombine.high %v3400_v15, %v3404_v16  ;;  %v7472_v31 = vcombine.low %v3400_v15, %v3404_v16  ;;  %v3455_v16 = vld [vmem:[#allocation10 + $0x250] sm:$0xff] }
 0x32a   :  { %6201 = vmatpush1.bf16.msra.mxu1 %v7866_v27  ;;  %6365 = vmatpush1.bf16.msra.mxu0 %v7868_v10  ;;  %v3412_v27 = vld [vmem:[#allocation10 + $0xf8] sm:$0xff]  ;;  %v7470_v10 = vcombine.low %v3399_v13, %v3403_v18 }
 0x32b   :  { %6202 = vmatprep.subr.bf16.mxu1 %v7875_v32  ;;  %6366 = vmatprep.subr.bf16.mxu0 %v7877_v36  ;;  %v7479_v32 = vcombine.high %v3407_v22, %v3411_v24  ;;  %v7481_v36 = vcombine.high %v3408_v25, %v3412_v27  ;;  %v7480_v46 = vcombine.low %v3408_v25, %v3412_v27  ;;  %v3463_v27 = vld [vmem:[#allocation10 + $0x290] sm:$0xff] }
 0x32e   :  { %6203 = vmatpush1.bf16.msra.mxu1 %v7874_v28  ;;  %6367 = vmatpush1.bf16.msra.mxu0 %v7876_v23  ;;  %v7487_v28 = vcombine.high %v3415_v2, %v3419_v37 }
 0x32f   :  { %6204 = vmatprep.subr.bf16.mxu1 %v7883_v44  ;;  %6368 = vmatprep.subr.bf16.mxu0 %v7885_v30  ;;  %v3427_v44 = vld [vmem:[#allocation10 + $0x170] sm:$0xff]  ;;  %v3424_v30 = vld [vmem:[#allocation10 + $0x158] sm:$0xff] }
 0x330   :  { %v7495_v50 = vcombine.high %v3423_v42, %v3427_v44  ;;  %v7494_v57 = vcombine.low %v3423_v42, %v3427_v44  ;;  %v7496_v58 = vcombine.low %v3424_v30, %v3428_v45 }
 0x332   :  { %6205 = vmatpush1.bf16.msra.mxu1 %v7882_v53  ;;  %6369 = vmatpush1.bf16.msra.mxu0 %v7884_v54  ;;  %v7497_v53 = vcombine.high %v3424_v30, %v3428_v45  ;;  %v3431_v54 = vld [vmem:[#allocation10 + $0x190] sm:$0xff] }
 0x333   :  { %6206 = vmatprep.subr.bf16.mxu1 %v7891_v34  ;;  %6370 = vmatprep.subr.bf16.mxu0 %v7893_v56  ;;  %v3432_v34 = vld [vmem:[#allocation10 + $0x198] sm:$0xff]  ;;  %v7503_v59 = vcombine.high %v3431_v54, %v3435_v55  ;;  %v3479_v45 = vld [vmem:[#allocation10 + $0x310] sm:$0xff] }
 0x334   :  { %v3436_v56 = vld [vmem:[#allocation10 + $0x1b8] sm:$0xff] }
 0x335   :  { %v7505_v52 = vcombine.high %v3432_v34, %v3436_v56  ;;  %v7504_v3 = vcombine.low %v3432_v34, %v3436_v56  ;;  %v3487_v56 = vld [vmem:[#allocation10 + $0x350] sm:$0xff] }
 0x336   :  { %6207 = vmatpush1.bf16.msra.mxu1 %v7890_v60  ;;  %6371 = vmatpush1.bf16.msra.mxu0 %v7892_v62  ;;  %v3439_v60 = vld [vmem:[#allocation10 + $0x1d0] sm:$0xff] }
 0x337   :  { %6397 = vmatprep.subr.bf16.mxu1 %v7455_v1  ;;  %6561 = vmatprep.subr.bf16.mxu0 %v7457_v29  ;;  %v3443_v62 = vld [vmem:[#allocation10 + $0x1f0] sm:$0xff]  ;;  %v3444_v1 = vld [vmem:[#allocation10 + $0x1f8] sm:$0xff]  ;;  %v7502_v29 = vcombine.low %v3431_v54, %v3435_v55 }
 0x338   :  { %v7511_v5 = vcombine.high %v3439_v60, %v3443_v62  ;;  %v7513_v6 = vcombine.high %v3440_v63, %v3444_v1  ;;  %v7512_v13 = vcombine.low %v3440_v63, %v3444_v1  ;;  %v3495_v1 = vld [vmem:[#allocation10 + $0x390] sm:$0xff] }
 0x339   :  { %6225 = vmatmul.mubr.bf16.vlgmr.msra.gmra.mrb[24].mxu1 %v9282_v8  ;;  %6389 = vmatmul.mubr.bf16.vlgmr.msra.gmra.mrb[8].mxu0 %v9282_v8 }
 0x33a   :  { %6398 = vmatpush1.bf16.msra.mxu1 %v7454_v14  ;;  %6429 = vmatprep.mubr.bf16.mxu1 %v9213_v4  ;;  %v3451_v14 = vld [vmem:[#allocation10 + $0x230] sm:$0xff] }
 0x33b   :  { %6562 = vmatpush1.bf16.msra.mxu0 %v7456_v9  ;;  %6593 = vmatprep.mubr.bf16.mxu0 %v9213_v4  ;;  %v3416_v4 = vld [vmem:[#allocation10 + $0x118] sm:$0xff]  ;;  %v7519_v18 = vcombine.high %v3447_v7, %v3451_v14 }
 0x33c   :  { %6399 = vmatprep.subr.bf16.mxu1 %v7463_v38  ;;  %6563 = vmatprep.subr.bf16.mxu0 %v7465_v12  ;;  %v7489_v23 = vcombine.high %v3416_v4, %v3420_v39  ;;  %v7488_v48 = vcombine.low %v3416_v4, %v3420_v39  ;;  %v3448_v9 = vld [vmem:[#allocation10 + $0x218] sm:$0xff]  ;;  %v7510_v12 = vcombine.low %v3439_v60, %v3443_v62  ;;  %v3471_v39 = vld [vmem:[#allocation10 + $0x2d0] sm:$0xff] }
 0x33d   :  { %v3452_v38 = vld [vmem:[#allocation10 + $0x238] sm:$0xff] }
 0x33e   :  { %6400 = vmatpush1.bf16.msra.mxu1 %v7462_v17  ;;  %v7521_v15 = vcombine.high %v3448_v9, %v3452_v38  ;;  %v3459_v17 = vld [vmem:[#allocation10 + $0x270] sm:$0xff]  ;;  %v7520_v22 = vcombine.low %v3448_v9, %v3452_v38 }
 0x33f   :  { %6564 = vmatpush1.bf16.msra.mxu0 %v7464_v19  ;;  %6401 = vmatprep.subr.bf16.mxu1 %v7471_v21  ;;  %v3456_v19 = vld [vmem:[#allocation10 + $0x258] sm:$0xff]  ;;  %v7527_v24 = vcombine.high %v3455_v16, %v3459_v17  ;;  %v3503_v38 = vld [vmem:[#allocation10 + $0x3d0] sm:$0xff] }
 0x340   :  { %6565 = vmatprep.subr.bf16.mxu0 %v7473_v41  ;;  %v3460_v21 = vld [vmem:[#allocation10 + $0x278] sm:$0xff]  ;;  %v7518_v41 = vcombine.low %v3447_v7, %v3451_v14 }
 0x341   :  { %v7529_v25 = vcombine.high %v3456_v19, %v3460_v21  ;;  %v7528_v2 = vcombine.low %v3456_v19, %v3460_v21  ;;  %v3511_v21 = vld [vmem:[#allocation10 + $0x410] sm:$0xff] }
 0x342   :  { %6402 = vmatpush1.bf16.msra.mxu1 %v7470_v10  ;;  %v3467_v10 = vld [vmem:[#allocation10 + $0x2b0] sm:$0xff] }
 0x343   :  { %6566 = vmatpush1.bf16.msra.mxu0 %v7472_v31  ;;  %6403 = vmatprep.subr.bf16.mxu1 %v7479_v32  ;;  %v3464_v31 = vld [vmem:[#allocation10 + $0x298] sm:$0xff]  ;;  %v7535_v37 = vcombine.high %v3463_v27, %v3467_v10 }
 0x344   :  { %6567 = vmatprep.subr.bf16.mxu0 %v7481_v36  ;;  %v3468_v32 = vld [vmem:[#allocation10 + $0x2b8] sm:$0xff]  ;;  %v7526_v36 = vcombine.low %v3455_v16, %v3459_v17 }
 0x345   :  { %v7537_v4 = vcombine.high %v3464_v31, %v3468_v32  ;;  %v7536_v42 = vcombine.low %v3464_v31, %v3468_v32  ;;  %v3519_v32 = vld [vmem:[#allocation10 + $0x450] sm:$0xff] }
 0x346   :  { %6404 = vmatpush1.bf16.msra.mxu1 %v7478_v40  ;;  %v3475_v40 = vld [vmem:[#allocation10 + $0x2f0] sm:$0xff] }
 0x347   :  { %6568 = vmatpush1.bf16.msra.mxu0 %v7480_v46  ;;  %6405 = vmatprep.subr.bf16.mxu1 %v7487_v28  ;;  %v3472_v46 = vld [vmem:[#allocation10 + $0x2d8] sm:$0xff]  ;;  %v7543_v44 = vcombine.high %v3471_v39, %v3475_v40 }
 0x348   :  { %6569 = vmatprep.subr.bf16.mxu0 %v7489_v23  ;;  %v3476_v28 = vld [vmem:[#allocation10 + $0x2f8] sm:$0xff]  ;;  %v7534_v23 = vcombine.low %v3463_v27, %v3467_v10 }
 0x349   :  { %v7545_v30 = vcombine.high %v3472_v46, %v3476_v28  ;;  %v7544_v54 = vcombine.low %v3472_v46, %v3476_v28  ;;  %v3527_v46 = vld [vmem:[#allocation10 + $0x490] sm:$0xff] }
 0x34a   :  { %6406 = vmatpush1.bf16.msra.mxu1 %v7486_v47  ;;  %v3483_v47 = vld [vmem:[#allocation10 + $0x330] sm:$0xff] }
 0x34b   :  { %6570 = vmatpush1.bf16.msra.mxu0 %v7488_v48  ;;  %6407 = vmatprep.subr.bf16.mxu1 %v7495_v50  ;;  %v3480_v48 = vld [vmem:[#allocation10 + $0x318] sm:$0xff]  ;;  %v7551_v55 = vcombine.high %v3479_v45, %v3483_v47  ;;  %v3531_v28 = vld [vmem:[#allocation10 + $0x4b0] sm:$0xff] }
 0x34c   :  { %6571 = vmatprep.subr.bf16.mxu0 %v7497_v53  ;;  %v3484_v50 = vld [vmem:[#allocation10 + $0x338] sm:$0xff]  ;;  %v7542_v53 = vcombine.low %v3471_v39, %v3475_v40 }
 0x34d   :  { %v7553_v34 = vcombine.high %v3480_v48, %v3484_v50  ;;  %v7552_v60 = vcombine.low %v3480_v48, %v3484_v50  ;;  %v3535_v50 = vld [vmem:[#allocation10 + $0x4d0] sm:$0xff] }
 0x34e   :  { %6408 = vmatpush1.bf16.msra.mxu1 %v7494_v57  ;;  %v3491_v57 = vld [vmem:[#allocation10 + $0x370] sm:$0xff] }
 0x34f   :  { %6572 = vmatpush1.bf16.msra.mxu0 %v7496_v58  ;;  %6409 = vmatprep.subr.bf16.mxu1 %v7503_v59  ;;  %v3488_v58 = vld [vmem:[#allocation10 + $0x358] sm:$0xff]  ;;  %v7559_v62 = vcombine.high %v3487_v56, %v3491_v57 }
 0x350   :  { %6573 = vmatprep.subr.bf16.mxu0 %v7505_v52  ;;  %v3492_v59 = vld [vmem:[#allocation10 + $0x378] sm:$0xff]  ;;  %v7550_v52 = vcombine.low %v3479_v45, %v3483_v47  ;;  %v7599_v47 = vcombine.high %v3527_v46, %v3531_v28 }
 0x351   :  { %v7561_v63 = vcombine.high %v3488_v58, %v3492_v59  ;;  %v7560_v7 = vcombine.low %v3488_v58, %v3492_v59  ;;  %v3543_v58 = vld [vmem:[#allocation10 + $0x510] sm:$0xff] }
 0x352   :  { %6410 = vmatpush1.bf16.msra.mxu1 %v7502_v29  ;;  %v3499_v29 = vld [vmem:[#allocation10 + $0x3b0] sm:$0xff] }
 0x353   :  { %6574 = vmatpush1.bf16.msra.mxu0 %v7504_v3  ;;  %6411 = vmatprep.subr.bf16.mxu1 %v7511_v5  ;;  %v3496_v3 = vld [vmem:[#allocation10 + $0x398] sm:$0xff]  ;;  %v7567_v14 = vcombine.high %v3495_v1, %v3499_v29  ;;  %v3547_v59 = vld [vmem:[#allocation10 + $0x530] sm:$0xff] }
 0x354   :  { %6575 = vmatprep.subr.bf16.mxu0 %v7513_v6  ;;  %v3500_v5 = vld [vmem:[#allocation10 + $0x3b8] sm:$0xff]  ;;  %v7558_v6 = vcombine.low %v3487_v56, %v3491_v57 }
 0x355   :  { %v7569_v9 = vcombine.high %v3496_v3, %v3500_v5  ;;  %v7568_v16 = vcombine.low %v3496_v3, %v3500_v5  ;;  %v3555_v3 = vld [vmem:[#allocation10 + $0x570] sm:$0xff]  ;;  %v3552_v5 = vld [vmem:[#allocation10 + $0x558] sm:$0xff] }
 0x356   :  { %6412 = vmatpush1.bf16.msra.mxu1 %v7510_v12  ;;  %v3507_v12 = vld [vmem:[#allocation10 + $0x3f0] sm:$0xff] }
 0x357   :  { %6576 = vmatpush1.bf16.msra.mxu0 %v7512_v13  ;;  %6413 = vmatprep.subr.bf16.mxu1 %v7519_v18  ;;  %v3504_v13 = vld [vmem:[#allocation10 + $0x3d8] sm:$0xff]  ;;  %v7575_v17 = vcombine.high %v3503_v38, %v3507_v12 }
 0x358   :  { %6577 = vmatprep.subr.bf16.mxu0 %v7521_v15  ;;  %v3508_v18 = vld [vmem:[#allocation10 + $0x3f8] sm:$0xff]  ;;  %v7566_v15 = vcombine.low %v3495_v1, %v3499_v29  ;;  %v3551_v29 = vld [vmem:[#allocation10 + $0x550] sm:$0xff] }
 0x359   :  { %v7577_v19 = vcombine.high %v3504_v13, %v3508_v18  ;;  %v7576_v27 = vcombine.low %v3504_v13, %v3508_v18  ;;  %v3563_v13 = vld [vmem:[#allocation10 + $0x5b0] sm:$0xff]  ;;  %v3560_v18 = vld [vmem:[#allocation10 + $0x598] sm:$0xff] }
 0x35a   :  { %6414 = vmatpush1.bf16.msra.mxu1 %v7518_v41  ;;  %v3515_v41 = vld [vmem:[#allocation10 + $0x430] sm:$0xff] }
 0x35b   :  { %6578 = vmatpush1.bf16.msra.mxu0 %v7520_v22  ;;  %6415 = vmatprep.subr.bf16.mxu1 %v7527_v24  ;;  %v3512_v22 = vld [vmem:[#allocation10 + $0x418] sm:$0xff]  ;;  %v7583_v10 = vcombine.high %v3511_v21, %v3515_v41 }
 0x35c   :  { %6579 = vmatprep.subr.bf16.mxu0 %v7529_v25  ;;  %v3516_v24 = vld [vmem:[#allocation10 + $0x438] sm:$0xff]  ;;  %v7574_v25 = vcombine.low %v3503_v38, %v3507_v12  ;;  %v3559_v12 = vld [vmem:[#allocation10 + $0x590] sm:$0xff] }
 0x35d   :  { %v7585_v31 = vcombine.high %v3512_v22, %v3516_v24  ;;  %v7584_v39 = vcombine.low %v3512_v22, %v3516_v24  ;;  %v3571_v22 = vld [vmem:[#allocation10 + $0x5f0] sm:$0xff]  ;;  %v3568_v24 = vld [vmem:[#allocation10 + $0x5d8] sm:$0xff] }
 0x35e   :  { %6416 = vmatpush1.bf16.msra.mxu1 %v7526_v36  ;;  %v3523_v36 = vld [vmem:[#allocation10 + $0x470] sm:$0xff] }
 0x35f   :  { %6580 = vmatpush1.bf16.msra.mxu0 %v7528_v2  ;;  %6417 = vmatprep.subr.bf16.mxu1 %v7535_v37  ;;  %v7582_v2 = vcombine.low %v3511_v21, %v3515_v41  ;;  %v3520_v37 = vld [vmem:[#allocation10 + $0x458] sm:$0xff]  ;;  %v7591_v40 = vcombine.high %v3519_v32, %v3523_v36  ;;  %v3567_v41 = vld [vmem:[#allocation10 + $0x5d0] sm:$0xff] }
 0x360   :  { %6581 = vmatprep.subr.bf16.mxu0 %v7537_v4  ;;  %v3524_v4 = vld [vmem:[#allocation10 + $0x478] sm:$0xff] }
 0x361   :  { %v7592_v45 = vcombine.low %v3520_v37, %v3524_v4 }
 0x362   :  { %6418 = vmatpush1.bf16.msra.mxu1 %v7534_v23  ;;  %v7593_v23 = vcombine.high %v3520_v37, %v3524_v4  ;;  %v3576_v37 = vld [vmem:[#allocation10 + $0x618] sm:$0xff] }
 0x363   :  { %6582 = vmatpush1.bf16.msra.mxu0 %v7536_v42  ;;  %6419 = vmatprep.subr.bf16.mxu1 %v7543_v44  ;;  %v3528_v42 = vld [vmem:[#allocation10 + $0x498] sm:$0xff] }
 0x364   :  { %6583 = vmatprep.subr.bf16.mxu0 %v7545_v30  ;;  %v3532_v44 = vld [vmem:[#allocation10 + $0x4b8] sm:$0xff]  ;;  %v7590_v30 = vcombine.low %v3519_v32, %v3523_v36  ;;  %v3575_v36 = vld [vmem:[#allocation10 + $0x610] sm:$0xff] }
 0x365   :  { %v7601_v48 = vcombine.high %v3528_v42, %v3532_v44  ;;  %v3580_v4 = vld [vmem:[#allocation10 + $0x638] sm:$0xff] }
 0x366   :  { %6420 = vmatpush1.bf16.msra.mxu1 %v7542_v53  ;;  %v3539_v53 = vld [vmem:[#allocation10 + $0x4f0] sm:$0xff] }
 0x367   :  { %6584 = vmatpush1.bf16.msra.mxu0 %v7544_v54  ;;  %6421 = vmatprep.subr.bf16.mxu1 %v7551_v55  ;;  %v3536_v54 = vld [vmem:[#allocation10 + $0x4d8] sm:$0xff]  ;;  %v7607_v56 = vcombine.high %v3535_v50, %v3539_v53 }
 0x368   :  { %6585 = vmatprep.subr.bf16.mxu0 %v7553_v34  ;;  %v3540_v55 = vld [vmem:[#allocation10 + $0x4f8] sm:$0xff]  ;;  %v7598_v34 = vcombine.low %v3527_v46, %v3531_v28  ;;  %v7649_v28 = vcombine.high %v3576_v37, %v3580_v4 }
 0x369   :  { %v7609_v57 = vcombine.high %v3536_v54, %v3540_v55 }
 0x36a   :  { %6422 = vmatpush1.bf16.msra.mxu1 %v7550_v52  ;;  %v3544_v52 = vld [vmem:[#allocation10 + $0x518] sm:$0xff] }
 0x36b   :  { %6586 = vmatpush1.bf16.msra.mxu0 %v7552_v60  ;;  %6423 = vmatprep.subr.bf16.mxu1 %v7559_v62  ;;  %v3548_v60 = vld [vmem:[#allocation10 + $0x538] sm:$0xff]  ;;  %v7608_v62 = vcombine.low %v3536_v54, %v3540_v55  ;;  %v3595_v54 = vld [vmem:[#allocation10 + $0x6b0] sm:$0xff] }
 0x36c   :  { %6587 = vmatprep.subr.bf16.mxu0 %v7561_v63  ;;  %v7615_v63 = vcombine.high %v3543_v58, %v3547_v59  ;;  %v7617_v1 = vcombine.high %v3544_v52, %v3548_v60  ;;  %v3592_v55 = vld [vmem:[#allocation10 + $0x698] sm:$0xff] }
 0x36e   :  { %6424 = vmatpush1.bf16.msra.mxu1 %v7558_v6  ;;  %v3556_v6 = vld [vmem:[#allocation10 + $0x578] sm:$0xff] }
 0x36f   :  { %6588 = vmatpush1.bf16.msra.mxu0 %v7560_v7  ;;  %6425 = vmatprep.subr.bf16.mxu1 %v7567_v14  ;;  %v7614_v7 = vcombine.low %v3543_v58, %v3547_v59  ;;  %v7616_v14 = vcombine.low %v3544_v52, %v3548_v60  ;;  %v7625_v38 = vcombine.high %v3552_v5, %v3556_v6  ;;  %v3599_v59 = vld [vmem:[#allocation10 + $0x6d0] sm:$0xff]  ;;  %v3600_v60 = vld [vmem:[#allocation10 + $0x6d8] sm:$0xff] }
 0x370   :  { %6589 = vmatprep.subr.bf16.mxu0 %v7569_v9  ;;  %v7623_v9 = vcombine.high %v3551_v29, %v3555_v3  ;;  %v3603_v52 = vld [vmem:[#allocation10 + $0x6f0] sm:$0xff] }
 0x372   :  { %6426 = vmatpush1.bf16.msra.mxu1 %v7566_v15  ;;  %v3564_v15 = vld [vmem:[#allocation10 + $0x5b8] sm:$0xff] }
 0x373   :  { %6590 = vmatpush1.bf16.msra.mxu0 %v7568_v16  ;;  %6427 = vmatprep.subr.bf16.mxu1 %v7575_v17  ;;  %v7622_v16 = vcombine.low %v3551_v29, %v3555_v3  ;;  %v7624_v17 = vcombine.low %v3552_v5, %v3556_v6  ;;  %v7633_v21 = vcombine.high %v3560_v18, %v3564_v15  ;;  %v3607_v3 = vld [vmem:[#allocation10 + $0x710] sm:$0xff]  ;;  %v3608_v6 = vld [vmem:[#allocation10 + $0x718] sm:$0xff] }
 0x374   :  { %6591 = vmatprep.subr.bf16.mxu0 %v7577_v19  ;;  %v7631_v19 = vcombine.high %v3559_v12, %v3563_v13  ;;  %v3611_v5 = vld [vmem:[#allocation10 + $0x730] sm:$0xff] }
 0x376   :  { %6428 = vmatpush1.bf16.msra.mxu1 %v7574_v25  ;;  %v3572_v25 = vld [vmem:[#allocation10 + $0x5f8] sm:$0xff] }
 0x377   :  { %6592 = vmatpush1.bf16.msra.mxu0 %v7576_v27  ;;  %6438 = vmatprep.subr.bf16.mxu1 %v7583_v10  ;;  %v7630_v27 = vcombine.low %v3559_v12, %v3563_v13  ;;  %v7632_v10 = vcombine.low %v3560_v18, %v3564_v15  ;;  %v7641_v32 = vcombine.high %v3568_v24, %v3572_v25  ;;  %v3615_v13 = vld [vmem:[#allocation10 + $0x750] sm:$0xff]  ;;  %v3616_v15 = vld [vmem:[#allocation10 + $0x758] sm:$0xff] }
 0x378   :  { %6602 = vmatprep.subr.bf16.mxu0 %v7585_v31  ;;  %v7639_v31 = vcombine.high %v3567_v41, %v3571_v22  ;;  %v3619_v18 = vld [vmem:[#allocation10 + $0x770] sm:$0xff] }
 0x379   :  { %6430 = vmatmul.mubr.bf16.vlgmr.msra.gmra.mrb[28].mxu1 %v9223_v11 }
 0x37a   :  { %6594 = vmatmul.mubr.bf16.vlgmr.msra.gmra.mrb[12].mxu0 %v9223_v11  ;;  %6439 = vmatpush1.bf16.msra.mxu1 %v7582_v2  ;;  %v7600_v11 = vcombine.low %v3528_v42, %v3532_v44  ;;  %v3579_v2 = vld [vmem:[#allocation10 + $0x630] sm:$0xff]  ;;  %v3584_v44 = vld [vmem:[#allocation10 + $0x658] sm:$0xff] }
 0x37b   :  { %6470 = vmatprep.mubr.bf16.mxu1 %v9230_v33  ;;  %6603 = vmatpush1.bf16.msra.mxu0 %v7584_v39  ;;  %v7638_v39 = vcombine.low %v3567_v41, %v3571_v22  ;;  %v7647_v46 = vcombine.high %v3575_v36, %v3579_v2  ;;  %v3587_v42 = vld [vmem:[#allocation10 + $0x670] sm:$0xff] }
 0x37c   :  { %6634 = vmatprep.mubr.bf16.mxu0 %v9230_v33  ;;  %6440 = vmatprep.subr.bf16.mxu1 %v7591_v40  ;;  %v7606_v33 = vcombine.low %v3535_v50, %v3539_v53  ;;  %v7640_v40 = vcombine.low %v3568_v24, %v3572_v25  ;;  %v3591_v53 = vld [vmem:[#allocation10 + $0x690] sm:$0xff]  ;;  %v3624_v25 = vld [vmem:[#allocation10 + $0x798] sm:$0xff] }
 0x37d   :  { %6604 = vmatprep.subr.bf16.mxu0 %v7593_v23  ;;  %v3583_v23 = vld [vmem:[#allocation10 + $0x650] sm:$0xff] }
 0x37e   :  { %6441 = vmatpush1.bf16.msra.mxu1 %v7590_v30  ;;  %v3588_v30 = vld [vmem:[#allocation10 + $0x678] sm:$0xff]  ;;  %v3623_v22 = vld [vmem:[#allocation10 + $0x790] sm:$0xff] }
 0x37f   :  { %6605 = vmatpush1.bf16.msra.mxu0 %v7592_v45  ;;  %6442 = vmatprep.subr.bf16.mxu1 %v7599_v47  ;;  %v7646_v45 = vcombine.low %v3575_v36, %v3579_v2  ;;  %v7648_v47 = vcombine.low %v3576_v37, %v3580_v4  ;;  %v7657_v50 = vcombine.high %v3584_v44, %v3588_v30  ;;  %v3627_v24 = vld [vmem:[#allocation10 + $0x7b0] sm:$0xff]  ;;  %v3632_v4 = vld [vmem:[#allocation10 + $0x7d8] sm:$0xff] }
 0x380   :  { %6606 = vmatprep.subr.bf16.mxu0 %v7601_v48  ;;  %v7655_v48 = vcombine.high %v3583_v23, %v3587_v42  ;;  %v3631_v2 = vld [vmem:[#allocation10 + $0x7d0] sm:$0xff] }
 0x381   :  { %v3635_v37 = vld [vmem:[#allocation10 + $0x7f0] sm:$0xff] }
 0x382   :  { %6443 = vmatpush1.bf16.msra.mxu1 %v7598_v34  ;;  %v3596_v34 = vld [vmem:[#allocation10 + $0x6b8] sm:$0xff] }
 0x383   :  { %6607 = vmatpush1.bf16.msra.mxu0 %v7600_v11  ;;  %6444 = vmatprep.subr.bf16.mxu1 %v7607_v56  ;;  %v7654_v11 = vcombine.low %v3583_v23, %v3587_v42  ;;  %v7656_v56 = vcombine.low %v3584_v44, %v3588_v30  ;;  %v7665_v58 = vcombine.high %v3592_v55, %v3596_v34  ;;  %v3639_v42 = vld [vmem:[#allocation10 + $0x810] sm:$0xff]  ;;  %v3640_v30 = vld [vmem:[#allocation10 + $0x818] sm:$0xff] }
 0x384   :  { %6608 = vmatprep.subr.bf16.mxu0 %v7609_v57  ;;  %v7663_v57 = vcombine.high %v3591_v53, %v3595_v54  ;;  %v3643_v44 = vld [vmem:[#allocation10 + $0x830] sm:$0xff] }
 0x386   :  { %6445 = vmatpush1.bf16.msra.mxu1 %v7606_v33  ;;  %v3604_v33 = vld [vmem:[#allocation10 + $0x6f8] sm:$0xff] }
 0x387   :  { %6609 = vmatpush1.bf16.msra.mxu0 %v7608_v62  ;;  %6446 = vmatprep.subr.bf16.mxu1 %v7615_v63  ;;  %v7662_v62 = vcombine.low %v3591_v53, %v3595_v54  ;;  %v7664_v63 = vcombine.low %v3592_v55, %v3596_v34  ;;  %v7673_v29 = vcombine.high %v3600_v60, %v3604_v33  ;;  %v3647_v54 = vld [vmem:[#allocation10 + $0x850] sm:$0xff] }
 0x388   :  { %6610 = vmatprep.subr.bf16.mxu0 %v7617_v1  ;;  %v7671_v1 = vcombine.high %v3599_v59, %v3603_v52  ;;  %v3651_v55 = vld [vmem:[#allocation10 + $0x870] sm:$0xff]  ;;  %v7710_v34 = vcombine.low %v3639_v42, %v3643_v44 }
 0x38a   :  { %6447 = vmatpush1.bf16.msra.mxu1 %v7614_v7  ;;  %v3612_v7 = vld [vmem:[#allocation10 + $0x738] sm:$0xff] }
 0x38b   :  { %6611 = vmatpush1.bf16.msra.mxu0 %v7616_v14  ;;  %6448 = vmatprep.subr.bf16.mxu1 %v7623_v9  ;;  %v7670_v14 = vcombine.low %v3599_v59, %v3603_v52  ;;  %v7672_v9 = vcombine.low %v3600_v60, %v3604_v33  ;;  %v7681_v12 = vcombine.high %v3608_v6, %v3612_v7  ;;  %v3655_v59 = vld [vmem:[#allocation10 + $0x890] sm:$0xff]  ;;  %v3656_v33 = vld [vmem:[#allocation10 + $0x898] sm:$0xff] }
 0x38c   :  { %6612 = vmatprep.subr.bf16.mxu0 %v7625_v38  ;;  %v7679_v38 = vcombine.high %v3607_v3, %v3611_v5  ;;  %v3659_v52 = vld [vmem:[#allocation10 + $0x8b0] sm:$0xff] }
 0x38e   :  { %6449 = vmatpush1.bf16.msra.mxu1 %v7622_v16  ;;  %v3620_v16 = vld [vmem:[#allocation10 + $0x778] sm:$0xff] }
 0x38f   :  { %6613 = vmatpush1.bf16.msra.mxu0 %v7624_v17  ;;  %6450 = vmatprep.subr.bf16.mxu1 %v7631_v19  ;;  %v7678_v17 = vcombine.low %v3607_v3, %v3611_v5  ;;  %v7680_v19 = vcombine.low %v3608_v6, %v3612_v7  ;;  %v7689_v41 = vcombine.high %v3616_v15, %v3620_v16  ;;  %v3663_v5 = vld [vmem:[#allocation10 + $0x8d0] sm:$0xff]  ;;  %v3664_v7 = vld [vmem:[#allocation10 + $0x8d8] sm:$0xff] }
 0x390   :  { %6614 = vmatprep.subr.bf16.mxu0 %v7633_v21  ;;  %v7687_v21 = vcombine.high %v3615_v13, %v3619_v18  ;;  %v3667_v6 = vld [vmem:[#allocation10 + $0x8f0] sm:$0xff] }
 0x392   :  { %6451 = vmatpush1.bf16.msra.mxu1 %v7630_v27  ;;  %v3628_v27 = vld [vmem:[#allocation10 + $0x7b8] sm:$0xff] }
 0x393   :  { %6615 = vmatpush1.bf16.msra.mxu0 %v7632_v10  ;;  %6452 = vmatprep.subr.bf16.mxu1 %v7639_v31  ;;  %v7686_v10 = vcombine.low %v3615_v13, %v3619_v18  ;;  %v7688_v31 = vcombine.low %v3616_v15, %v3620_v16  ;;  %v7697_v36 = vcombine.high %v3624_v25, %v3628_v27  ;;  %v3671_v13 = vld [vmem:[#allocation10 + $0x910] sm:$0xff]  ;;  %v3672_v15 = vld [vmem:[#allocation10 + $0x918] sm:$0xff] }
 0x394   :  { %6616 = vmatprep.subr.bf16.mxu0 %v7641_v32  ;;  %v7695_v32 = vcombine.high %v3623_v22, %v3627_v24  ;;  %v3675_v18 = vld [vmem:[#allocation10 + $0x930] sm:$0xff]  ;;  %v3676_v16 = vld [vmem:[#allocation10 + $0x938] sm:$0xff] }
 0x396   :  { %6453 = vmatpush1.bf16.msra.mxu1 %v7638_v39  ;;  %v3636_v39 = vld [vmem:[#allocation10 + $0x7f8] sm:$0xff] }
 0x397   :  { %6617 = vmatpush1.bf16.msra.mxu0 %v7640_v40  ;;  %6454 = vmatprep.subr.bf16.mxu1 %v7647_v46  ;;  %v7694_v40 = vcombine.low %v3623_v22, %v3627_v24  ;;  %v7696_v46 = vcombine.low %v3624_v25, %v3628_v27  ;;  %v7705_v23 = vcombine.high %v3632_v4, %v3636_v39  ;;  %v3683_v22 = vld [vmem:[#allocation10 + $0x970] sm:$0xff]  ;;  %v3680_v24 = vld [vmem:[#allocation10 + $0x958] sm:$0xff] }
 0x398   :  { %6618 = vmatprep.subr.bf16.mxu0 %v7649_v28  ;;  %v7703_v28 = vcombine.high %v3631_v2, %v3635_v37  ;;  %v3684_v25 = vld [vmem:[#allocation10 + $0x978] sm:$0xff]  ;;  %v7742_v27 = vcombine.low %v3671_v13, %v3675_v18 }
 0x39a   :  { %6455 = vmatpush1.bf16.msra.mxu1 %v7646_v45  ;;  %v3644_v45 = vld [vmem:[#allocation10 + $0x838] sm:$0xff] }
 0x39b   :  { %6619 = vmatpush1.bf16.msra.mxu0 %v7648_v47  ;;  %6456 = vmatprep.subr.bf16.mxu1 %v7655_v48  ;;  %v7702_v47 = vcombine.low %v3631_v2, %v3635_v37  ;;  %v7704_v48 = vcombine.low %v3632_v4, %v3636_v39  ;;  %v7713_v53 = vcombine.high %v3640_v30, %v3644_v45  ;;  %v3691_v2 = vld [vmem:[#allocation10 + $0x9b0] sm:$0xff]  ;;  %v3688_v37 = vld [vmem:[#allocation10 + $0x998] sm:$0xff] }
 0x39c   :  { %6620 = vmatprep.subr.bf16.mxu0 %v7657_v50  ;;  %v7711_v50 = vcombine.high %v3639_v42, %v3643_v44  ;;  %v3692_v4 = vld [vmem:[#allocation10 + $0x9b8] sm:$0xff]  ;;  %v3699_v42 = vld [vmem:[#allocation10 + $0x9f0] sm:$0xff] }
 0x39d   :  { %v3696_v44 = vld [vmem:[#allocation10 + $0x9d8] sm:$0xff] }
 0x39e   :  { %6457 = vmatpush1.bf16.msra.mxu1 %v7654_v11  ;;  %v3648_v11 = vld [vmem:[#allocation10 + $0x858] sm:$0xff] }
 0x39f   :  { %6621 = vmatpush1.bf16.msra.mxu0 %v7656_v56  ;;  %6458 = vmatprep.subr.bf16.mxu1 %v7663_v57  ;;  %v3652_v56 = vld [vmem:[#allocation10 + $0x878] sm:$0xff]  ;;  %v7712_v57 = vcombine.low %v3640_v30, %v3644_v45 }
 0x3a0   :  { %6622 = vmatprep.subr.bf16.mxu0 %v7665_v58  ;;  %v7719_v58 = vcombine.high %v3647_v54, %v3651_v55  ;;  %v7721_v60 = vcombine.high %v3648_v11, %v3652_v56  ;;  %v3700_v30 = vld [vmem:[#allocation10 + $0x9f8] sm:$0xff] }
 0x3a2   :  { %6459 = vmatpush1.bf16.msra.mxu1 %v7662_v62  ;;  %v3660_v62 = vld [vmem:[#allocation10 + $0x8b8] sm:$0xff] }
 0x3a3   :  { %6623 = vmatpush1.bf16.msra.mxu0 %v7664_v63  ;;  %6460 = vmatprep.subr.bf16.mxu1 %v7671_v1  ;;  %v7718_v63 = vcombine.low %v3647_v54, %v3651_v55  ;;  %v7720_v1 = vcombine.low %v3648_v11, %v3652_v56  ;;  %v7729_v3 = vcombine.high %v3656_v33, %v3660_v62  ;;  %v3707_v54 = vld [vmem:[#allocation10 + $0xa30] sm:$0xff]  ;;  %v3704_v55 = vld [vmem:[#allocation10 + $0xa18] sm:$0xff] }
 0x3a4   :  { %6624 = vmatprep.subr.bf16.mxu0 %v7673_v29  ;;  %v7727_v29 = vcombine.high %v3655_v59, %v3659_v52  ;;  %v7768_v56 = vcombine.low %v3696_v44, %v3700_v30 }
 0x3a6   :  { %6461 = vmatpush1.bf16.msra.mxu1 %v7670_v14  ;;  %v3668_v14 = vld [vmem:[#allocation10 + $0x8f8] sm:$0xff] }
 0x3a7   :  { %6625 = vmatpush1.bf16.msra.mxu0 %v7672_v9  ;;  %6462 = vmatprep.subr.bf16.mxu1 %v7679_v38  ;;  %v7726_v9 = vcombine.low %v3655_v59, %v3659_v52  ;;  %v7735_v38 = vcombine.high %v3663_v5, %v3667_v6  ;;  %v3711_v59 = vld [vmem:[#allocation10 + $0xa50] sm:$0xff] }
 0x3a8   :  { %6626 = vmatprep.subr.bf16.mxu0 %v7681_v12  ;;  %v7737_v12 = vcombine.high %v3664_v7, %v3668_v14  ;;  %v3715_v52 = vld [vmem:[#allocation10 + $0xa70] sm:$0xff] }
 0x3aa   :  { %6463 = vmatpush1.bf16.msra.mxu1 %v7678_v17  ;;  %v7736_v17 = vcombine.low %v3664_v7, %v3668_v14  ;;  %v3724_v7 = vld [vmem:[#allocation10 + $0xab8] sm:$0xff]  ;;  %v7782_v14 = vcombine.low %v3711_v59, %v3715_v52 }
 0x3ab   :  { %6627 = vmatpush1.bf16.msra.mxu0 %v7680_v19  ;;  %6464 = vmatprep.subr.bf16.mxu1 %v7687_v21  ;;  %v7743_v19 = vcombine.high %v3671_v13, %v3675_v18  ;;  %v7745_v21 = vcombine.high %v3672_v15, %v3676_v16  ;;  %v3731_v13 = vld [vmem:[#allocation10 + $0xaf0] sm:$0xff]  ;;  %v3728_v18 = vld [vmem:[#allocation10 + $0xad8] sm:$0xff] }
 0x3ac   :  { %6628 = vmatprep.subr.bf16.mxu0 %v7689_v41  ;;  %v3679_v41 = vld [vmem:[#allocation10 + $0x950] sm:$0xff] }
 0x3ad   :  { %v7750_v39 = vcombine.low %v3679_v41, %v3683_v22 }
 0x3ae   :  { %6465 = vmatpush1.bf16.msra.mxu1 %v7686_v10  ;;  %v7744_v10 = vcombine.low %v3672_v15, %v3676_v16  ;;  %v3732_v15 = vld [vmem:[#allocation10 + $0xaf8] sm:$0xff] }
 0x3af   :  { %6629 = vmatpush1.bf16.msra.mxu0 %v7688_v31  ;;  %6466 = vmatprep.subr.bf16.mxu1 %v7695_v32  ;;  %v7751_v31 = vcombine.high %v3679_v41, %v3683_v22  ;;  %v7753_v32 = vcombine.high %v3680_v24, %v3684_v25  ;;  %v3739_v41 = vld [vmem:[#allocation10 + $0xb30] sm:$0xff]  ;;  %v3736_v22 = vld [vmem:[#allocation10 + $0xb18] sm:$0xff] }
 0x3b0   :  { %6630 = vmatprep.subr.bf16.mxu0 %v7697_v36  ;;  %v3687_v36 = vld [vmem:[#allocation10 + $0x990] sm:$0xff] }
 0x3b1   :  { %v7758_v45 = vcombine.low %v3687_v36, %v3691_v2 }
 0x3b2   :  { %6467 = vmatpush1.bf16.msra.mxu1 %v7694_v40  ;;  %v7752_v40 = vcombine.low %v3680_v24, %v3684_v25  ;;  %v3740_v24 = vld [vmem:[#allocation10 + $0xb38] sm:$0xff] }
 0x3b3   :  { %6631 = vmatpush1.bf16.msra.mxu0 %v7696_v46  ;;  %6468 = vmatprep.subr.bf16.mxu1 %v7703_v28  ;;  %v7759_v46 = vcombine.high %v3687_v36, %v3691_v2  ;;  %v7761_v28 = vcombine.high %v3688_v37, %v3692_v4  ;;  %v3747_v36 = vld [vmem:[#allocation10 + $0xb70] sm:$0xff]  ;;  %v3744_v2 = vld [vmem:[#allocation10 + $0xb58] sm:$0xff] }
 0x3b4   :  { %6632 = vmatprep.subr.bf16.mxu0 %v7705_v23  ;;  %v3695_v23 = vld [vmem:[#allocation10 + $0x9d0] sm:$0xff] }
 0x3b5   :  { %v7766_v11 = vcombine.low %v3695_v23, %v3699_v42 }
 0x3b6   :  { %6469 = vmatpush1.bf16.msra.mxu1 %v7702_v47  ;;  %v7760_v47 = vcombine.low %v3688_v37, %v3692_v4  ;;  %v3748_v37 = vld [vmem:[#allocation10 + $0xb78] sm:$0xff] }
 0x3b7   :  { %6633 = vmatpush1.bf16.msra.mxu0 %v7704_v48  ;;  %6479 = vmatprep.subr.bf16.mxu1 %v7711_v50  ;;  %v7767_v48 = vcombine.high %v3695_v23, %v3699_v42  ;;  %v7769_v50 = vcombine.high %v3696_v44, %v3700_v30  ;;  %v3755_v23 = vld [vmem:[#allocation10 + $0xbb0] sm:$0xff]  ;;  %v3752_v42 = vld [vmem:[#allocation10 + $0xb98] sm:$0xff] }
 0x3b8   :  { %6643 = vmatprep.subr.bf16.mxu0 %v7713_v53  ;;  %v3703_v53 = vld [vmem:[#allocation10 + $0xa10] sm:$0xff]  ;;  %v3756_v44 = vld [vmem:[#allocation10 + $0xbb8] sm:$0xff] }
 0x3b9   :  { %6471 = vmatmul.mubr.bf16.vlgmr.msra.gmra.mrb[28].mxu1 %v9241_v61 }
 0x3ba   :  { %6635 = vmatmul.mubr.bf16.vlgmr.msra.gmra.mrb[12].mxu0 %v9241_v61  ;;  %6480 = vmatpush1.bf16.msra.mxu1 %v7710_v34  ;;  %v7728_v61 = vcombine.low %v3656_v33, %v3660_v62  ;;  %v3708_v34 = vld [vmem:[#allocation10 + $0xa38] sm:$0xff]  ;;  %v7774_v62 = vcombine.low %v3703_v53, %v3707_v54 }
 0x3bb   :  { %6511 = vmatprep.mubr.bf16.mxu1 %v9265_v49  ;;  %6644 = vmatpush1.bf16.msra.mxu0 %v7712_v57  ;;  %v7775_v57 = vcombine.high %v3703_v53, %v3707_v54  ;;  %v3716_v33 = vld [vmem:[#allocation10 + $0xa78] sm:$0xff]  ;;  %v3763_v53 = vld [vmem:[#allocation10 + $0xbf0] sm:$0xff] }
 0x3bc   :  { %6675 = vmatprep.mubr.bf16.mxu0 %v9265_v49  ;;  %6481 = vmatprep.subr.bf16.mxu1 %v7719_v58  ;;  %v7734_v49 = vcombine.low %v3663_v5, %v3667_v6  ;;  %v7777_v58 = vcombine.high %v3704_v55, %v3708_v34  ;;  %v3723_v5 = vld [vmem:[#allocation10 + $0xab0] sm:$0xff]  ;;  %v3720_v6 = vld [vmem:[#allocation10 + $0xa98] sm:$0xff] }
 0x3bd   :  { %6645 = vmatprep.subr.bf16.mxu0 %v7721_v60  ;;  %v3712_v60 = vld [vmem:[#allocation10 + $0xa58] sm:$0xff] }
 0x3be   :  { %6482 = vmatpush1.bf16.msra.mxu1 %v7718_v63  ;;  %v7776_v63 = vcombine.low %v3704_v55, %v3708_v34  ;;  %v3760_v54 = vld [vmem:[#allocation10 + $0xbd8] sm:$0xff] }
 0x3bf   :  { %6646 = vmatpush1.bf16.msra.mxu0 %v7720_v1  ;;  %6483 = vmatprep.subr.bf16.mxu1 %v7727_v29  ;;  %v7783_v1 = vcombine.high %v3711_v59, %v3715_v52  ;;  %v7785_v29 = vcombine.high %v3712_v60, %v3716_v33  ;;  %v3764_v55 = vld [vmem:[#allocation10 + $0xbf8] sm:$0xff]  ;;  %v3771_v59 = vld [vmem:[#allocation10 + $0xc30] sm:$0xff] }
 0x3c0   :  { %6647 = vmatprep.subr.bf16.mxu0 %v7729_v3  ;;  %v3719_v3 = vld [vmem:[#allocation10 + $0xa90] sm:$0xff]  ;;  %v3768_v52 = vld [vmem:[#allocation10 + $0xc18] sm:$0xff] }
 0x3c1   :  { %v7790_v16 = vcombine.low %v3719_v3, %v3723_v5 }
 0x3c2   :  { %6484 = vmatpush1.bf16.msra.mxu1 %v7726_v9  ;;  %v7784_v9 = vcombine.low %v3712_v60, %v3716_v33  ;;  %v3772_v60 = vld [vmem:[#allocation10 + $0xc38] sm:$0xff] }
 0x3c3   :  { %6648 = vmatpush1.bf16.msra.mxu0 %v7728_v61  ;;  %6485 = vmatprep.subr.bf16.mxu1 %v7735_v38  ;;  %v7791_v61 = vcombine.high %v3719_v3, %v3723_v5  ;;  %v7793_v38 = vcombine.high %v3720_v6, %v3724_v7  ;;  %v3779_v3 = vld [vmem:[#allocation10 + $0xc70] sm:$0xff]  ;;  %v3776_v5 = vld [vmem:[#allocation10 + $0xc58] sm:$0xff] }
 0x3c4   :  { %6649 = vmatprep.subr.bf16.mxu0 %v7737_v12  ;;  %v3727_v12 = vld [vmem:[#allocation10 + $0xad0] sm:$0xff] }
 0x3c5   :  { %v7798_v25 = vcombine.low %v3727_v12, %v3731_v13 }
 0x3c6   :  { %6486 = vmatpush1.bf16.msra.mxu1 %v7734_v49  ;;  %v7792_v49 = vcombine.low %v3720_v6, %v3724_v7  ;;  %v3780_v6 = vld [vmem:[#allocation10 + $0xc78] sm:$0xff] }
 0x3c7   :  { %6650 = vmatpush1.bf16.msra.mxu0 %v7736_v17  ;;  %6487 = vmatprep.subr.bf16.mxu1 %v7743_v19  ;;  %v7799_v17 = vcombine.high %v3727_v12, %v3731_v13  ;;  %v7801_v19 = vcombine.high %v3728_v18, %v3732_v15  ;;  %v3787_v12 = vld [vmem:[#allocation10 + $0xcb0] sm:$0xff]  ;;  %v3784_v13 = vld [vmem:[#allocation10 + $0xc98] sm:$0xff] }
 0x3c8   :  { %6651 = vmatprep.subr.bf16.mxu0 %v7745_v21  ;;  %v3735_v21 = vld [vmem:[#allocation10 + $0xb10] sm:$0xff] }
 0x3c9   :  { %v7806_v4 = vcombine.low %v3735_v21, %v3739_v41 }
 0x3ca   :  { %6488 = vmatpush1.bf16.msra.mxu1 %v7742_v27  ;;  %v7800_v27 = vcombine.low %v3728_v18, %v3732_v15  ;;  %v3788_v18 = vld [vmem:[#allocation10 + $0xcb8] sm:$0xff] }
 0x3cb   :  { %6652 = vmatpush1.bf16.msra.mxu0 %v7744_v10  ;;  %6489 = vmatprep.subr.bf16.mxu1 %v7751_v31  ;;  %v7807_v10 = vcombine.high %v3735_v21, %v3739_v41  ;;  %v7809_v31 = vcombine.high %v3736_v22, %v3740_v24  ;;  %v3795_v21 = vld [vmem:[#allocation10 + $0xcf0] sm:$0xff]  ;;  %v3792_v41 = vld [vmem:[#allocation10 + $0xcd8] sm:$0xff] }
 0x3cc   :  { %6653 = vmatprep.subr.bf16.mxu0 %v7753_v32  ;;  %v3743_v32 = vld [vmem:[#allocation10 + $0xb50] sm:$0xff] }
 0x3cd   :  { %v7814_v30 = vcombine.low %v3743_v32, %v3747_v36 }
 0x3ce   :  { %6490 = vmatpush1.bf16.msra.mxu1 %v7750_v39  ;;  %v7808_v39 = vcombine.low %v3736_v22, %v3740_v24  ;;  %v3796_v22 = vld [vmem:[#allocation10 + $0xcf8] sm:$0xff] }
 0x3cf   :  { %6654 = vmatpush1.bf16.msra.mxu0 %v7752_v40  ;;  %6491 = vmatprep.subr.bf16.mxu1 %v7759_v46  ;;  %v7815_v40 = vcombine.high %v3743_v32, %v3747_v36  ;;  %v7817_v46 = vcombine.high %v3744_v2, %v3748_v37  ;;  %v3800_v32 = vld [vmem:[#allocation10 + $0xd18] sm:$0xff] }
 0x3d0   :  { %6655 = vmatprep.subr.bf16.mxu0 %v7761_v28  ;;  %v3751_v28 = vld [vmem:[#allocation10 + $0xb90] sm:$0xff]  ;;  %v3804_v36 = vld [vmem:[#allocation10 + $0xd38] sm:$0xff] }
 0x3d1   :  { %v7822_v34 = vcombine.low %v3751_v28, %v3755_v23 }
 0x3d2   :  { %6492 = vmatpush1.bf16.msra.mxu1 %v7758_v45  ;;  %v7816_v45 = vcombine.low %v3744_v2, %v3748_v37  ;;  %v7864_v37 = vcombine.low %v3792_v41, %v3796_v22 }
 0x3d3   :  { %6656 = vmatpush1.bf16.msra.mxu0 %v7760_v47  ;;  %6493 = vmatprep.subr.bf16.mxu1 %v7767_v48  ;;  %v7823_v47 = vcombine.high %v3751_v28, %v3755_v23  ;;  %v7825_v48 = vcombine.high %v3752_v42, %v3756_v44  ;;  %v3812_v28 = vld [vmem:[#allocation10 + $0xd78] sm:$0xff] }
 0x3d4   :  { %6657 = vmatprep.subr.bf16.mxu0 %v7769_v50  ;;  %v3759_v50 = vld [vmem:[#allocation10 + $0xbd0] sm:$0xff] }
 0x3d5   :  { %v7830_v33 = vcombine.low %v3759_v50, %v3763_v53 }
 0x3d6   :  { %6494 = vmatpush1.bf16.msra.mxu1 %v7766_v11  ;;  %v7824_v11 = vcombine.low %v3752_v42, %v3756_v44  ;;  %v7872_v42 = vcombine.low %v3800_v32, %v3804_v36 }
 0x3d7   :  { %6658 = vmatpush1.bf16.msra.mxu0 %v7768_v56  ;;  %6495 = vmatprep.subr.bf16.mxu1 %v7775_v57  ;;  %v7831_v56 = vcombine.high %v3759_v50, %v3763_v53  ;;  %v7833_v57 = vcombine.high %v3760_v54, %v3764_v55  ;;  %v3820_v50 = vld [vmem:[#allocation10 + $0xdb8] sm:$0xff] }
 0x3d8   :  { %6659 = vmatprep.subr.bf16.mxu0 %v7777_v58  ;;  %v3767_v58 = vld [vmem:[#allocation10 + $0xc10] sm:$0xff] }
 0x3d9   :  { %v7838_v7 = vcombine.low %v3767_v58, %v3771_v59 }
 0x3da   :  { %6496 = vmatpush1.bf16.msra.mxu1 %v7774_v62  ;;  %v7832_v62 = vcombine.low %v3760_v54, %v3764_v55 }
 0x3db   :  { %6660 = vmatpush1.bf16.msra.mxu0 %v7776_v63  ;;  %6497 = vmatprep.subr.bf16.mxu1 %v7783_v1  ;;  %v7839_v63 = vcombine.high %v3767_v58, %v3771_v59  ;;  %v7841_v1 = vcombine.high %v3768_v52, %v3772_v60  ;;  %v3827_v58 = vld [vmem:[#allocation10 + $0xdf0] sm:$0xff] }
 0x3dc   :  { %6661 = vmatprep.subr.bf16.mxu0 %v7785_v29  ;;  %v3775_v29 = vld [vmem:[#allocation10 + $0xc50] sm:$0xff] }
 0x3dd   :  { %v7846_v15 = vcombine.low %v3775_v29, %v3779_v3 }
 0x3de   :  { %6498 = vmatpush1.bf16.msra.mxu1 %v7782_v14  ;;  %v7840_v14 = vcombine.low %v3768_v52, %v3772_v60 }
 0x3df   :  { %6662 = vmatpush1.bf16.msra.mxu0 %v7784_v9  ;;  %6499 = vmatprep.subr.bf16.mxu1 %v7791_v61  ;;  %v7847_v9 = vcombine.high %v3775_v29, %v3779_v3  ;;  %v7849_v61 = vcombine.high %v3776_v5, %v3780_v6 }
 0x3e0   :  { %6663 = vmatprep.subr.bf16.mxu0 %v7793_v38  ;;  %v3783_v38 = vld [vmem:[#allocation10 + $0xc90] sm:$0xff] }
 0x3e1   :  { %v7854_v24 = vcombine.low %v3783_v38, %v3787_v12 }
 0x3e2   :  { %6500 = vmatpush1.bf16.msra.mxu1 %v7790_v16  ;;  %v7848_v16 = vcombine.low %v3776_v5, %v3780_v6 }
 0x3e3   :  { %6664 = vmatpush1.bf16.msra.mxu0 %v7792_v49  ;;  %6501 = vmatprep.subr.bf16.mxu1 %v7799_v17  ;;  %v7855_v49 = vcombine.high %v3783_v38, %v3787_v12  ;;  %v7857_v17 = vcombine.high %v3784_v13, %v3788_v18  ;;  %v8714_v12 = vld [vmem:[%s9412_s7 + $0x40] sm:$0xff]  }
 0x3e4   :  { %6665 = vmatprep.subr.bf16.mxu0 %v7801_v19  ;;  %v3791_v19 = vld [vmem:[#allocation10 + $0xcd0] sm:$0xff] }
 0x3e5   :  { %v7862_v2 = vcombine.low %v3791_v19, %v3795_v21 }
 0x3e6   :  { %6502 = vmatpush1.bf16.msra.mxu1 %v7798_v25  ;;  %v7863_v25 = vcombine.high %v3791_v19, %v3795_v21  ;;  %v8722_v19 = vld [vmem:[%s9412_s7 + $0x60] sm:$0xff]  }
 0x3e7   :  { %6666 = vmatpush1.bf16.msra.mxu0 %v7800_v27  ;;  %6503 = vmatprep.subr.bf16.mxu1 %v7807_v10  ;;  %v7865_v27 = vcombine.high %v3792_v41, %v3796_v22  ;;  %v3799_v10 = vld [vmem:[#allocation10 + $0xd10] sm:$0xff]  ;;  %v8724_v41 = vld [vmem:[%s9412_s7 + $0x68] sm:$0xff]  }
 0x3e8   :  { %6667 = vmatprep.subr.bf16.mxu0 %v7809_v31  ;;  %v3803_v31 = vld [vmem:[#allocation10 + $0xd30] sm:$0xff]  ;;  %v8725_v22 = vld [vmem:[%s9412_s7 + $0x28] sm:$0xff]  }
 0x3e9   :  { %v7870_v23 = vcombine.low %v3799_v10, %v3803_v31  ;;  %v8723_v21 = vld [vmem:[%s9412_s7 + $0x20] sm:$0xff]  }
 0x3ea   :  { %6504 = vmatpush1.bf16.msra.mxu1 %v7806_v4  ;;  %v7871_v4 = vcombine.high %v3799_v10, %v3803_v31  ;;  %v6731_v10 = vld [vmem:[#allocation11] sm:$0x3] }
 0x3eb   :  { %6668 = vmatpush1.bf16.msra.mxu0 %v7808_v39  ;;  %6505 = vmatprep.subr.bf16.mxu1 %v7815_v40  ;;  %v3807_v39 = vld [vmem:[#allocation10 + $0xd50] sm:$0xff] }
 0x3ec   :  { %6669 = vmatprep.subr.bf16.mxu0 %v7817_v46  ;;  %v3811_v40 = vld [vmem:[#allocation10 + $0xd70] sm:$0xff]  ;;  %v3808_v46 = vld [vmem:[#allocation10 + $0xd58] sm:$0xff] }
 0x3ed   :  { %v7879_v44 = vcombine.high %v3807_v39, %v3811_v40  ;;  %v7878_v53 = vcombine.low %v3807_v39, %v3811_v40  ;;  %v7880_v54 = vcombine.low %v3808_v46, %v3812_v28  ;;  %v6740_v40 = vrot.slane %v6731_v10, %v3331_v43 }
 0x3ee   :  { %6506 = vmatpush1.bf16.msra.mxu1 %v7814_v30  ;;  %v7881_v30 = vcombine.high %v3808_v46, %v3812_v28 }
 0x3ef   :  { %6670 = vmatpush1.bf16.msra.mxu0 %v7816_v45  ;;  %6507 = vmatprep.subr.bf16.mxu1 %v7823_v47  ;;  %v3815_v45 = vld [vmem:[#allocation10 + $0xd90] sm:$0xff] }
 0x3f0   :  { %6671 = vmatprep.subr.bf16.mxu0 %v7825_v48  ;;  %v3819_v47 = vld [vmem:[#allocation10 + $0xdb0] sm:$0xff]  ;;  %v3816_v48 = vld [vmem:[#allocation10 + $0xd98] sm:$0xff] }
 0x3f1   :  { %v7887_v55 = vcombine.high %v3815_v45, %v3819_v47  ;;  %v7886_v3 = vcombine.low %v3815_v45, %v3819_v47 }
 0x3f2   :  { %6508 = vmatpush1.bf16.msra.mxu1 %v7822_v34 }
 0x3f3   :  { %6672 = vmatpush1.bf16.msra.mxu0 %v7824_v11  ;;  %6509 = vmatprep.subr.bf16.mxu1 %v7831_v56  ;;  %v7889_v56 = vcombine.high %v3816_v48, %v3820_v50 }
 0x3f4   :  { %6673 = vmatprep.subr.bf16.mxu0 %v7833_v57  ;;  %v3823_v57 = vld [vmem:[#allocation10 + $0xdd0] sm:$0xff] }
 0x3f6   :  { %6510 = vmatpush1.bf16.msra.mxu1 %v7830_v33  ;;  %v3824_v33 = vld [vmem:[#allocation10 + $0xdd8] sm:$0xff] }
 0x3f7   :  { %6674 = vmatpush1.bf16.msra.mxu0 %v7832_v62  ;;  %6520 = vmatprep.subr.bf16.mxu1 %v7839_v63  ;;  %v3828_v62 = vld [vmem:[#allocation10 + $0xdf8] sm:$0xff] }
 0x3f8   :  { %6684 = vmatprep.subr.bf16.mxu0 %v7841_v1  ;;  %v7896_v38 = vcombine.low %v3824_v33, %v3828_v62 }
 0x3f9   :  { %6512 = vmatmul.mubr.bf16.vlgmr.msra.gmra.mrb[28].mxu1 %v9267_v51 }
 0x3fa   :  { %6676 = vmatmul.mubr.bf16.vlgmr.msra.gmra.mrb[12].mxu0 %v9267_v51  ;;  %6521 = vmatpush1.bf16.msra.mxu1 %v7838_v7  ;;  %v7856_v51 = vcombine.low %v3784_v13, %v3788_v18  ;;  %v7888_v7 = vcombine.low %v3816_v48, %v3820_v50  ;;  %v8715_v13 = vld [vmem:[%s9412_s7] sm:$0xff]   ;;  %v8716_v18 = vld [vmem:[%s9412_s7 + $0x48] sm:$0xff]  }
 0x3fb   :  { %6685 = vmatpush1.bf16.msra.mxu0 %v7840_v14  ;;  %6522 = vmatprep.subr.bf16.mxu1 %v7847_v9  ;;  %v7895_v14 = vcombine.high %v3823_v57, %v3827_v58  ;;  %v7897_v9 = vcombine.high %v3824_v33, %v3828_v62 }
 0x3fc   :  { %6686 = vmatprep.subr.bf16.mxu0 %v7849_v61  ;;  %6552 = vmatprep.mubr.bf16.mxu1 %v8961_v0  ;;  %v7894_v61 = vcombine.low %v3823_v57, %v3827_v58  ;;  %v7899_v58 = vld [vmem:[#allocation13] ss:$0 sm:$0xff] }
 0x3fd   :  { %6716 = vmatprep.mubr.bf16.mxu0 %v8961_v0  ;;  %v7873_v0 = vcombine.high %v3800_v32, %v3804_v36 }
 0x3fe   :  { %6523 = vmatpush1.bf16.msra.mxu1 %v7846_v15  ;;  %v8717_v15 = vld [vmem:[%s9412_s7 + $0x8] sm:$0xff]  }
 0x3ff   :  { %6687 = vmatpush1.bf16.msra.mxu0 %v7848_v16  ;;  %6524 = vmatprep.subr.bf16.mxu1 %v7855_v49  ;;  %v8718_v16 = vld [vmem:[%s9412_s7 + $0x50] sm:$0xff]  }
 0x400   :  { %6688 = vmatprep.subr.bf16.mxu0 %v7857_v17  ;;  %v8719_v49 = vld [vmem:[%s9412_s7 + $0x10] sm:$0xff]   ;;  %v8721_v17 = vld [vmem:[%s9412_s7 + $0x18] sm:$0xff]  }
 0x402   :  { %6525 = vmatpush1.bf16.msra.mxu1 %v7854_v24  ;;  %v8726_v24 = vld [vmem:[%s9412_s7 + $0x70] sm:$0xff]  }
 0x403   :  { %6689 = vmatpush1.bf16.msra.mxu0 %v7856_v51  ;;  %6526 = vmatprep.subr.bf16.mxu1 %v7863_v25  ;;  %v8727_v51 = vld [vmem:[%s9412_s7 + $0x30] sm:$0xff]   ;;  %v8728_v25 = vld [vmem:[%s9412_s7 + $0x78] sm:$0xff]  }
 0x404   :  { %6690 = vmatprep.subr.bf16.mxu0 %v7865_v27  ;;  %v8729_v27 = vld [vmem:[%s9412_s7 + $0x38] sm:$0xff]  }
 0x406   :  { %6527 = vmatpush1.bf16.msra.mxu1 %v7862_v2 }
 0x407   :  { %6691 = vmatpush1.bf16.msra.mxu0 %v7864_v37  ;;  %6528 = vmatprep.subr.bf16.mxu1 %v7871_v4  ;;  %v6736_v37 = vrot.slane %v6731_v10, %v3327_v35 }
 0x408   :  { %6692 = vmatprep.subr.bf16.mxu0 %v7873_v0 }
 0x40a   :  { %6529 = vmatpush1.bf16.msra.mxu1 %v7870_v23 }
 0x40b   :  { %6693 = vmatpush1.bf16.msra.mxu0 %v7872_v42  ;;  %6530 = vmatprep.subr.bf16.mxu1 %v7879_v44  ;;  %v7898_v42 = vld.sshfl [vmem:[#allocation2] sm:$0x33 pattern:$0x76325410] }
 0x40c   :  { %v9300_v34 = vpop.f32.mrb[24].mxu1  ;;  %v9302_v11 = vpop.f32.mrb[8].mxu0  ;;  %6694 = vmatprep.subr.bf16.mxu0 %v7881_v30  ;;  %v6756_v47 = vcombine.high %v7898_v42, %v7898_v42 }
 0x40d   :  { %v6725_v59 = vmax.f32 %v9300_v34, %v9302_v11  ;;  %v9306_v52 = vpop.f32.mrb[25].mxu1  ;;  %v9308_v60 = vpop.f32.mrb[9].mxu0  ;;  %v8731_v34 = vld [vmem:[%s9414_s9 + $0x8] sm:$0xff]   ;;  %v8732_v11 = vld [vmem:[%s9414_s9 + $0x10] sm:$0xff]  }
 0x40e   :  { %v6726_v63 = vmax.f32 %v9306_v52, %v9308_v60  ;;  %v6230_v1 = vpop.f32.mrb[26].mxu1  ;;  %v6394_v29 = vpop.f32.mrb[10].mxu0  ;;  %6531 = vmatpush1.bf16.msra.mxu1 %v7878_v53 }
 0x40f   :  { %6695 = vmatpush1.bf16.msra.mxu0 %v7880_v54  ;;  %v6231_v5 = vpop.f32.mrb[27].mxu1  ;;  %v6395_v6 = vpop.f32.mrb[11].mxu0  ;;  %6532 = vmatprep.subr.bf16.mxu1 %v7887_v55  ;;  %v8730_v54 = vld [vmem:[%s9414_s9] sm:$0xff]  }
 0x410   :  { %6696 = vmatprep.subr.bf16.mxu0 %v7889_v56  ;;  %v8733_v56 = vld [vmem:[%s9414_s9 + $0x18] sm:$0xff]   ;;  %v7916_v5 = vld [vmem:[#allocation14] ss:$0 sm:$0xff]  ;;  %s8964_s9 = smov [#allocation16]  }
 0x411   :  { %s7045_s28 = sshll.u32 %s8964_s9, 4  ;;  %s7046_s28 = int_to_ptr.vmem [resolvable:$true] %s7045_s28 }
 0x412   :  { %6533 = vmatpush1.bf16.msra.mxu1 %v7886_v3  ;;  %s8915_s8 = scalar_lea.vmem %s7046_s28, 32  ;;  %p8920_p9 = scmp.lt.s32.totalorder %s7046_s28, %s7046_s28 }
 0x413   :  { %6697 = vmatpush1.bf16.msra.mxu0 %v7888_v7  ;;  %6534 = vmatprep.subr.bf16.mxu1 %v7895_v14  ;;  %p8916_p8 = scmp.ne.s32.totalorder %s7046_s28, %s8915_s8  ;;  %p8921_p10 = scmp.lt.s32.totalorder %s8915_s8, %s8915_s8 }
 0x414   :  { %6698 = vmatprep.subr.bf16.mxu0 %v7897_v9 }
 0x415   :  { %p8922_p11 = por %p8921_p10, %p8920_p9 }
 0x416   :  { %6535 = vmatpush1.bf16.msra.mxu1 %v7894_v61 }
 0x417   :  { %6699 = vmatpush1.bf16.msra.mxu0 %v7896_v38  ;;  %7997 = vmatprep.subr.bf16.mxu1 %v8714_v12  ;;  %p8923_p12 = pnand %p8922_p11, %p8916_p8 }
 0x419   :  { %6553 = vmatmul.mubr.bf16.vlgmr.msra.gmra.mrb[28].mxu1 %v9282_v8 }
 0x41a   :  { %6717 = vmatmul.mubr.bf16.vlgmr.msra.gmra.mrb[12].mxu0 %v9282_v8  ;;  %7998 = vmatpush3.bf16.msra.mxu1 %v8715_v13  ;;  %v8720_v8 = vld [vmem:[%s9412_s7 + $0x58] sm:$0xff]  }
 0x41b   :  { %7999 = vmatprep.subr.bf16.mxu1 %v8716_v18 }
 0x41e   :  { %8000 = vmatpush3.bf16.msra.mxu1 %v8717_v15 }
 0x41f   :  { %8001 = vmatprep.subr.bf16.mxu1 %v8718_v16 }
 0x422   :  { %8002 = vmatpush3.bf16.msra.mxu1 %v8719_v49 }
 0x423   :  { %8003 = vmatprep.subr.bf16.mxu1 %v8720_v8 }
 0x426   :  { %8004 = vmatpush3.bf16.msra.mxu1 %v8721_v17 }
 0x427   :  { %8005 = vmatprep.subr.bf16.mxu1 %v8722_v19 }
 0x42a   :  { %8006 = vmatpush3.bf16.msra.mxu1 %v8723_v21 }
 0x42b   :  { %8007 = vmatprep.subr.bf16.mxu1 %v8724_v41 }
 0x42e   :  { %8008 = vmatpush3.bf16.msra.mxu1 %v8725_v22 }
 0x42f   :  { %8009 = vmatprep.subr.bf16.mxu1 %v8726_v24 }
 0x432   :  { %8010 = vmatpush3.bf16.msra.mxu1 %v8727_v51 }
 0x433   :  { %8011 = vmatprep.subr.bf16.mxu1 %v8728_v25 }
 0x436   :  { %8012 = vmatpush3.bf16.msra.mxu1 %v8729_v27 }
 0x437   :  { %8044 = vmatprep.subr.bf16.mxu1 %v8962_v20 }
 0x4ec   :  { %v6554_v31 = vpop.f32.mrb[28].mxu1 }
 0x4ed   :  { %v6718_v32 = vpop.f32.mrb[12].mxu0  ;;  %v6556_v36 = vpop.f32.mrb[29].mxu1 }
 0x4ee   :  { %v6727_v2 = vmax.f32 %v6554_v31, %v6718_v32  ;;  %v6720_v4 = vpop.f32.mrb[13].mxu0  ;;  %v6558_v0 = vpop.f32.mrb[30].mxu1 }
 0x4ef   :  { %v6728_v39 = vmax.f32 %v6556_v36, %v6720_v4  ;;  %v6722_v46 = vpop.f32.mrb[14].mxu0  ;;  %v6559_v28 = vpop.f32.mrb[31].mxu1 }
 0x4f0   :  { %v6729_v23 = vmax.f32 %v6725_v59, %v6727_v2  ;;  %v6723_v44 = vpop.f32.mrb[15].mxu0 }
 0x4f1   :  { %v6730_v30 = vmax.f32 %v6726_v63, %v6728_v39  ;;  %v6939_v63 = vld [vmem:[#allocation5] sm:$0x3] }
 0x4f2   :  { %v6743_v45 = vadd.f32 %v6736_v37, %v6729_v23 }
 0x4f3   :  { %v6744_v35 = vadd.f32 %v6740_v40, %v6730_v30 }
 0x4f4   :  { %v6745_v48 = vmax.f32 %v6743_v45, 0.0 }
 0x4f5   :  { %v6746_v50 = vmax.f32 %v6744_v35, 0.0 }
 0x4f6   :  { %v6759_v53 = vmul.f32 %v7898_v42, %v6745_v48 }
 0x4f7   :  { %v6760_v26 = vmul.f32 %v6756_v47, %v6746_v50 }
 0x4f8   :  { %v6761_v55 = vpack.c.bf16 %v6759_v53, %v6759_v53 }
 0x4f9   :  { %v6762_v43 = vpack.c.bf16 %v6760_v26, %v6760_v26 }
 0x4fb   :  { %6930 = vmatprep.mubr.bf16.mxu1 %v6762_v43 }
 0x4fc   :  { %6931 = vmatmul.mubr.bf16.vlgmr.msra.gmra.mrb[32].mxu1 %v6761_v55 }
 0x4fd   :  { %8045 = vmatpush3.bf16.msra.mxu1 %v8730_v54  ;;  %8052 = vmatprep.mubr.msk.bf16.mxu1 %vm8963_vm0, %v8962_v20 }
 0x4fe   :  { %8046 = vmatprep.subr.bf16.mxu1 %v8962_v20 }
 0x501   :  { %8047 = vmatpush3.bf16.msra.mxu1 %v8731_v34 }
 0x502   :  { %8048 = vmatprep.subr.bf16.mxu1 %v8962_v20 }
 0x505   :  { %8049 = vmatpush3.bf16.msra.mxu1 %v8732_v11 }
 0x506   :  { %8050 = vmatprep.subr.bf16.mxu1 %v8962_v20 }
 0x509   :  { %8051 = vmatpush3.bf16.msra.mxu1 %v8733_v56 }
 0x5cf   :  { %v8013_v57 = vpop.f32.mrb[32].mxu1 }
 0x5d0   :  { %v8014_v59 = vpop.f32.mrb[33].mxu1 }
 0x5d1   :  { %v8015_v52 = vadd.f32 %v8014_v59, %v8013_v57  ;;  %v8016_v60 = vpop.f32.mrb[34].mxu1 }
 0x5d2   :  { %v8017_v33 = vpop.f32.mrb[35].mxu1 }
 0x5d3   :  { %v6933_v62 = vadd.f32 %v8015_v52, %v7899_v58 }
 0x5d5   :  { %v6938_v1 = vmax.f32 %v6933_v62, 0.0 }
 0x5d7   :  { %v6940_v29 = vmul.f32 %v6939_v63, %v6938_v1 }
 0x5d9   :  { %v6941_v3 = vpack.c.bf16 %v6940_v29, %v6940_v29 }
 0x5db   :  { %8053 = vmatmul.mubr.msk.bf16.vlgmr.msra.gmra.mrb[36].mxu1 %vm6981_vm1, %v6941_v3 }
 0x6ae   :  { %v7019_v20 = vpop.f32.mrb[36].mxu1 }
 0x6af   :  { %v7020_v6 = vadd.f32 %v7916_v5, %v7019_v20  ;;  %v8054_v7 = vpop.f32.mrb[37].mxu1 }
 0x6b0   :  { %v7022_v14 = vpop.f32.mrb[38].mxu1 }
 0x6b1   :  { %v8055_v9 = vpop.f32.mrb[39].mxu1  ;;  %v7026_v61 = vsel %vm7025_vm2, %v7020_v6, -inf }
 0x6b2   :  { %7027 = vmax.xlane.f32.xlu0 %v7026_v61 }
 0x73f   :  { %v7028_v38 = vpop.xlane.xlu0 %7027 }
 0x740   :  { %v7029_v12 = vsub.f32 %v7020_v6, %v7028_v38 }
 0x742   :  { %v7030_v13 = vmul.f32 1.442695, %v7029_v12 }
 0x744   :  { %8734 = vpow2.f32 %v7030_v13 }
 0x74e   :  { %v8735_v18 = vpop.eup %8734 }
 0x74f   :  { %v7032_v15 = vsel %vm7025_vm2, %v8735_v18, 0.0 }
 0x750   :  { %7033 = vadd.xlane.f32.xlu0 %v7032_v15 }
 0x7dd   :  { %v7034_v16 = vpop.xlane.xlu0 %7033 }
 0x7de   :  { %8736 = vlog2.f32 %v7034_v16 }
 0x7e8   :  { %v8737_v49 = vpop.eup %8736 }
 0x7e9   :  { %v7036_v8 = vmul.f32 0.6931472, %v8737_v49 }
 0x7eb   :  { %v7037_v17 = vsub.f32 %v7029_v12, %v7036_v8 }
 0x7ed   :  { %7038 = vst.msk [vmem:[#allocation16] sm:$0x3] %vm7025_vm2, %v7037_v17 }
 0x7ee   :  { %8926 = shalt.err (!%p8923_p12)
}
 0x7ef   :  { %s8927_s30 = scalar_lea.hbm %s9416_s11, 32 }
 0x7f0   :  { %p8928_p13 = scmp.ne.s32.totalorder %s9416_s11, %s8927_s30  ;;  %p8931_p0 = scmp.lt.u32.totalorder %s8927_s30, %s9416_s11 }
 0x7f2   :  { %p8933_p1 = pnand %p8931_p0, %p8928_p13 }
 0x7f4   :  { %8936 = shalt.err (!%p8933_p1)
}
 0x7f5   :  { %7048 = dma.vmem_to_hbm [thread:$0]  %s7046_s28, 32, %s9416_s11, [#allocation4]  }
 0x7f6   :  { %8947 = dma.done.wait [#allocation4], 32  }
 0x7f7   :  { %8948 = vsyncadd [#allocation4], 4294967264 }
 0x7f8   :  { %7052 = vsyncpa [#allocation3], 1 }
 0x7f9   :  { %7053 = vsyncpa [#allocation6], 1 }
 0x7fa   :  { %7054 = vsyncpa [#allocation9], 1 }
 0x7fb   :  { %7055 = vsyncpa [#allocation12], 1 }
 0x7fc   :  { %7056 = vsyncpa [#allocation15], 1 }
 0x7fd   :  { %7057 = vsyncpa [#allocation4], 1 }

</bundles_post_ra>
